<compile_context>
chip_gen: v6e
topology: v6e:2x2x1
jax: 0.10.0
libtpu: 0.0.40
codegen_flags: <defaults>
</compile_context>

<pallas_src>
import functools

import jax
import jax.numpy as jnp
from jax.experimental import pallas as pl
from jax.experimental.pallas import tpu as pltpu


# ---------------------------------------------------------------------------
# Kernel 1: LayerNorm (weight-only, eps=1e-5) + fused QKV projection
# ---------------------------------------------------------------------------
def qkv_proj_kernel(x_ref, g_ref, w_ref, b_ref, qkv_ref):
    # x_ref  : (1, tp, C)  fp32 input rows
    # g_ref  : (1, C)      fp32 layernorm weight
    # w_ref  : (C, 3C)     bf16 fused [Wq*scale | Wk | Wv]
    # b_ref  : (1, 3C)     fp32 fused [bq*scale | bk | bv]
    # qkv_ref: (1, tp, 3C) bf16 output
    x = x_ref[0]
    mean = jnp.mean(x, axis=-1, keepdims=True)
    var = jnp.mean((x - mean) * (x - mean), axis=-1, keepdims=True)
    xn = (x - mean) * jax.lax.rsqrt(var + 1e-5) * g_ref[...]
    qkv = jnp.dot(xn.astype(jnp.bfloat16), w_ref[...],
                  preferred_element_type=jnp.float32) + b_ref[...]
    qkv_ref[0] = qkv.astype(jnp.bfloat16)


# ---------------------------------------------------------------------------
# Kernel 2: flash-style attention (online softmax over key blocks)
#           + output projection + residual
# ---------------------------------------------------------------------------
def attention_kernel(x_ref, q_ref, k_ref, v_ref, wp_ref, bp_ref, o_ref,
                     m_sc, l_sc, acc_sc, *, seq_len, seq_pad):
    # x_ref : (1, tq, C) fp32 raw rows (residual)      q_ref : (1, tq, C) bf16
    # k_ref : (1, tk, C) bf16                          v_ref : (1, tk, C) bf16
    # wp_ref: (C, C) bf16     bp_ref: (1, C) fp32      o_ref : (1, tq, C) fp32
    # m_sc/l_sc: (tq, 1) fp32, acc_sc: (tq, C) fp32 — carried across key blocks only
    kv = pl.program_id(2)
    tk = k_ref.shape[1]

    @pl.when(kv == 0)
    def _():
        m_sc[...] = jnp.full(m_sc.shape, -jnp.inf, jnp.float32)
        l_sc[...] = jnp.zeros(l_sc.shape, jnp.float32)
        acc_sc[...] = jnp.zeros(acc_sc.shape, jnp.float32)

    # NT score matmul: contract channel dim of Q and K directly (no XLU transpose).
    # Softmax scale is already folded into Q (weight-side, in the wrapper).
    s = jax.lax.dot_general(q_ref[0], k_ref[0],
                            dimension_numbers=(((1,), (1,)), ((), ())),
                            preferred_element_type=jnp.float32)          # (tq, tk)

    if seq_pad != seq_len:   # static Python condition: only traced when S was padded
        col = jax.lax.broadcasted_iota(jnp.int32, s.shape, 1) + kv * tk
        s = jnp.where(col < seq_len, s, -1e30)                           # mask pad keys

    # Online softmax update (fp32 statistics).
    m_prev = m_sc[...]
    m_new = jnp.maximum(m_prev, jnp.max(s, axis=-1, keepdims=True))
    alpha = jnp.exp(m_prev - m_new)
    p = jnp.exp(s - m_new)
    l_sc[...] = alpha * l_sc[...] + jnp.sum(p, axis=-1, keepdims=True)
    acc_sc[...] = alpha * acc_sc[...] + jnp.dot(
        p.astype(jnp.bfloat16), v_ref[0], preferred_element_type=jnp.float32)
    m_sc[...] = m_new

    @pl.when(kv == pl.num_programs(2) - 1)
    def _():
        attn = acc_sc[...] * pl.reciprocal(l_sc[...], approx=True)       # (tq, C)
        out = jnp.dot(attn.astype(jnp.bfloat16), wp_ref[...],
                      preferred_element_type=jnp.float32) + bp_ref[...]
        o_ref[0] = x_ref[0] + out          # residual on the raw (pre-norm) input rows


# ---------------------------------------------------------------------------
# Wrapper
# ---------------------------------------------------------------------------
@functools.partial(jax.jit, static_argnames=("tq", "tk"))
def attention_block(x_nchw, norm_w, w_qkv, b_qkv, w_proj, b_proj, *, tq=256, tk=256):
    """x_nchw: (B, C, H, W) fp32.  Linear weights given as (in, out).  Returns NCHW fp32.

    tq/tk = query / key tile sizes.  Defaults (256) fill the v6e/v7x MXU; use 128 on v5e.
    """
    b, c, h, w = x_nchw.shape
    s = h * w
    assert c % 128 == 0, "channel dim must be a multiple of 128 (lane axis)"
    assert tq % 8 == 0 and tk % 8 == 0

    # Pad S up to a tile multiple (replaces the old `tq = s` fallback); padded key
    # columns are masked inside the kernel, padded query rows dropped below.
    tile = max(tq, tk)
    s_pad = ((s + tile - 1) // tile) * tile

    # NCHW -> (B, S, C); channels on the lane axis.
    x_flat = jnp.transpose(x_nchw, (0, 2, 3, 1)).reshape(b, s, c)
    if s_pad != s:
        x_flat = jnp.pad(x_flat, ((0, 0), (0, s_pad - s), (0, 0)))

    # Fold 1/sqrt(C) softmax scale into the Q columns of the fused qkv weight & bias.
    scale = float(c) ** -0.5
    w_fused = jnp.concatenate([w_qkv[:, :c] * scale, w_qkv[:, c:]],
                              axis=-1).astype(jnp.bfloat16)               # (C, 3C)
    b_fused = jnp.concatenate([b_qkv[:c] * scale, b_qkv[c:]]
                              ).reshape(1, 3 * c).astype(jnp.float32)     # (1, 3C)
    g2 = norm_w.reshape(1, c).astype(jnp.float32)
    w_p = w_proj.astype(jnp.bfloat16)
    b_p = b_proj.reshape(1, c).astype(jnp.float32)

    nq = s_pad // tq
    nk = s_pad // tk

    # ---- kernel 1: layernorm + fused QKV projection (fully parallel grid) --------
    qkv = pl.pallas_call(
        qkv_proj_kernel,
        out_shape=jax.ShapeDtypeStruct((b, s_pad, 3 * c), jnp.bfloat16),
        grid_spec=pltpu.PrefetchScalarGridSpec(
            num_scalar_prefetch=0,
            grid=(b, nq),
            in_specs=[
                pl.BlockSpec((1, tq, c), lambda bi, ti: (bi, ti, 0)),      # x rows
                pl.BlockSpec((1, c), lambda bi, ti: (0, 0)),               # norm weight
                pl.BlockSpec((c, 3 * c), lambda bi, ti: (0, 0)),           # fused Wqkv
                pl.BlockSpec((1, 3 * c), lambda bi, ti: (0, 0)),           # fused bqkv
            ],
            out_specs=pl.BlockSpec((1, tq, 3 * c), lambda bi, ti: (bi, ti, 0)),
        ),
        compiler_params=pltpu.CompilerParams(
            dimension_semantics=("parallel", "parallel"),
            vmem_limit_bytes=32 * 1024 * 1024,
        ),
    )(x_flat, g2, w_fused, b_fused)

    # ---- kernel 2: flash attention + out-proj + residual -------------------------
    # q / k / v are lane-aligned column blocks 0 / 1 / 2 of the same qkv array.
    kernel = functools.partial(attention_kernel, seq_len=s, seq_pad=s_pad)
    out_flat = pl.pallas_call(
        kernel,
        out_shape=jax.ShapeDtypeStruct((b, s_pad, c), jnp.float32),
        grid_spec=pltpu.PrefetchScalarGridSpec(
            num_scalar_prefetch=0,
            grid=(b, nq, nk),
            in_specs=[
                pl.BlockSpec((1, tq, c), lambda bi, qi, ki: (bi, qi, 0)),  # x (residual)
                pl.BlockSpec((1, tq, c), lambda bi, qi, ki: (bi, qi, 0)),  # Q tile
                pl.BlockSpec((1, tk, c), lambda bi, qi, ki: (bi, ki, 1)),  # K block
                pl.BlockSpec((1, tk, c), lambda bi, qi, ki: (bi, ki, 2)),  # V block
                pl.BlockSpec((c, c), lambda bi, qi, ki: (0, 0)),           # W_proj
                pl.BlockSpec((1, c), lambda bi, qi, ki: (0, 0)),           # b_proj
            ],
            out_specs=pl.BlockSpec((1, tq, c), lambda bi, qi, ki: (bi, qi, 0)),
            scratch_shapes=[
                pltpu.VMEM((tq, 1), jnp.float32),    # running max
                pltpu.VMEM((tq, 1), jnp.float32),    # running denom
                pltpu.VMEM((tq, c), jnp.float32),    # running accumulator
            ],
        ),
        compiler_params=pltpu.CompilerParams(
            # No carry across batch or q-tile axes -> both parallel (2x on v7x, B=1);
            # only the key-block (online-softmax) axis is sequential.
            dimension_semantics=("parallel", "parallel", "arbitrary"),
            vmem_limit_bytes=32 * 1024 * 1024,
        ),
    )(x_flat, qkv, qkv, qkv, w_p, b_p)

    out_flat = out_flat[:, :s, :]                      # drop padded query rows
    return jnp.transpose(out_flat.reshape(b, h, w, c), (0, 3, 1, 2))


# ---------------------------------------------------------------------------
# Pure-JAX reference (mirrors the PyTorch module in fp32)
# ---------------------------------------------------------------------------
def reference(x_nchw, norm_w, w_qkv, b_qkv, w_proj, b_proj):
    b, c, h, w = x_nchw.shape
    xf = jnp.transpose(x_nchw, (0, 2, 3, 1)).reshape(b, h * w, c)
    mean = jnp.mean(xf, axis=-1, keepdims=True)
    var = jnp.mean((xf - mean) ** 2, axis=-1, keepdims=True)
    xn = (xf - mean) / jnp.sqrt(var + 1e-5) * norm_w
    qkv = xn @ w_qkv + b_qkv
    q, k, v = qkv[..., :c], qkv[..., c:2 * c], qkv[..., 2 * c:]
    attn = jax.nn.softmax(jnp.einsum("bqc,bkc->bqk", q, k) * (c ** -0.5), axis=-1)
    out = jnp.einsum("bqk,bkc->bqc", attn, v) @ w_proj + b_proj
    out = xf + out
    return jnp.transpose(out.reshape(b, h, w, c), (0, 3, 1, 2))


if __name__ == "__main__":
    key = jax.random.PRNGKey(0)
    # C = 128 keeps the channel/lane axis lane-dense (realistic VAE attention widths
    # are 128/256/512); H*W = 256 spatial tokens -> one 256-row query/key tile.
    B, C, H, W = 2, 128, 16, 16

    k_x, k_wqkv, k_bqkv, k_wproj, k_bproj = jax.random.split(key, 5)
    x = jax.random.normal(k_x, (B, C, H, W), dtype=jnp.float32)

    # Deterministic parameter init (shapes from nn.Parameter / nn.Linear in __init__);
    # weights stored as (in_features, out_features) so the kernels compute x @ W + b.
    norm_w = jnp.ones((C,), dtype=jnp.float32)
    lim = 1.0 / (C ** 0.5)
    w_qkv = jax.random.uniform(k_wqkv, (C, 3 * C), jnp.float32, -lim, lim)
    b_qkv = jax.random.uniform(k_bqkv, (3 * C,), jnp.float32, -lim, lim)
    w_proj = jax.random.uniform(k_wproj, (C, C), jnp.float32, -lim, lim)
    b_proj = jax.random.uniform(k_bproj, (C,), jnp.float32, -lim, lim)

    out = attention_block(x, norm_w, w_qkv, b_qkv, w_proj, b_proj)
    out = jax.block_until_ready(out)

    ref = reference(x, norm_w, w_qkv, b_qkv, w_proj, b_proj)
    assert out.shape == (B, C, H, W)
    # bf16 matmul operands + approx reciprocal vs fp32 reference -> relaxed tolerance
    assert jnp.allclose(out, ref, atol=2e-2, rtol=2e-2), "mismatch vs reference"

    print("KERNEL_OK")
</pallas_src>

<mosaic_0001>
module attributes {stable_mosaic.version = 11 : i64} {
  func.func @qkv_proj_kernel(%arg0: i32, %arg1: i32, %arg2: memref<1x256x128xf32, #tpu.memory_space<vmem>>, %arg3: memref<1x128xf32, #tpu.memory_space<vmem>>, %arg4: memref<128x384xbf16, #tpu.memory_space<vmem>>, %arg5: memref<1x384xf32, #tpu.memory_space<vmem>>, %arg6: memref<1x256x384xbf16, #tpu.memory_space<vmem>>) attributes {dimension_semantics = [#tpu.dimension_semantics<parallel>, #tpu.dimension_semantics<parallel>], iteration_bounds = array<i64: 2, 1>, scalar_prefetch = 0 : i64, scratch_operands = 0 : i64, tpu.core_type = #tpu.core_type<tc>, window_params = [{transform_indices = @transform_0, window_bounds = array<i64: 1, 256, 128>}, {pipeline_mode = #tpu.pipeline_mode<synchronous>, transform_indices = @transform_1, window_bounds = array<i64: 1, 128>}, {pipeline_mode = #tpu.pipeline_mode<synchronous>, transform_indices = @transform_2, window_bounds = array<i64: 128, 384>}, {pipeline_mode = #tpu.pipeline_mode<synchronous>, transform_indices = @transform_3, window_bounds = array<i64: 1, 384>}, {transform_indices = @transform_4, window_bounds = array<i64: 1, 256, 384>}]} {
    %c0 = arith.constant 0 : index
    %c0_0 = arith.constant 0 : index
    %c0_1 = arith.constant 0 : index
    %0 = vector.load %arg2[%c0, %c0_0, %c0_1] : memref<1x256x128xf32, #tpu.memory_space<vmem>>, vector<1x256x128xf32>
    %1 = vector.shape_cast %0 : vector<1x256x128xf32> to vector<256x128xf32>
    %cst = arith.constant dense<0.000000e+00> : vector<256xf32>
    %2 = vector.multi_reduction <add>, %1, %cst [1] : vector<256x128xf32> to vector<256xf32>
    %3 = vector.shape_cast %2 : vector<256xf32> to vector<256x1xf32>
    %cst_2 = arith.constant 1.280000e+02 : f32
    %4 = vector.broadcast %cst_2 : f32 to vector<256x1xf32>
    %5 = arith.divf %3, %4 : vector<256x1xf32>
    %6 = vector.broadcast %5 : vector<256x1xf32> to vector<256x128xf32>
    %7 = arith.subf %1, %6 : vector<256x128xf32>
    %8 = vector.broadcast %5 : vector<256x1xf32> to vector<256x128xf32>
    %9 = arith.subf %1, %8 : vector<256x128xf32>
    %10 = arith.mulf %7, %9 : vector<256x128xf32>
    %cst_3 = arith.constant dense<0.000000e+00> : vector<256xf32>
    %11 = vector.multi_reduction <add>, %10, %cst_3 [1] : vector<256x128xf32> to vector<256xf32>
    %12 = vector.shape_cast %11 : vector<256xf32> to vector<256x1xf32>
    %cst_4 = arith.constant 1.280000e+02 : f32
    %13 = vector.broadcast %cst_4 : f32 to vector<256x1xf32>
    %14 = arith.divf %12, %13 : vector<256x1xf32>
    %15 = vector.broadcast %5 : vector<256x1xf32> to vector<256x128xf32>
    %16 = arith.subf %1, %15 : vector<256x128xf32>
    %cst_5 = arith.constant 9.99999974E-6 : f32
    %17 = vector.broadcast %cst_5 : f32 to vector<256x1xf32>
    %18 = arith.addf %14, %17 : vector<256x1xf32>
    %19 = math.rsqrt %18 : vector<256x1xf32>
    %20 = vector.broadcast %19 : vector<256x1xf32> to vector<256x128xf32>
    %21 = arith.mulf %16, %20 : vector<256x128xf32>
    %c0_6 = arith.constant 0 : index
    %c0_7 = arith.constant 0 : index
    %22 = vector.load %arg3[%c0_6, %c0_7] : memref<1x128xf32, #tpu.memory_space<vmem>>, vector<1x128xf32>
    %23 = vector.broadcast %22 : vector<1x128xf32> to vector<256x128xf32>
    %24 = arith.mulf %21, %23 : vector<256x128xf32>
    %25 = arith.truncf %24 : vector<256x128xf32> to vector<256x128xbf16>
    %c0_8 = arith.constant 0 : index
    %c0_9 = arith.constant 0 : index
    %26 = vector.load %arg4[%c0_8, %c0_9] : memref<128x384xbf16, #tpu.memory_space<vmem>>, vector<128x384xbf16>
    %cst_10 = arith.constant dense<0.000000e+00> : vector<256x384xf32>
    %27 = tpu.matmul %25, %26, %cst_10 {dimension_numbers = #tpu.dot_dimension_numbers<[1], [0], [0], [1], [0, 0, 1, 1], [], []>} : vector<256x128xbf16>, vector<128x384xbf16>, vector<256x384xf32> -> vector<256x384xf32>
    %c0_11 = arith.constant 0 : index
    %c0_12 = arith.constant 0 : index
    %28 = vector.load %arg5[%c0_11, %c0_12] : memref<1x384xf32, #tpu.memory_space<vmem>>, vector<1x384xf32>
    %29 = vector.broadcast %28 : vector<1x384xf32> to vector<256x384xf32>
    %30 = arith.addf %27, %29 : vector<256x384xf32>
    %31 = arith.truncf %30 : vector<256x384xf32> to vector<256x384xbf16>
    %c0_13 = arith.constant 0 : index
    %c0_14 = arith.constant 0 : index
    %c0_15 = arith.constant 0 : index
    %32 = vector.load %arg6[%c0_13, %c0_14, %c0_15] : memref<1x256x384xbf16, #tpu.memory_space<vmem>>, vector<1x256x384xbf16>
    %33 = vector.shape_cast %32 : vector<1x256x384xbf16> to vector<256x384xbf16>
    %34 = vector.shape_cast %31 : vector<256x384xbf16> to vector<1x256x384xbf16>
    tpu.vector_store %arg6[%c0_13, %c0_14, %c0_15], %34 {strides = array<i32>} : memref<1x256x384xbf16, #tpu.memory_space<vmem>>, vector<1x256x384xbf16>,
    return
  }
  func.func @transform_0(%arg0: i32, %arg1: i32) -> (i32, i32, i32) {
    %c0_i32 = arith.constant 0 : i32
    %c0_i32_0 = arith.constant 0 : i32
    return %arg0, %arg1, %c0_i32 : i32, i32, i32
  }
  func.func @transform_1(%arg0: i32, %arg1: i32) -> (i32, i32) {
    %c0_i32 = arith.constant 0 : i32
    %c0_i32_0 = arith.constant 0 : i32
    %c0_i32_1 = arith.constant 0 : i32
    return %c0_i32, %c0_i32_0 : i32, i32
  }
  func.func @transform_2(%arg0: i32, %arg1: i32) -> (i32, i32) {
    %c0_i32 = arith.constant 0 : i32
    %c0_i32_0 = arith.constant 0 : i32
    %c0_i32_1 = arith.constant 0 : i32
    return %c0_i32, %c0_i32_0 : i32, i32
  }
  func.func @transform_3(%arg0: i32, %arg1: i32) -> (i32, i32) {
    %c0_i32 = arith.constant 0 : i32
    %c0_i32_0 = arith.constant 0 : i32
    %c0_i32_1 = arith.constant 0 : i32
    return %c0_i32, %c0_i32_0 : i32, i32
  }
  func.func @transform_4(%arg0: i32, %arg1: i32) -> (i32, i32, i32) {
    %c0_i32 = arith.constant 0 : i32
    %c0_i32_0 = arith.constant 0 : i32
    return %arg0, %arg1, %c0_i32 : i32, i32, i32
  }
}

module attributes {stable_mosaic.version = 11 : i64} {
  func.func @attention_kernel(%arg0: i32, %arg1: i32, %arg2: i32, %arg3: memref<1x256x128xf32, #tpu.memory_space<vmem>>, %arg4: memref<1x256x128xbf16, #tpu.memory_space<vmem>>, %arg5: memref<1x256x128xbf16, #tpu.memory_space<vmem>>, %arg6: memref<1x256x128xbf16, #tpu.memory_space<vmem>>, %arg7: memref<128x128xbf16, #tpu.memory_space<vmem>>, %arg8: memref<1x128xf32, #tpu.memory_space<vmem>>, %arg9: memref<1x256x128xf32, #tpu.memory_space<vmem>>, %arg10: memref<256x1xf32, #tpu.memory_space<vmem>>, %arg11: memref<256x1xf32, #tpu.memory_space<vmem>>, %arg12: memref<256x128xf32, #tpu.memory_space<vmem>>) attributes {dimension_semantics = [#tpu.dimension_semantics<parallel>, #tpu.dimension_semantics<parallel>, #tpu.dimension_semantics<arbitrary>], iteration_bounds = array<i64: 2, 1, 1>, scalar_prefetch = 0 : i64, scratch_operands = 3 : i64, tpu.core_type = #tpu.core_type<tc>, window_params = [{transform_indices = @transform_0, window_bounds = array<i64: 1, 256, 128>}, {transform_indices = @transform_1, window_bounds = array<i64: 1, 256, 128>}, {transform_indices = @transform_2, window_bounds = array<i64: 1, 256, 128>}, {transform_indices = @transform_3, window_bounds = array<i64: 1, 256, 128>}, {pipeline_mode = #tpu.pipeline_mode<synchronous>, transform_indices = @transform_4, window_bounds = array<i64: 128, 128>}, {pipeline_mode = #tpu.pipeline_mode<synchronous>, transform_indices = @transform_5, window_bounds = array<i64: 1, 128>}, {transform_indices = @transform_6, window_bounds = array<i64: 1, 256, 128>}]} {
    %c0_i32 = arith.constant 0 : i32
    %0 = arith.cmpi eq, %arg2, %c0_i32 : i32
    %1 = arith.extui %0 : i1 to i32
    %c0_i32_0 = arith.constant 0 : i32
    %2 = arith.cmpi ne, %1, %c0_i32_0 : i32
    scf.if %2 {
      %cst_26 = arith.constant 0xFF800000 : f32
      %36 = vector.broadcast %cst_26 : f32 to vector<256x1xf32>
      %c0_27 = arith.constant 0 : index
      %c0_28 = arith.constant 0 : index
      %37 = vector.load %arg10[%c0_27, %c0_28] : memref<256x1xf32, #tpu.memory_space<vmem>>, vector<256x1xf32>
      tpu.vector_store %arg10[%c0_27, %c0_28], %36 {strides = array<i32>} : memref<256x1xf32, #tpu.memory_space<vmem>>, vector<256x1xf32>,
      %cst_29 = arith.constant 0.000000e+00 : f32
      %38 = vector.broadcast %cst_29 : f32 to vector<256x1xf32>
      %c0_30 = arith.constant 0 : index
      %c0_31 = arith.constant 0 : index
      %39 = vector.load %arg11[%c0_30, %c0_31] : memref<256x1xf32, #tpu.memory_space<vmem>>, vector<256x1xf32>
      tpu.vector_store %arg11[%c0_30, %c0_31], %38 {strides = array<i32>} : memref<256x1xf32, #tpu.memory_space<vmem>>, vector<256x1xf32>,
      %cst_32 = arith.constant 0.000000e+00 : f32
      %40 = vector.broadcast %cst_32 : f32 to vector<256x128xf32>
      %c0_33 = arith.constant 0 : index
      %c0_34 = arith.constant 0 : index
      %41 = vector.load %arg12[%c0_33, %c0_34] : memref<256x128xf32, #tpu.memory_space<vmem>>, vector<256x128xf32>
      tpu.vector_store %arg12[%c0_33, %c0_34], %40 {strides = array<i32>} : memref<256x128xf32, #tpu.memory_space<vmem>>, vector<256x128xf32>,
    } else {
    }
    %c0 = arith.constant 0 : index
    %c0_1 = arith.constant 0 : index
    %c0_2 = arith.constant 0 : index
    %3 = vector.load %arg4[%c0, %c0_1, %c0_2] : memref<1x256x128xbf16, #tpu.memory_space<vmem>>, vector<1x256x128xbf16>
    %4 = vector.shape_cast %3 : vector<1x256x128xbf16> to vector<256x128xbf16>
    %c0_3 = arith.constant 0 : index
    %c0_4 = arith.constant 0 : index
    %c0_5 = arith.constant 0 : index
    %5 = vector.load %arg5[%c0_3, %c0_4, %c0_5] : memref<1x256x128xbf16, #tpu.memory_space<vmem>>, vector<1x256x128xbf16>
    %6 = vector.shape_cast %5 : vector<1x256x128xbf16> to vector<256x128xbf16>
    %cst = arith.constant dense<0.000000e+00> : vector<256x256xf32>
    %7 = tpu.matmul %4, %6, %cst {dimension_numbers = #tpu.dot_dimension_numbers<[1], [1], [0], [0], [0, 0, 1, 0], [], []>} : vector<256x128xbf16>, vector<256x128xbf16>, vector<256x256xf32> -> vector<256x256xf32>
    %c0_6 = arith.constant 0 : index
    %c0_7 = arith.constant 0 : index
    %8 = vector.load %arg10[%c0_6, %c0_7] : memref<256x1xf32, #tpu.memory_space<vmem>>, vector<256x1xf32>
    %cst_8 = arith.constant dense<0xFF800000> : vector<256xf32>
    %9 = vector.multi_reduction <maximumf>, %7, %cst_8 [1] : vector<256x256xf32> to vector<256xf32>
    %10 = vector.shape_cast %9 : vector<256xf32> to vector<256x1xf32>
    %11 = arith.maximumf %8, %10 : vector<256x1xf32>
    %12 = arith.subf %8, %11 : vector<256x1xf32>
    %13 = math.exp %12 : vector<256x1xf32>
    %14 = vector.broadcast %11 : vector<256x1xf32> to vector<256x256xf32>
    %15 = arith.subf %7, %14 : vector<256x256xf32>
    %16 = math.exp %15 : vector<256x256xf32>
    %c0_9 = arith.constant 0 : index
    %c0_10 = arith.constant 0 : index
    %17 = vector.load %arg11[%c0_9, %c0_10] : memref<256x1xf32, #tpu.memory_space<vmem>>, vector<256x1xf32>
    %18 = arith.mulf %13, %17 : vector<256x1xf32>
    %cst_11 = arith.constant dense<0.000000e+00> : vector<256xf32>
    %19 = vector.multi_reduction <add>, %16, %cst_11 [1] : vector<256x256xf32> to vector<256xf32>
    %20 = vector.shape_cast %19 : vector<256xf32> to vector<256x1xf32>
    %21 = arith.addf %18, %20 : vector<256x1xf32>
    %c0_12 = arith.constant 0 : index
    %c0_13 = arith.constant 0 : index
    %22 = vector.load %arg11[%c0_12, %c0_13] : memref<256x1xf32, #tpu.memory_space<vmem>>, vector<256x1xf32>
    tpu.vector_store %arg11[%c0_12, %c0_13], %21 {strides = array<i32>} : memref<256x1xf32, #tpu.memory_space<vmem>>, vector<256x1xf32>,
    %c0_14 = arith.constant 0 : index
    %c0_15 = arith.constant 0 : index
    %23 = vector.load %arg12[%c0_14, %c0_15] : memref<256x128xf32, #tpu.memory_space<vmem>>, vector<256x128xf32>
    %24 = vector.broadcast %13 : vector<256x1xf32> to vector<256x128xf32>
    %25 = arith.mulf %24, %23 : vector<256x128xf32>
    %26 = arith.truncf %16 : vector<256x256xf32> to vector<256x256xbf16>
    %c0_16 = arith.constant 0 : index
    %c0_17 = arith.constant 0 : index
    %c0_18 = arith.constant 0 : index
    %27 = vector.load %arg6[%c0_16, %c0_17, %c0_18] : memref<1x256x128xbf16, #tpu.memory_space<vmem>>, vector<1x256x128xbf16>
    %28 = vector.shape_cast %27 : vector<1x256x128xbf16> to vector<256x128xbf16>
    %cst_19 = arith.constant dense<0.000000e+00> : vector<256x128xf32>
    %29 = tpu.matmul %26, %28, %cst_19 {dimension_numbers = #tpu.dot_dimension_numbers<[1], [0], [0], [1], [0, 0, 1, 1], [], []>} : vector<256x256xbf16>, vector<256x128xbf16>, vector<256x128xf32> -> vector<256x128xf32>
    %30 = arith.addf %25, %29 : vector<256x128xf32>
    %c0_20 = arith.constant 0 : index
    %c0_21 = arith.constant 0 : index
    %31 = vector.load %arg12[%c0_20, %c0_21] : memref<256x128xf32, #tpu.memory_space<vmem>>, vector<256x128xf32>
    tpu.vector_store %arg12[%c0_20, %c0_21], %30 {strides = array<i32>} : memref<256x128xf32, #tpu.memory_space<vmem>>, vector<256x128xf32>,
    %c0_22 = arith.constant 0 : index
    %c0_23 = arith.constant 0 : index
    %32 = vector.load %arg10[%c0_22, %c0_23] : memref<256x1xf32, #tpu.memory_space<vmem>>, vector<256x1xf32>
    tpu.vector_store %arg10[%c0_22, %c0_23], %11 {strides = array<i32>} : memref<256x1xf32, #tpu.memory_space<vmem>>, vector<256x1xf32>,
    %c0_i32_24 = arith.constant 0 : i32
    %33 = arith.cmpi eq, %arg2, %c0_i32_24 : i32
    %34 = arith.extui %33 : i1 to i32
    %c0_i32_25 = arith.constant 0 : i32
    %35 = arith.cmpi ne, %34, %c0_i32_25 : i32
    scf.if %35 {
      %c0_26 = arith.constant 0 : index
      %c0_27 = arith.constant 0 : index
      %36 = vector.load %arg12[%c0_26, %c0_27] : memref<256x128xf32, #tpu.memory_space<vmem>>, vector<256x128xf32>
      %c0_28 = arith.constant 0 : index
      %c0_29 = arith.constant 0 : index
      %37 = vector.load %arg11[%c0_28, %c0_29] : memref<256x1xf32, #tpu.memory_space<vmem>>, vector<256x1xf32>
      %38 = tpu.reciprocal %37 {approx = true} : vector<256x1xf32> -> vector<256x1xf32>
      %39 = vector.broadcast %38 : vector<256x1xf32> to vector<256x128xf32>
      %40 = arith.mulf %36, %39 : vector<256x128xf32>
      %41 = arith.truncf %40 : vector<256x128xf32> to vector<256x128xbf16>
      %c0_30 = arith.constant 0 : index
      %c0_31 = arith.constant 0 : index
      %42 = vector.load %arg7[%c0_30, %c0_31] : memref<128x128xbf16, #tpu.memory_space<vmem>>, vector<128x128xbf16>
      %cst_32 = arith.constant dense<0.000000e+00> : vector<256x128xf32>
      %43 = tpu.matmul %41, %42, %cst_32 {dimension_numbers = #tpu.dot_dimension_numbers<[1], [0], [0], [1], [0, 0, 1, 1], [], []>} : vector<256x128xbf16>, vector<128x128xbf16>, vector<256x128xf32> -> vector<256x128xf32>
      %c0_33 = arith.constant 0 : index
      %c0_34 = arith.constant 0 : index
      %44 = vector.load %arg8[%c0_33, %c0_34] : memref<1x128xf32, #tpu.memory_space<vmem>>, vector<1x128xf32>
      %45 = vector.broadcast %44 : vector<1x128xf32> to vector<256x128xf32>
      %46 = arith.addf %43, %45 : vector<256x128xf32>
      %c0_35 = arith.constant 0 : index
      %c0_36 = arith.constant 0 : index
      %c0_37 = arith.constant 0 : index
      %47 = vector.load %arg3[%c0_35, %c0_36, %c0_37] : memref<1x256x128xf32, #tpu.memory_space<vmem>>, vector<1x256x128xf32>
      %48 = vector.shape_cast %47 : vector<1x256x128xf32> to vector<256x128xf32>
      %49 = arith.addf %48, %46 : vector<256x128xf32>
      %c0_38 = arith.constant 0 : index
      %c0_39 = arith.constant 0 : index
      %c0_40 = arith.constant 0 : index
      %50 = vector.load %arg9[%c0_38, %c0_39, %c0_40] : memref<1x256x128xf32, #tpu.memory_space<vmem>>, vector<1x256x128xf32>
      %51 = vector.shape_cast %50 : vector<1x256x128xf32> to vector<256x128xf32>
      %52 = vector.shape_cast %49 : vector<256x128xf32> to vector<1x256x128xf32>
      tpu.vector_store %arg9[%c0_38, %c0_39, %c0_40], %52 {strides = array<i32>} : memref<1x256x128xf32, #tpu.memory_space<vmem>>, vector<1x256x128xf32>,
    } else {
    }
    return
  }
  func.func @transform_0(%arg0: i32, %arg1: i32, %arg2: i32) -> (i32, i32, i32) {
    %c0_i32 = arith.constant 0 : i32
    %c0_i32_0 = arith.constant 0 : i32
    return %arg0, %arg1, %c0_i32 : i32, i32, i32
  }
  func.func @transform_1(%arg0: i32, %arg1: i32, %arg2: i32) -> (i32, i32, i32) {
    %c0_i32 = arith.constant 0 : i32
    %c0_i32_0 = arith.constant 0 : i32
    return %arg0, %arg1, %c0_i32 : i32, i32, i32
  }
  func.func @transform_2(%arg0: i32, %arg1: i32, %arg2: i32) -> (i32, i32, i32) {
    %c1_i32 = arith.constant 1 : i32
    %c0_i32 = arith.constant 0 : i32
    return %arg0, %arg2, %c1_i32 : i32, i32, i32
  }
  func.func @transform_3(%arg0: i32, %arg1: i32, %arg2: i32) -> (i32, i32, i32) {
    %c2_i32 = arith.constant 2 : i32
    %c0_i32 = arith.constant 0 : i32
    return %arg0, %arg2, %c2_i32 : i32, i32, i32
  }
  func.func @transform_4(%arg0: i32, %arg1: i32, %arg2: i32) -> (i32, i32) {
    %c0_i32 = arith.constant 0 : i32
    %c0_i32_0 = arith.constant 0 : i32
    %c0_i32_1 = arith.constant 0 : i32
    return %c0_i32, %c0_i32_0 : i32, i32
  }
  func.func @transform_5(%arg0: i32, %arg1: i32, %arg2: i32) -> (i32, i32) {
    %c0_i32 = arith.constant 0 : i32
    %c0_i32_0 = arith.constant 0 : i32
    %c0_i32_1 = arith.constant 0 : i32
    return %c0_i32, %c0_i32_0 : i32, i32
  }
  func.func @transform_6(%arg0: i32, %arg1: i32, %arg2: i32) -> (i32, i32, i32) {
    %c0_i32 = arith.constant 0 : i32
    %c0_i32_0 = arith.constant 0 : i32
    return %arg0, %arg1, %c0_i32 : i32, i32, i32
  }
}

</mosaic_0001>

<bundles_post_ra>
// kernel: attention_block.2
= control target key start
LH: loop header
LB: loop body
LE: loop exit
PB: predicated region body
PF: predicated region fallthrough
CT: control target
= control target key end

     0   :  { %s2112_s15 = smov 0   ;;  %s2114_s16 = smov 0   ;;  %s2813_s0 = inlined_call_operand.vmem [shape: f32[2,256,128], index: 0, kind: input, shape index: {}]   ;;  %s2814_s1 = inlined_call_operand.vmem [shape: f32[1,128], index: 1, kind: input, shape index: {}]   ;;  %s2815_s2 = inlined_call_operand.vmem [shape: bf16[128,384], index: 2, kind: input, shape index: {}]   ;;  %s2816_s3 = inlined_call_operand.vmem [shape: f32[1,384], index: 3, kind: input, shape index: {}]   ;;  %s2817_s4 = inlined_call_operand.vmem [shape: bf16[2,256,384], index: 4, kind: output, shape index: {}]  }
   0x1   :  { %s2116_s17 = smov 0  }
   0x2 LB: > { %s26_s18 = sadd.s32 1, %s2080_s16  ;;  %p1692_p0 = scmp.ge.s32.totalorder %s2084_s17, 1  ;;  %s2084_s17 = sphi %s2116_s17, %s14_s17   ;;  %s2080_s16 = sphi %s2114_s16, %s2819_s16   ;;  %s2076_s15 = sphi %s2112_s15, %s2818_s15  }
   0x3   : > { %p28_p1 = scmp.ge.s32.totalorder %s26_s18, 2  ;;  %p183_p2 = scmp.lt.s32.totalorder %s2084_s17, 3 }
   0x5   : > { %s2821_s18 = smov (%p28_p1, %s26_s18), 0  ;;  %p184_p3 = pnand %p1692_p0, %p183_p2 }
   0x6   : > { %p219_p4 = scmp.lt.s32.totalorder (!%p184_p3), %s2076_s15, 1 }
   0x7   : > { %187 = sbr.rel (%p184_p3) target bundleno = 622 (0x26e), region = 36 }
   0xc   : > { %s2823_s15 = smov (!%p219_p4, %s2076_s15), 1  ;;  %v1966_v32 = vld [vmem:[%s2815_s2 + $0xac] ss:$12 sps:$4 sm:$0xff]   ;;  %v1968_v33 = vld [vmem:[%s2815_s2 + $0xa8] ss:$12 sps:$4 sm:$0xff]  }
   0xd   : > { %s1787_s19 = sshll.u32 %s2823_s15, 8  ;;  %857 = vmatprep.subr.bf16.mxu0 %v1966_v32  ;;  %1924 = vmatprep.subr.bf16.mxu1 %v1966_v32  ;;  %s1940_s5 = smul.u32 384, %s2823_s15 }
   0xe   : > { %s2136_s22 = scalar_lea.vmem %s2813_s0, %s1787_s19  ;;  %858 = vmatpush1.bf16.msra.mxu0 %v1968_v33  ;;  %1932 = vmatpush1.bf16.msra.mxu1 %v1968_v33 }
   0xf   : > { %v2139_v0 = vld [vmem:[%s2136_s22] sm:$0xff]  ;;  %v2147_v2 = vld [vmem:[%s2136_s22 + $0x8] sm:$0xff]  ;;  %v2155_v4 = vld [vmem:[%s2136_s22 + $0x10] sm:$0xff]  ;;  %s2640_s8 = scalar_lea.vmem %s2817_s4, %s1940_s5 }
  0x10   : > { %v2142_v1 = vld [vmem:[%s2136_s22 + $0xc0] sm:$0xff]  ;;  %272 = vadd.xlane.f32.xlu0 %v2139_v0  ;;  %v2150_v3 = vld [vmem:[%s2136_s22 + $0xc8] sm:$0xff]  ;;  %v2158_v5 = vld [vmem:[%s2136_s22 + $0x18] sm:$0xff] }
  0x11   : > { %320 = vadd.xlane.f32.xlu1 %v2142_v1  ;;  %v2163_v6 = vld [vmem:[%s2136_s22 + $0xd0] sm:$0xff]  ;;  %v2166_v7 = vld [vmem:[%s2136_s22 + $0xd8] sm:$0xff]  ;;  %v2169_v8 = vld [vmem:[%s2136_s22 + $0x20] sm:$0xff] }
  0x12   : > { %v2172_v9 = vld [vmem:[%s2136_s22 + $0x28] sm:$0xff]  ;;  %v2179_v10 = vld [vmem:[%s2136_s22 + $0xe0] sm:$0xff]  ;;  %v2187_v12 = vld [vmem:[%s2136_s22 + $0x30] sm:$0xff] }
  0x13   : > { %v2182_v11 = vld [vmem:[%s2136_s22 + $0xe8] sm:$0xff]  ;;  %v2190_v13 = vld [vmem:[%s2136_s22 + $0x38] sm:$0xff]  ;;  %v2195_v14 = vld [vmem:[%s2136_s22 + $0xf0] sm:$0xff] }
  0x14   : > { %274 = vadd.xlane.f32.xlu0 %v2147_v2  ;;  %v2198_v15 = vld [vmem:[%s2136_s22 + $0xf8] sm:$0xff]  ;;  %v2203_v16 = vld [vmem:[%s2136_s22 + $0x40] sm:$0xff]  ;;  %v2206_v17 = vld [vmem:[%s2136_s22 + $0x48] sm:$0xff] }
  0x15   : > { %322 = vadd.xlane.f32.xlu1 %v2150_v3  ;;  %v2211_v18 = vld [vmem:[%s2136_s22 + $0x50] sm:$0xff]  ;;  %v2214_v19 = vld [vmem:[%s2136_s22 + $0x58] sm:$0xff]  ;;  %v2219_v20 = vld [vmem:[%s2136_s22 + $0x60] sm:$0xff] }
  0x16   : > { %v2222_v21 = vld [vmem:[%s2136_s22 + $0x68] sm:$0xff]  ;;  %v2227_v22 = vld [vmem:[%s2136_s22 + $0x70] sm:$0xff]  ;;  %v2230_v23 = vld [vmem:[%s2136_s22 + $0x78] sm:$0xff] }
  0x17   : > { %v2235_v24 = vld [vmem:[%s2136_s22 + $0x80] sm:$0xff]  ;;  %v2238_v25 = vld [vmem:[%s2136_s22 + $0x88] sm:$0xff]  ;;  %v2243_v26 = vld [vmem:[%s2136_s22 + $0x90] sm:$0xff] }
  0x18   : > { %276 = vadd.xlane.f32.xlu0 %v2155_v4  ;;  %v2246_v27 = vld [vmem:[%s2136_s22 + $0x98] sm:$0xff]  ;;  %v2251_v28 = vld [vmem:[%s2136_s22 + $0xa0] sm:$0xff]  ;;  %v2254_v29 = vld [vmem:[%s2136_s22 + $0xa8] sm:$0xff] }
  0x19   : > { %278 = vadd.xlane.f32.xlu1 %v2158_v5  ;;  %v2259_v30 = vld [vmem:[%s2136_s22 + $0xb0] sm:$0xff]  ;;  %v2262_v31 = vld [vmem:[%s2136_s22 + $0xb8] sm:$0xff] }
  0x1c   : > { %324 = vadd.xlane.f32.xlu0 %v2163_v6 }
  0x1d   : > { %326 = vadd.xlane.f32.xlu1 %v2166_v7 }
  0x20   : > { %280 = vadd.xlane.f32.xlu0 %v2169_v8 }
  0x21   : > { %282 = vadd.xlane.f32.xlu1 %v2172_v9 }
  0x24   : > { %328 = vadd.xlane.f32.xlu0 %v2179_v10 }
  0x25   : > { %330 = vadd.xlane.f32.xlu1 %v2182_v11 }
  0x28   : > { %284 = vadd.xlane.f32.xlu0 %v2187_v12 }
  0x29   : > { %286 = vadd.xlane.f32.xlu1 %v2190_v13 }
  0x2c   : > { %332 = vadd.xlane.f32.xlu0 %v2195_v14 }
  0x2d   : > { %334 = vadd.xlane.f32.xlu1 %v2198_v15 }
  0x30   : > { %288 = vadd.xlane.f32.xlu0 %v2203_v16 }
  0x31   : > { %290 = vadd.xlane.f32.xlu1 %v2206_v17 }
  0x34   : > { %292 = vadd.xlane.f32.xlu0 %v2211_v18 }
  0x35   : > { %294 = vadd.xlane.f32.xlu1 %v2214_v19 }
  0x38   : > { %296 = vadd.xlane.f32.xlu0 %v2219_v20 }
  0x39   : > { %298 = vadd.xlane.f32.xlu1 %v2222_v21 }
  0x3c   : > { %300 = vadd.xlane.f32.xlu0 %v2227_v22 }
  0x3d   : > { %302 = vadd.xlane.f32.xlu1 %v2230_v23 }
  0x40   : > { %304 = vadd.xlane.f32.xlu0 %v2235_v24 }
  0x41   : > { %306 = vadd.xlane.f32.xlu1 %v2238_v25 }
  0x44   : > { %308 = vadd.xlane.f32.xlu0 %v2243_v26 }
  0x45   : > { %310 = vadd.xlane.f32.xlu1 %v2246_v27 }
  0x48   : > { %312 = vadd.xlane.f32.xlu0 %v2251_v28 }
  0x49   : > { %314 = vadd.xlane.f32.xlu1 %v2254_v29 }
  0x4c   : > { %316 = vadd.xlane.f32.xlu0 %v2259_v30 }
  0x4d   : > { %318 = vadd.xlane.f32.xlu1 %v2262_v31 }
  0x99   : > { %v273_v34 = vpop.xlane.xlu0 %272 }
  0x9a   : > { %v321_v35 = vpop.xlane.xlu1 %320  ;;  %v337_v36 = vmul.f32 0.0078125, %v273_v34 }
  0x9b   : > { %v361_v37 = vmul.f32 0.0078125, %v321_v35 }
  0x9c   : > { %v2273_v38 = vsub.f32 %v2139_v0, %v337_v36  ;;  %v1969_v0 = vld [vmem:[%s2815_s2 + $0x94] ss:$12 sps:$4 sm:$0xff]   ;;  %v1972_v36 = vld [vmem:[%s2815_s2 + $0x7c] ss:$12 sps:$4 sm:$0xff]  }
  0x9d   : > { %v2276_v39 = vsub.f32 %v2142_v1, %v361_v37  ;;  %v275_v40 = vpop.xlane.xlu0 %274  ;;  %859 = vmatprep.subr.bf16.mxu0 %v1969_v0  ;;  %1925 = vmatprep.subr.bf16.mxu1 %v1969_v0 }
  0x9e   : > { %v323_v41 = vpop.xlane.xlu1 %322  ;;  %v338_v42 = vmul.f32 0.0078125, %v275_v40  ;;  %v401_v43 = vmul.f32 %v2273_v38, %v2273_v38 }
  0x9f   : > { %v362_v44 = vmul.f32 0.0078125, %v323_v41  ;;  %v425_v47 = vmul.f32 %v2276_v39, %v2276_v39  ;;  %v1974_v41 = vld [vmem:[%s2815_s2 + $0x78] ss:$12 sps:$4 sm:$0xff]  }
  0xa0   : > { %v2281_v45 = vsub.f32 %v2147_v2, %v338_v42  ;;  %433 = vadd.xlane.f32.xlu0 %v401_v43 }
  0xa1   : > { %v2284_v46 = vsub.f32 %v2150_v3, %v362_v44  ;;  %v277_v48 = vpop.xlane.xlu0 %276  ;;  %v1971_v3 = vld [vmem:[%s2815_s2 + $0x90] ss:$12 sps:$4 sm:$0xff]  }
  0xa2   : > { %v279_v49 = vpop.xlane.xlu1 %278  ;;  %v339_v50 = vmul.f32 0.0078125, %v277_v48  ;;  %v402_v51 = vmul.f32 %v2281_v45, %v2281_v45  ;;  %860 = vmatpush1.bf16.msra.mxu0 %v1971_v3  ;;  %1933 = vmatpush1.bf16.msra.mxu1 %v1971_v3  ;;  %v1975_v48 = vld [vmem:[%s2815_s2 + $0x64] ss:$12 sps:$4 sm:$0xff]  }
  0xa3   : > { %v340_v52 = vmul.f32 0.0078125, %v279_v49  ;;  %v426_v55 = vmul.f32 %v2284_v46, %v2284_v46  ;;  %861 = vmatprep.subr.bf16.mxu0 %v1972_v36  ;;  %1926 = vmatprep.subr.bf16.mxu1 %v1972_v36 }
  0xa4   : > { %v2291_v53 = vsub.f32 %v2155_v4, %v339_v50  ;;  %481 = vadd.xlane.f32.xlu0 %v425_v47  ;;  %435 = vadd.xlane.f32.xlu1 %v402_v51 }
  0xa5   : > { %v2294_v54 = vsub.f32 %v2158_v5, %v340_v52  ;;  %v325_v56 = vpop.xlane.xlu0 %324 }
  0xa6   : > { %v327_v57 = vpop.xlane.xlu1 %326  ;;  %v363_v58 = vmul.f32 0.0078125, %v325_v56  ;;  %v403_v59 = vmul.f32 %v2291_v53, %v2291_v53  ;;  %862 = vmatpush1.bf16.msra.mxu0 %v1974_v41  ;;  %1934 = vmatpush1.bf16.msra.mxu1 %v1974_v41 }
  0xa7   : > { %v364_v60 = vmul.f32 0.0078125, %v327_v57  ;;  %v404_v63 = vmul.f32 %v2294_v54, %v2294_v54  ;;  %863 = vmatprep.subr.bf16.mxu0 %v1975_v48  ;;  %1927 = vmatprep.subr.bf16.mxu1 %v1975_v48 }
  0xa8   : > { %v2301_v61 = vsub.f32 %v2163_v6, %v363_v58  ;;  %483 = vadd.xlane.f32.xlu1 %v426_v55  ;;  %437 = vadd.xlane.f32.xlu0 %v403_v59  ;;  %v1978_v58 = vld [vmem:[%s2815_s2 + $0x4c] ss:$12 sps:$4 sm:$0xff]  }
  0xa9   : > { %v2304_v62 = vsub.f32 %v2166_v7, %v364_v60  ;;  %v281_v1 = vpop.xlane.xlu0 %280 }
  0xaa   : > { %v283_v2 = vpop.xlane.xlu1 %282  ;;  %v341_v4 = vmul.f32 0.0078125, %v281_v1  ;;  %v427_v5 = vmul.f32 %v2301_v61, %v2301_v61 }
  0xab   : > { %v342_v6 = vmul.f32 0.0078125, %v283_v2  ;;  %v428_v33 = vmul.f32 %v2304_v62, %v2304_v62 }
  0xac   : > { %v2317_v7 = vsub.f32 %v2169_v8, %v341_v4  ;;  %439 = vadd.xlane.f32.xlu1 %v404_v63  ;;  %485 = vadd.xlane.f32.xlu0 %v427_v5  ;;  %v1981_v4 = vld [vmem:[%s2815_s2 + $0x34] ss:$12 sps:$4 sm:$0xff]  }
  0xad   : > { %v2320_v32 = vsub.f32 %v2172_v9, %v342_v6  ;;  %v329_v34 = vpop.xlane.xlu0 %328 }
  0xae   : > { %v331_v35 = vpop.xlane.xlu1 %330  ;;  %v365_v37 = vmul.f32 0.0078125, %v329_v34  ;;  %v405_v40 = vmul.f32 %v2317_v7, %v2317_v7 }
  0xaf   : > { %v366_v8 = vmul.f32 0.0078125, %v331_v35  ;;  %v406_v43 = vmul.f32 %v2320_v32, %v2320_v32 }
  0xb0   : > { %v2333_v9 = vsub.f32 %v2179_v10, %v365_v37  ;;  %487 = vadd.xlane.f32.xlu1 %v428_v33  ;;  %441 = vadd.xlane.f32.xlu0 %v405_v40  ;;  %v1984_v40 = vld [vmem:[%s2815_s2 + $0x1c] ss:$12 sps:$4 sm:$0xff]  }
  0xb1   : > { %v2336_v42 = vsub.f32 %v2182_v11, %v366_v8  ;;  %v285_v44 = vpop.xlane.xlu0 %284  ;;  %v1977_v11 = vld [vmem:[%s2815_s2 + $0x60] ss:$12 sps:$4 sm:$0xff]  }
  0xb2   : > { %v287_v47 = vpop.xlane.xlu1 %286  ;;  %v343_v49 = vmul.f32 0.0078125, %v285_v44  ;;  %v429_v10 = vmul.f32 %v2333_v9, %v2333_v9  ;;  %864 = vmatpush1.bf16.msra.mxu0 %v1977_v11  ;;  %1935 = vmatpush1.bf16.msra.mxu1 %v1977_v11 }
  0xb3   : > { %v344_v50 = vmul.f32 0.0078125, %v287_v47  ;;  %v430_v55 = vmul.f32 %v2336_v42, %v2336_v42  ;;  %865 = vmatprep.subr.bf16.mxu0 %v1978_v58  ;;  %1928 = vmatprep.subr.bf16.mxu1 %v1978_v58 }
  0xb4   : > { %v2349_v51 = vsub.f32 %v2187_v12, %v343_v49  ;;  %443 = vadd.xlane.f32.xlu1 %v406_v43  ;;  %489 = vadd.xlane.f32.xlu0 %v429_v10  ;;  %v1987_v10 = vld [vmem:[%s2815_s2 + $0x4] ss:$12 sps:$4 sm:$0xff]  }
  0xb5   : > { %v2352_v52 = vsub.f32 %v2190_v13, %v344_v50  ;;  %v333_v56 = vpop.xlane.xlu0 %332  ;;  %v1980_v13 = vld [vmem:[%s2815_s2 + $0x48] ss:$12 sps:$4 sm:$0xff]  }
  0xb6   : > { %v335_v57 = vpop.xlane.xlu1 %334  ;;  %v367_v59 = vmul.f32 0.0078125, %v333_v56  ;;  %v407_v12 = vmul.f32 %v2349_v51, %v2349_v51  ;;  %866 = vmatpush1.bf16.msra.mxu0 %v1980_v13  ;;  %1936 = vmatpush1.bf16.msra.mxu1 %v1980_v13 }
  0xb7   : > { %v368_v60 = vmul.f32 0.0078125, %v335_v57  ;;  %v408_v1 = vmul.f32 %v2352_v52, %v2352_v52  ;;  %867 = vmatprep.subr.bf16.mxu0 %v1981_v4  ;;  %1929 = vmatprep.subr.bf16.mxu1 %v1981_v4 }
  0xb8   : > { %v2365_v63 = vsub.f32 %v2195_v14, %v367_v59  ;;  %491 = vadd.xlane.f32.xlu1 %v430_v55  ;;  %445 = vadd.xlane.f32.xlu0 %v407_v12 }
  0xb9   : > { %v2368_v0 = vsub.f32 %v2198_v15, %v368_v60  ;;  %v289_v2 = vpop.xlane.xlu0 %288  ;;  %v1983_v15 = vld [vmem:[%s2815_s2 + $0x30] ss:$12 sps:$4 sm:$0xff]  }
  0xba   : > { %v291_v3 = vpop.xlane.xlu1 %290  ;;  %v345_v5 = vmul.f32 0.0078125, %v289_v2  ;;  %v431_v14 = vmul.f32 %v2365_v63, %v2365_v63  ;;  %868 = vmatpush1.bf16.msra.mxu0 %v1983_v15  ;;  %1937 = vmatpush1.bf16.msra.mxu1 %v1983_v15 }
  0xbb   : > { %v346_v6 = vmul.f32 0.0078125, %v291_v3  ;;  %v432_v35 = vmul.f32 %v2368_v0, %v2368_v0  ;;  %869 = vmatprep.subr.bf16.mxu0 %v1984_v40  ;;  %1930 = vmatprep.subr.bf16.mxu1 %v1984_v40 }
  0xbc   : > { %v2381_v33 = vsub.f32 %v2203_v16, %v345_v5  ;;  %447 = vadd.xlane.f32.xlu1 %v408_v1  ;;  %493 = vadd.xlane.f32.xlu0 %v431_v14  ;;  %v2086_v1 = vmov 0   ;;  %v2435_v5 = vld [vmem:[%s2815_s2 + $0xb0] ss:$12 sps:$4 sm:$0xff]  }
  0xbd   : > { %v2384_v34 = vsub.f32 %v2206_v17, %v346_v6  ;;  %v293_v36 = vpop.xlane.xlu0 %292  ;;  %v1986_v17 = vld [vmem:[%s2815_s2 + $0x18] ss:$12 sps:$4 sm:$0xff]   ;;  %889 = vmatprep.mubr.bf16.mxu0 %v2086_v1  ;;  %1009 = vmatprep.mubr.bf16.mxu1 %v2086_v1 }
  0xbe   : > { %v295_v37 = vpop.xlane.xlu1 %294  ;;  %v347_v8 = vmul.f32 0.0078125, %v293_v36  ;;  %v409_v16 = vmul.f32 %v2381_v33, %v2381_v33  ;;  %870 = vmatpush1.bf16.msra.mxu0 %v1986_v17  ;;  %1938 = vmatpush1.bf16.msra.mxu1 %v1986_v17 }
  0xbf   : > { %v348_v41 = vmul.f32 0.0078125, %v295_v37  ;;  %v410_v47 = vmul.f32 %v2384_v34, %v2384_v34  ;;  %871 = vmatprep.subr.bf16.mxu0 %v1987_v10  ;;  %1931 = vmatprep.subr.bf16.mxu1 %v1987_v10 }
  0xc0   : > { %v2397_v43 = vsub.f32 %v2211_v18, %v347_v8  ;;  %495 = vadd.xlane.f32.xlu1 %v432_v35  ;;  %449 = vadd.xlane.f32.xlu0 %v409_v16 }
  0xc1   : > { %v2400_v44 = vsub.f32 %v2214_v19, %v348_v41  ;;  %v297_v48 = vpop.xlane.xlu0 %296  ;;  %v1989_v19 = vld [vmem:[%s2815_s2] ss:$12 sps:$4 sm:$0xff]  }
  0xc2   : > { %v299_v49 = vpop.xlane.xlu1 %298  ;;  %v349_v50 = vmul.f32 0.0078125, %v297_v48  ;;  %v411_v18 = vmul.f32 %v2397_v43, %v2397_v43  ;;  %872 = vmatpush1.bf16.msra.mxu0 %v1989_v19  ;;  %1939 = vmatpush1.bf16.msra.mxu1 %v1989_v19 }
  0xc3   : > { %v350_v11 = vmul.f32 0.0078125, %v299_v49  ;;  %v412_v57 = vmul.f32 %v2400_v44, %v2400_v44  ;;  %1876 = vmatprep.subr.bf16.mxu1 %v2435_v5 }
  0xc4   : > { %v2413_v55 = vsub.f32 %v2219_v20, %v349_v50  ;;  %451 = vadd.xlane.f32.xlu1 %v410_v47  ;;  %453 = vadd.xlane.f32.xlu0 %v411_v18 }
  0xc5   : > { %v2416_v56 = vsub.f32 %v2222_v21, %v350_v11  ;;  %v301_v58 = vpop.xlane.xlu0 %300 }
  0xc6   : > { %v303_v59 = vpop.xlane.xlu1 %302  ;;  %v351_v12 = vmul.f32 0.0078125, %v301_v58  ;;  %v413_v60 = vmul.f32 %v2413_v55, %v2413_v55 }
  0xc7   : > { %v352_v13 = vmul.f32 0.0078125, %v303_v59  ;;  %v414_v2 = vmul.f32 %v2416_v56, %v2416_v56 }
  0xc8   : > { %v2425_v20 = vsub.f32 %v2227_v22, %v351_v12  ;;  %455 = vadd.xlane.f32.xlu1 %v412_v57  ;;  %457 = vadd.xlane.f32.xlu0 %v413_v60 }
  0xc9   : > { %v2428_v21 = vsub.f32 %v2230_v23, %v352_v13  ;;  %v305_v3 = vpop.xlane.xlu0 %304 }
  0xca   : > { %v307_v4 = vpop.xlane.xlu1 %306  ;;  %v353_v14 = vmul.f32 0.0078125, %v305_v3  ;;  %v415_v22 = vmul.f32 %v2425_v20, %v2425_v20 }
  0xcb   : > { %v354_v6 = vmul.f32 0.0078125, %v307_v4  ;;  %v416_v35 = vmul.f32 %v2428_v21, %v2428_v21 }
  0xcc   : > { %v2441_v23 = vsub.f32 %v2235_v24, %v353_v14  ;;  %459 = vadd.xlane.f32.xlu1 %v414_v2  ;;  %461 = vadd.xlane.f32.xlu0 %v415_v22 }
  0xcd   : > { %v2444_v15 = vsub.f32 %v2238_v25, %v354_v6  ;;  %v309_v36 = vpop.xlane.xlu0 %308 }
  0xce   : > { %v311_v37 = vpop.xlane.xlu1 %310  ;;  %v355_v40 = vmul.f32 0.0078125, %v309_v36  ;;  %v417_v8 = vmul.f32 %v2441_v23, %v2441_v23 }
  0xcf   : > { %v356_v16 = vmul.f32 0.0078125, %v311_v37  ;;  %v418_v25 = vmul.f32 %v2444_v15, %v2444_v15 }
  0xd0   : > { %v2451_v41 = vsub.f32 %v2243_v26, %v355_v40  ;;  %463 = vadd.xlane.f32.xlu1 %v416_v35  ;;  %465 = vadd.xlane.f32.xlu0 %v417_v8 }
  0xd1   : > { %v2454_v24 = vsub.f32 %v2246_v27, %v356_v16  ;;  %v313_v17 = vpop.xlane.xlu0 %312 }
  0xd2   : > { %v315_v47 = vpop.xlane.xlu1 %314  ;;  %v357_v48 = vmul.f32 0.0078125, %v313_v17  ;;  %v419_v49 = vmul.f32 %v2451_v41, %v2451_v41 }
  0xd3   : > { %v358_v10 = vmul.f32 0.0078125, %v315_v47  ;;  %v420_v27 = vmul.f32 %v2454_v24, %v2454_v24 }
  0xd4   : > { %v2461_v50 = vsub.f32 %v2251_v28, %v357_v48  ;;  %467 = vadd.xlane.f32.xlu1 %v418_v25  ;;  %469 = vadd.xlane.f32.xlu0 %v419_v49 }
  0xd5   : > { %v2464_v26 = vsub.f32 %v2254_v29, %v358_v10  ;;  %v317_v18 = vpop.xlane.xlu0 %316 }
  0xd6   : > { %v319_v11 = vpop.xlane.xlu1 %318  ;;  %v359_v19 = vmul.f32 0.0078125, %v317_v18  ;;  %v421_v57 = vmul.f32 %v2461_v50, %v2461_v50 }
  0xd7   : > { %v360_v58 = vmul.f32 0.0078125, %v319_v11  ;;  %v422_v29 = vmul.f32 %v2464_v26, %v2464_v26 }
  0xd8   : > { %v2471_v59 = vsub.f32 %v2259_v30, %v359_v19  ;;  %471 = vadd.xlane.f32.xlu1 %v420_v27  ;;  %473 = vadd.xlane.f32.xlu0 %v421_v57 }
  0xd9   : > { %v2474_v28 = vsub.f32 %v2262_v31, %v360_v58 }
  0xda   : > { %v423_v12 = vmul.f32 %v2471_v59, %v2471_v59 }
  0xdb   : > { %v424_v60 = vmul.f32 %v2474_v28, %v2474_v28 }
  0xdc   : > { %475 = vadd.xlane.f32.xlu1 %v422_v29  ;;  %477 = vadd.xlane.f32.xlu0 %v423_v12 }
  0xe0   : > { %479 = vadd.xlane.f32.xlu1 %v424_v60 }
 0x129   : > { %v434_v13 = vpop.xlane.xlu0 %433 }
 0x12a   : > { %v497_v30 = vmul.f32 0.0078125, %v434_v13 }
 0x12c   : > { %v529_v2 = vadd.f32 1e-05, %v497_v30 }
 0x12d   : > { %v436_v3 = vpop.xlane.xlu1 %435  ;;  %v482_v4 = vpop.xlane.xlu0 %481 }
 0x12e   : > { %1998 = vrsqrt.f32 %v529_v2  ;;  %v498_v31 = vmul.f32 0.0078125, %v436_v3  ;;  %v521_v14 = vmul.f32 0.0078125, %v482_v4  ;;  %v2486_v3 = vld [vmem:[%s2814_s1] ss:$0 sm:$0xff] }
 0x130   : > { %v530_v22 = vadd.f32 1e-05, %v498_v31  ;;  %v553_v6 = vadd.f32 1e-05, %v521_v14 }
 0x131   : > { %v484_v35 = vpop.xlane.xlu1 %483  ;;  %v438_v36 = vpop.xlane.xlu0 %437 }
 0x132   : > { %2000 = vrsqrt.f32 %v530_v22  ;;  %v522_v37 = vmul.f32 0.0078125, %v484_v35  ;;  %v499_v40 = vmul.f32 0.0078125, %v438_v36 }
 0x133   : > { %2002 = vrsqrt.f32 %v553_v6 }
 0x134   : > { %v554_v8 = vadd.f32 1e-05, %v522_v37  ;;  %v531_v16 = vadd.f32 1e-05, %v499_v40 }
 0x135   : > { %v440_v25 = vpop.xlane.xlu1 %439  ;;  %v486_v17 = vpop.xlane.xlu0 %485 }
 0x136   : > { %2004 = vrsqrt.f32 %v554_v8  ;;  %v500_v47 = vmul.f32 0.0078125, %v440_v25  ;;  %v523_v48 = vmul.f32 0.0078125, %v486_v17 }
 0x137   : > { %2006 = vrsqrt.f32 %v531_v16 }
 0x138   : > { %v532_v49 = vadd.f32 1e-05, %v500_v47  ;;  %v555_v10 = vadd.f32 1e-05, %v523_v48 }
 0x139   : > { %v488_v27 = vpop.xlane.xlu1 %487  ;;  %v442_v18 = vpop.xlane.xlu0 %441 }
 0x13a   : > { %2008 = vrsqrt.f32 %v532_v49  ;;  %v524_v11 = vmul.f32 0.0078125, %v488_v27  ;;  %v501_v19 = vmul.f32 0.0078125, %v442_v18 }
 0x13b   : > { %v1999_v57 = vpop.eup %1998  ;;  %2010 = vrsqrt.f32 %v555_v10 }
 0x13c   : > { %v556_v58 = vadd.f32 1e-05, %v524_v11  ;;  %v533_v29 = vadd.f32 1e-05, %v501_v19  ;;  %v593_v13 = vmul.f32 %v1999_v57, %v2273_v38 }
 0x13d   : > { %v444_v12 = vpop.xlane.xlu1 %443  ;;  %v490_v60 = vpop.xlane.xlu0 %489 }
 0x13e   : > { %2012 = vrsqrt.f32 %v556_v58  ;;  %v502_v30 = vmul.f32 0.0078125, %v444_v12  ;;  %v525_v2 = vmul.f32 0.0078125, %v490_v60  ;;  %v632_v37 = vmul.f32 %v2486_v3, %v593_v13 }
 0x13f   : > { %v2001_v4 = vpop.eup %2000  ;;  %2014 = vrsqrt.f32 %v533_v29 }
 0x140   : > { %v2003_v31 = vpop.eup %2002  ;;  %v534_v14 = vadd.f32 1e-05, %v502_v30  ;;  %v557_v22 = vadd.f32 1e-05, %v525_v2  ;;  %v594_v6 = vmul.f32 %v2001_v4, %v2281_v45 }
 0x141   : > { %v492_v35 = vpop.xlane.xlu1 %491  ;;  %v446_v36 = vpop.xlane.xlu0 %445  ;;  %v617_v38 = vmul.f32 %v2003_v31, %v2276_v39 }
 0x142   : > { %2016 = vrsqrt.f32 %v534_v14  ;;  %v526_v40 = vmul.f32 0.0078125, %v492_v35  ;;  %v503_v8 = vmul.f32 0.0078125, %v446_v36  ;;  %v633_v16 = vmul.f32 %v2486_v3, %v594_v6 }
 0x143   : > { %v2005_v25 = vpop.eup %2004  ;;  %2018 = vrsqrt.f32 %v557_v22  ;;  %v656_v18 = vmul.f32 %v2486_v3, %v617_v38 }
 0x144   : > { %v2007_v17 = vpop.eup %2006  ;;  %v558_v47 = vadd.f32 1e-05, %v526_v40  ;;  %v535_v48 = vadd.f32 1e-05, %v503_v8  ;;  %v2492_v49 = vpack.c.bf16 %v633_v16, %v632_v37  ;;  %v618_v45 = vmul.f32 %v2005_v25, %v2284_v46 }
 0x145   : > { %v448_v10 = vpop.xlane.xlu1 %447  ;;  %v494_v27 = vpop.xlane.xlu0 %493  ;;  %v595_v39 = vmul.f32 %v2007_v17, %v2291_v53  ;;  %v1991_v53 = vld [vmem:[%s2815_s2 + $0x98] ss:$12 sps:$4 sm:$0xff]  }
 0x146   : > { %2020 = vrsqrt.f32 %v558_v47  ;;  %v504_v11 = vmul.f32 0.0078125, %v448_v10  ;;  %v527_v19 = vmul.f32 0.0078125, %v494_v27  ;;  %890 = vmatmul.mubr.bf16.vlgmr.msra.gmra.mxu0 %v2492_v49  ;;  %v657_v57 = vmul.f32 %v2486_v3, %v618_v45 }
 0x147   : > { %v2009_v58 = vpop.eup %2008  ;;  %2022 = vrsqrt.f32 %v535_v48  ;;  %899 = vmatprep.mubr.bf16.mxu0 %v2086_v1  ;;  %v634_v4 = vmul.f32 %v2486_v3, %v595_v39 }
 0x148   : > { %v2011_v29 = vpop.eup %2010  ;;  %v536_v12 = vadd.f32 1e-05, %v504_v11  ;;  %v559_v46 = vadd.f32 1e-05, %v527_v19  ;;  %v2500_v60 = vpack.c.bf16 %v657_v57, %v656_v18  ;;  %v596_v13 = vmul.f32 %v2009_v58, %v2294_v54 }
 0x149   : > { %v496_v30 = vpop.xlane.xlu1 %495  ;;  %v450_v2 = vpop.xlane.xlu0 %449  ;;  %v619_v31 = vmul.f32 %v2011_v29, %v2301_v61  ;;  %v1992_v61 = vld [vmem:[%s2815_s2 + $0x80] ss:$12 sps:$4 sm:$0xff]  }
 0x14a   : > { %2024 = vrsqrt.f32 %v536_v12  ;;  %v528_v14 = vmul.f32 0.0078125, %v496_v30  ;;  %v505_v22 = vmul.f32 0.0078125, %v450_v2  ;;  %1010 = vmatmul.mubr.bf16.vlgmr.msra.gmra.mxu1 %v2500_v60  ;;  %v635_v6 = vmul.f32 %v2486_v3, %v596_v13 }
 0x14b   : > { %v2013_v35 = vpop.eup %2012  ;;  %2026 = vrsqrt.f32 %v559_v46  ;;  %1877 = vmatpush3.bf16.msra.mxu1 %v2435_v5  ;;  %1019 = vmatprep.mubr.bf16.mxu1 %v2086_v1  ;;  %v658_v25 = vmul.f32 %v2486_v3, %v619_v31 }
 0x14c   : > { %v2015_v54 = vpop.eup %2014  ;;  %v560_v36 = vadd.f32 1e-05, %v528_v14  ;;  %v537_v37 = vadd.f32 1e-05, %v505_v22  ;;  %1878 = vmatprep.subr.bf16.mxu1 %v1991_v53  ;;  %v2512_v38 = vpack.c.bf16 %v635_v6, %v634_v4  ;;  %v620_v40 = vmul.f32 %v2013_v35, %v2304_v62 }
 0x14d   : > { %v452_v8 = vpop.xlane.xlu1 %451  ;;  %v454_v16 = vpop.xlane.xlu0 %453  ;;  %v597_v5 = vmul.f32 %v2015_v54, %v2317_v7  ;;  %v1993_v7 = vld [vmem:[%s2815_s2 + $0x68] ss:$12 sps:$4 sm:$0xff]  }
 0x14e   : > { %2028 = vrsqrt.f32 %v560_v36  ;;  %v506_v17 = vmul.f32 0.0078125, %v452_v8  ;;  %v507_v47 = vmul.f32 0.0078125, %v454_v16  ;;  %900 = vmatmul.mubr.bf16.gmra.mxu0 %v2512_v38  ;;  %v659_v48 = vmul.f32 %v2486_v3, %v620_v40 }
 0x14f   : > { %v2017_v45 = vpop.eup %2016  ;;  %2030 = vrsqrt.f32 %v537_v37  ;;  %1879 = vmatpush3.bf16.msra.mxu1 %v1991_v53  ;;  %909 = vmatprep.mubr.bf16.mxu0 %v2086_v1  ;;  %v636_v29 = vmul.f32 %v2486_v3, %v597_v5 }
 0x150   : > { %v2019_v10 = vpop.eup %2018  ;;  %v538_v62 = vadd.f32 1e-05, %v506_v17  ;;  %1880 = vmatprep.subr.bf16.mxu1 %v1992_v61  ;;  %v2523_v27 = vpack.c.bf16 %v659_v48, %v658_v25  ;;  %v598_v18 = vmul.f32 %v2017_v45, %v2320_v32  ;;  %v539_v39 = vadd.f32 1e-05, %v507_v47 }
 0x151   : > { %v456_v11 = vpop.xlane.xlu1 %455  ;;  %v458_v19 = vpop.xlane.xlu0 %457  ;;  %v621_v57 = vmul.f32 %v2019_v10, %v2333_v9  ;;  %v1994_v9 = vld [vmem:[%s2815_s2 + $0x50] ss:$12 sps:$4 sm:$0xff]   ;;  %v1996_v10 = vld [vmem:[%s2815_s2 + $0x20] ss:$12 sps:$4 sm:$0xff]  }
 0x152   : > { %2032 = vrsqrt.f32 %v538_v62  ;;  %v508_v58 = vmul.f32 0.0078125, %v456_v11  ;;  %1020 = vmatmul.mubr.bf16.gmra.mxu1 %v2523_v27  ;;  %v637_v12 = vmul.f32 %v2486_v3, %v598_v18  ;;  %v509_v2 = vmul.f32 0.0078125, %v458_v19 }
 0x153   : > { %v2021_v46 = vpop.eup %2020  ;;  %1881 = vmatpush3.bf16.msra.mxu1 %v1992_v61  ;;  %1029 = vmatprep.mubr.bf16.mxu1 %v2086_v1  ;;  %2034 = vrsqrt.f32 %v539_v39  ;;  %v660_v31 = vmul.f32 %v2486_v3, %v621_v57  ;;  %v1995_v61 = vld [vmem:[%s2815_s2 + $0x38] ss:$12 sps:$4 sm:$0xff]  }
 0x154   : > { %v2023_v53 = vpop.eup %2022  ;;  %v540_v13 = vadd.f32 1e-05, %v508_v58  ;;  %1882 = vmatprep.subr.bf16.mxu1 %v1993_v7  ;;  %v2534_v32 = vpack.c.bf16 %v637_v12, %v636_v29  ;;  %v622_v30 = vmul.f32 %v2021_v46, %v2336_v42  ;;  %v541_v16 = vadd.f32 1e-05, %v509_v2 }
 0x155   : > { %v460_v4 = vpop.xlane.xlu1 %459  ;;  %v462_v22 = vpop.xlane.xlu0 %461  ;;  %v599_v35 = vmul.f32 %v2023_v53, %v2349_v51 }
 0x156   : > { %2036 = vrsqrt.f32 %v540_v13  ;;  %v510_v14 = vmul.f32 0.0078125, %v460_v4  ;;  %910 = vmatmul.mubr.bf16.gmra.mxu0 %v2534_v32  ;;  %v661_v6 = vmul.f32 %v2486_v3, %v622_v30 }
 0x157   : > { %v2025_v54 = vpop.eup %2024  ;;  %1883 = vmatpush3.bf16.msra.mxu1 %v1993_v7  ;;  %919 = vmatprep.mubr.bf16.mxu0 %v2086_v1  ;;  %v638_v51 = vmul.f32 %v2486_v3, %v599_v35  ;;  %v511_v7 = vmul.f32 0.0078125, %v462_v22 }
 0x158   : > { %v2027_v36 = vpop.eup %2026  ;;  %v542_v42 = vadd.f32 1e-05, %v510_v14  ;;  %1884 = vmatprep.subr.bf16.mxu1 %v1994_v9  ;;  %v2545_v37 = vpack.c.bf16 %v661_v6, %v660_v31  ;;  %v600_v40 = vmul.f32 %v2025_v54, %v2352_v52 }
 0x159   : > { %v464_v8 = vpop.xlane.xlu1 %463  ;;  %v623_v5 = vmul.f32 %v2027_v36, %v2365_v63  ;;  %v466_v45 = vpop.xlane.xlu0 %465  ;;  %v543_v13 = vadd.f32 1e-05, %v511_v7 }
 0x15a   : > { %1030 = vmatmul.mubr.bf16.gmra.mxu1 %v2545_v37  ;;  %v639_v25 = vmul.f32 %v2486_v3, %v600_v40  ;;  %2038 = vrsqrt.f32 %v542_v42  ;;  %v512_v48 = vmul.f32 0.0078125, %v464_v8  ;;  %v513_v4 = vmul.f32 0.0078125, %v466_v45 }
 0x15b   : > { %v2029_v17 = vpop.eup %2028  ;;  %1885 = vmatpush3.bf16.msra.mxu1 %v1994_v9  ;;  %1039 = vmatprep.mubr.bf16.mxu1 %v2086_v1  ;;  %2040 = vrsqrt.f32 %v541_v16  ;;  %v662_v63 = vmul.f32 %v2486_v3, %v623_v5 }
 0x15c   : > { %v2031_v47 = vpop.eup %2030  ;;  %1886 = vmatprep.subr.bf16.mxu1 %v1995_v61  ;;  %v2556_v52 = vpack.c.bf16 %v639_v25, %v638_v51  ;;  %v624_v62 = vmul.f32 %v2029_v17, %v2368_v0  ;;  %v544_v57 = vadd.f32 1e-05, %v512_v48  ;;  %v1997_v0 = vld [vmem:[%s2815_s2 + $0x8] ss:$12 sps:$4 sm:$0xff]   ;;  %v545_v35 = vadd.f32 1e-05, %v513_v4 }
 0x15d   : > { %v468_v18 = vpop.xlane.xlu1 %467  ;;  %v601_v11 = vmul.f32 %v2031_v47, %v2381_v33  ;;  %v470_v9 = vpop.xlane.xlu0 %469 }
 0x15e   : > { %920 = vmatmul.mubr.bf16.gmra.mxu0 %v2556_v52  ;;  %v663_v39 = vmul.f32 %v2486_v3, %v624_v62  ;;  %v514_v12 = vmul.f32 0.0078125, %v468_v18  ;;  %2042 = vrsqrt.f32 %v544_v57  ;;  %v515_v40 = vmul.f32 0.0078125, %v470_v9 }
 0x15f   : > { %v2033_v19 = vpop.eup %2032  ;;  %1887 = vmatpush3.bf16.msra.mxu1 %v1995_v61  ;;  %929 = vmatprep.mubr.bf16.mxu0 %v2086_v1  ;;  %v640_v33 = vmul.f32 %v2486_v3, %v601_v11  ;;  %2044 = vrsqrt.f32 %v543_v13 }
 0x160   : > { %1888 = vmatprep.subr.bf16.mxu1 %v1996_v10  ;;  %v2567_v58 = vpack.c.bf16 %v663_v39, %v662_v63  ;;  %v602_v29 = vmul.f32 %v2033_v19, %v2384_v34  ;;  %v2035_v53 = vpop.eup %2034  ;;  %v546_v14 = vadd.f32 1e-05, %v514_v12  ;;  %v547_v47 = vadd.f32 1e-05, %v515_v40 }
 0x161   : > { %v472_v46 = vpop.xlane.xlu1 %471  ;;  %v603_v6 = vmul.f32 %v2035_v53, %v2397_v43  ;;  %v474_v36 = vpop.xlane.xlu0 %473 }
 0x162   : > { %1040 = vmatmul.mubr.bf16.gmra.mxu1 %v2567_v58  ;;  %v641_v30 = vmul.f32 %v2486_v3, %v602_v29  ;;  %v516_v54 = vmul.f32 0.0078125, %v472_v46  ;;  %2046 = vrsqrt.f32 %v546_v14  ;;  %v517_v16 = vmul.f32 0.0078125, %v474_v36 }
 0x163   : > { %v2037_v2 = vpop.eup %2036  ;;  %1889 = vmatpush3.bf16.msra.mxu1 %v1996_v10  ;;  %1892 = vmatprep.mubr.bf16.mxu1 %v2492_v49  ;;  %2048 = vrsqrt.f32 %v545_v35 }
 0x164   : > { %1890 = vmatprep.subr.bf16.mxu1 %v1997_v0  ;;  %v668_v31 = vpack.c.bf16 %v641_v30, %v640_v33  ;;  %v604_v34 = vmul.f32 %v2037_v2, %v2400_v44  ;;  %v642_v44 = vmul.f32 %v2486_v3, %v603_v6  ;;  %v548_v43 = vadd.f32 1e-05, %v516_v54 }
 0x165   : > { %v476_v22 = vpop.xlane.xlu1 %475  ;;  %v549_v45 = vadd.f32 1e-05, %v517_v16  ;;  %v478_v10 = vpop.xlane.xlu0 %477 }
 0x166   : > { %930 = vmatmul.mubr.bf16.gmra.mxu0 %v668_v31  ;;  %v643_v42 = vmul.f32 %v2486_v3, %v604_v34  ;;  %v518_v61 = vmul.f32 0.0078125, %v476_v22  ;;  %2050 = vrsqrt.f32 %v548_v43 }
 0x167   : > { %1891 = vmatpush3.bf16.msra.mxu1 %v1997_v0  ;;  %939 = vmatprep.mubr.bf16.mxu0 %v2086_v1  ;;  %v2039_v49 = vpop.eup %2038 }
 0x168   : > { %v2041_v8 = vpop.eup %2040  ;;  %v669_v51 = vpack.c.bf16 %v643_v42, %v642_v44  ;;  %v606_v25 = vmul.f32 %v2039_v49, %v2416_v56  ;;  %v550_v5 = vadd.f32 1e-05, %v518_v61 }
 0x169   : > { %v480_v17 = vpop.xlane.xlu1 %479  ;;  %v605_v48 = vmul.f32 %v2041_v8, %v2413_v55 }
 0x16a   : > { %1893 = vmatmul.mubr.bf16.vlgmr.msra.gmra.mxu1 %v2512_v38  ;;  %v520_v38 = vmul.f32 0.0078125, %v480_v17  ;;  %v645_v62 = vmul.f32 %v2486_v3, %v606_v25  ;;  %2052 = vrsqrt.f32 %v550_v5 }
 0x16b   : > { %1896 = vmatprep.mubr.bf16.mxu1 %v2534_v32  ;;  %v2043_v7 = vpop.eup %2042  ;;  %2054 = vrsqrt.f32 %v547_v47  ;;  %v519_v32 = vmul.f32 0.0078125, %v478_v10  ;;  %v644_v56 = vmul.f32 %v2486_v3, %v605_v48 }
 0x16c   : > { %v2045_v18 = vpop.eup %2044  ;;  %2056 = vrsqrt.f32 %v549_v45  ;;  %v552_v55 = vadd.f32 1e-05, %v520_v38  ;;  %v608_v39 = vmul.f32 %v2043_v7, %v2428_v21 }
 0x16d   : > { %v670_v63 = vpack.c.bf16 %v645_v62, %v644_v56  ;;  %v551_v19 = vadd.f32 1e-05, %v519_v32  ;;  %v607_v57 = vmul.f32 %v2045_v18, %v2425_v20 }
 0x16e   : > { %940 = vmatmul.mubr.bf16.gmra.mxu0 %v669_v51  ;;  %2058 = vrsqrt.f32 %v552_v55 }
 0x16f   : > { %949 = vmatprep.mubr.bf16.mxu0 %v2086_v1  ;;  %v2047_v11 = vpop.eup %2046  ;;  %2060 = vrsqrt.f32 %v551_v19  ;;  %v646_v12 = vmul.f32 %v2486_v3, %v607_v57 }
 0x170   : > { %v2049_v0 = vpop.eup %2048  ;;  %v610_v29 = vmul.f32 %v2047_v11, %v2444_v15 }
 0x171   : > { %v609_v21 = vmul.f32 %v2049_v0, %v2441_v23 }
 0x172   : > { %1897 = vmatmul.mubr.bf16.gmra.mxu1 %v2556_v52  ;;  %v647_v52 = vmul.f32 %v2486_v3, %v608_v39  ;;  %v649_v13 = vmul.f32 %v2486_v3, %v610_v29 }
 0x173   : > { %1900 = vmatprep.mubr.bf16.mxu1 %v668_v31  ;;  %v2051_v53 = vpop.eup %2050  ;;  %v648_v33 = vmul.f32 %v2486_v3, %v609_v21 }
 0x174   : > { %v671_v46 = vpack.c.bf16 %v647_v52, %v646_v12  ;;  %v612_v15 = vmul.f32 %v2051_v53, %v2454_v24 }
 0x175   : > { %v672_v2 = vpack.c.bf16 %v649_v13, %v648_v33 }
 0x176   : > { %950 = vmatmul.mubr.bf16.gmra.mxu0 %v670_v63  ;;  %v651_v34 = vmul.f32 %v2486_v3, %v612_v15 }
 0x177   : > { %959 = vmatprep.mubr.bf16.mxu0 %v2086_v1  ;;  %v2053_v20 = vpop.eup %2052 }
 0x178   : > { %v2055_v9 = vpop.eup %2054  ;;  %v614_v4 = vmul.f32 %v2053_v20, %v2464_v26 }
 0x179   : > { %v2057_v30 = vpop.eup %2056  ;;  %v611_v23 = vmul.f32 %v2055_v9, %v2451_v41 }
 0x17a   : > { %1901 = vmatmul.mubr.bf16.gmra.mxu1 %v669_v51  ;;  %v613_v31 = vmul.f32 %v2057_v30, %v2461_v50  ;;  %v653_v22 = vmul.f32 %v2486_v3, %v614_v4 }
 0x17b   : > { %1904 = vmatprep.mubr.bf16.mxu1 %v670_v63  ;;  %v2059_v14 = vpop.eup %2058  ;;  %v650_v6 = vmul.f32 %v2486_v3, %v611_v23 }
 0x17c   : > { %v2061_v35 = vpop.eup %2060  ;;  %v652_v24 = vmul.f32 %v2486_v3, %v613_v31  ;;  %v616_v54 = vmul.f32 %v2059_v14, %v2474_v28 }
 0x17d   : > { %v673_v26 = vpack.c.bf16 %v651_v34, %v650_v6  ;;  %v615_v50 = vmul.f32 %v2061_v35, %v2471_v59  ;;  %v714_v59 = vlaneseq }
 0x17e   : > { %960 = vmatmul.mubr.bf16.gmra.mxu0 %v671_v46  ;;  %v674_v41 = vpack.c.bf16 %v653_v22, %v652_v24  ;;  %v655_v36 = vmul.f32 %v2486_v3, %v616_v54 }
 0x17f   : > { %969 = vmatprep.mubr.bf16.mxu0 %v2086_v1  ;;  %v654_v42 = vmul.f32 %v2486_v3, %v615_v50  ;;  %v2619_v28 = vshrl.u32 %v714_v59, 7 }
 0x181   : > { %v675_v49 = vpack.c.bf16 %v655_v36, %v654_v42  ;;  %v716_v3 = vsub.s32 0, %v2619_v28  ;;  %v720_v61 = vsub.s32 1, %v2619_v28 }
 0x182   : > { %1905 = vmatmul.mubr.bf16.gmra.mxu1 %v671_v46 }
 0x183   : > { %1908 = vmatprep.mubr.bf16.mxu1 %v672_v2 }
 0x186   : > { %970 = vmatmul.mubr.bf16.gmra.mxu0 %v672_v2 }
 0x187   : > { %979 = vmatprep.mubr.bf16.mxu0 %v2086_v1 }
 0x18a   : > { %1909 = vmatmul.mubr.bf16.gmra.mxu1 %v673_v26 }
 0x18b   : > { %1912 = vmatprep.mubr.bf16.mxu1 %v674_v41 }
 0x18e   : > { %980 = vmatmul.mubr.bf16.gmra.mxu0 %v673_v26 }
 0x18f   : > { %989 = vmatprep.mubr.bf16.mxu0 %v2086_v1 }
 0x192   : > { %1913 = vmatmul.mubr.bf16.gmra.mxu1 %v675_v49 }
 0x193   : > { %1916 = vmatprep.mubr.bf16.mxu1 %v2500_v60  ;;  %v2626_v60 = vld [vmem:[%s2816_s3] sm:$0x7] }
 0x196   : > { %990 = vmatmul.mubr.bf16.gmra.mxu0 %v674_v41 }
 0x197   : > { %999 = vmatprep.mubr.bf16.mxu0 %v2086_v1  ;;  %v2629_v1 = vrot.slane %v2626_v60, %v716_v3 }
 0x19a   : > { %1917 = vmatmul.mubr.bf16.gmra.mxu1 %v2523_v27  ;;  %v2632_v27 = vrot.slane %v2626_v60, %v720_v61 }
 0x19b   : > { %1920 = vmatprep.mubr.bf16.mxu1 %v2545_v37 }
 0x19e   : > { %1000 = vmatmul.mubr.bf16.gmra.mxu0 %v675_v49 }
 0x1a2   : > { %1921 = vmatmul.mubr.bf16.gmra.mxu1 %v2567_v58 }
 0x206   : > { %v891_v37 = vpop.f32.mrf.mxu0 }
 0x207   : > { %v892_v40 = vadd.f32 %v891_v37, %v2629_v1 }
 0x208   : > { %v893_v58 = vpop.f32.mrf.mxu0 }
 0x209   : > { %v894_v44 = vadd.f32 %v893_v58, %v2632_v27 }
 0x20a   : > { %v895_v8 = vpop.f32.mrf.mxu0  ;;  %v1011_v16 = vpop.f32.mrf.mxu1 }
 0x20b   : > { %v1788_v43 = vpack.c.bf16 %v894_v44, %v892_v40  ;;  %v896_v5 = vadd.f32 %v895_v8, %v2629_v1  ;;  %v1012_v17 = vadd.f32 %v1011_v16, %v2629_v1 }
 0x20c   : > { %v897_v51 = vpop.f32.mrf.mxu0  ;;  %v1013_v25 = vpop.f32.mrf.mxu1 }
 0x20d   : > { %1531 = vst [vmem:[%s2640_s8] sm:$0xff] %v1788_v43  ;;  %v898_v47 = vadd.f32 %v897_v51, %v2632_v27  ;;  %v1014_v48 = vadd.f32 %v1013_v25, %v2632_v27  ;;  %v724_v51 = vsub.s32 2, %v2619_v28 }
 0x20e   : > { %v901_v45 = vpop.f32.mrf.mxu0  ;;  %v1015_v10 = vpop.f32.mrf.mxu1 }
 0x20f   : > { %v1790_v38 = vpack.c.bf16 %v898_v47, %v896_v5  ;;  %v1836_v62 = vpack.c.bf16 %v1014_v48, %v1012_v17  ;;  %v902_v56 = vadd.f32 %v901_v45, %v2629_v1  ;;  %v1016_v18 = vadd.f32 %v1015_v10, %v2629_v1 }
 0x210   : > { %v903_v7 = vpop.f32.mrf.mxu0  ;;  %v1017_v32 = vpop.f32.mrf.mxu1  ;;  %v2685_v28 = vrot.slane %v2626_v60, %v724_v51 }
 0x211   : > { %1533 = vst [vmem:[%s2640_s8 + $0xc] sm:$0xff] %v1790_v38  ;;  %1579 = vst [vmem:[%s2640_s8 + $0x120] sm:$0xff] %v1836_v62  ;;  %v904_v55 = vadd.f32 %v903_v7, %v2632_v27  ;;  %v1018_v63 = vadd.f32 %v1017_v32, %v2632_v27 }
 0x212   : > { %v905_v39 = vpop.f32.mrf.mxu0  ;;  %v1021_v11 = vpop.f32.mrf.mxu1 }
 0x213   : > { %v1792_v19 = vpack.c.bf16 %v904_v55, %v902_v56  ;;  %v1838_v57 = vpack.c.bf16 %v1018_v63, %v1016_v18  ;;  %v906_v29 = vadd.f32 %v905_v39, %v2629_v1  ;;  %v1022_v12 = vadd.f32 %v1021_v11, %v2629_v1 }
 0x214   : > { %v907_v0 = vpop.f32.mrf.mxu0  ;;  %v1023_v52 = vpop.f32.mrf.mxu1 }
 0x215   : > { %1535 = vst [vmem:[%s2640_s8 + $0x18] sm:$0xff] %v1792_v19  ;;  %1581 = vst [vmem:[%s2640_s8 + $0x12c] sm:$0xff] %v1838_v57  ;;  %v908_v21 = vadd.f32 %v907_v0, %v2632_v27  ;;  %v1024_v46 = vadd.f32 %v1023_v52, %v2632_v27 }
 0x216   : > { %v911_v53 = vpop.f32.mrf.mxu0  ;;  %v1025_v13 = vpop.f32.mrf.mxu1 }
 0x217   : > { %v1794_v20 = vpack.c.bf16 %v908_v21, %v906_v29  ;;  %v1840_v9 = vpack.c.bf16 %v1024_v46, %v1022_v12  ;;  %v912_v15 = vadd.f32 %v911_v53, %v2629_v1  ;;  %v1026_v2 = vadd.f32 %v1025_v13, %v2629_v1 }
 0x218   : > { %v913_v33 = vpop.f32.mrf.mxu0  ;;  %v1027_v30 = vpop.f32.mrf.mxu1 }
 0x219   : > { %1537 = vst [vmem:[%s2640_s8 + $0x24] sm:$0xff] %v1794_v20  ;;  %1583 = vst [vmem:[%s2640_s8 + $0x138] sm:$0xff] %v1840_v9  ;;  %v914_v4 = vadd.f32 %v913_v33, %v2632_v27  ;;  %v1028_v23 = vadd.f32 %v1027_v30, %v2632_v27 }
 0x21a   : > { %v915_v31 = vpop.f32.mrf.mxu0  ;;  %v1031_v34 = vpop.f32.mrf.mxu1 }
 0x21b   : > { %v1796_v14 = vpack.c.bf16 %v914_v4, %v912_v15  ;;  %v1842_v22 = vpack.c.bf16 %v1028_v23, %v1026_v2  ;;  %v916_v24 = vadd.f32 %v915_v31, %v2629_v1  ;;  %v1032_v26 = vadd.f32 %v1031_v34, %v2629_v1 }
 0x21c   : > { %v917_v6 = vpop.f32.mrf.mxu0  ;;  %v1033_v35 = vpop.f32.mrf.mxu1 }
 0x21d   : > { %1539 = vst [vmem:[%s2640_s8 + $0x30] sm:$0xff] %v1796_v14  ;;  %1585 = vst [vmem:[%s2640_s8 + $0x144] sm:$0xff] %v1842_v22  ;;  %v918_v54 = vadd.f32 %v917_v6, %v2632_v27  ;;  %v1034_v41 = vadd.f32 %v1033_v35, %v2632_v27 }
 0x21e   : > { %v921_v50 = vpop.f32.mrf.mxu0  ;;  %v1035_v36 = vpop.f32.mrf.mxu1 }
 0x21f   : > { %v1798_v42 = vpack.c.bf16 %v918_v54, %v916_v24  ;;  %v1844_v49 = vpack.c.bf16 %v1034_v41, %v1032_v26  ;;  %v922_v61 = vadd.f32 %v921_v50, %v2629_v1  ;;  %v1036_v37 = vadd.f32 %v1035_v36, %v2629_v1 }
 0x220   : > { %v923_v59 = vpop.f32.mrf.mxu0  ;;  %v1037_v3 = vpop.f32.mrf.mxu1 }
 0x221   : > { %1541 = vst [vmem:[%s2640_s8 + $0x3c] sm:$0xff] %v1798_v42  ;;  %1587 = vst [vmem:[%s2640_s8 + $0x150] sm:$0xff] %v1844_v49  ;;  %v924_v58 = vadd.f32 %v923_v59, %v2632_v27  ;;  %v1038_v40 = vadd.f32 %v1037_v3, %v2632_v27 }
 0x222   : > { %v925_v44 = vpop.f32.mrf.mxu0  ;;  %v1041_v8 = vpop.f32.mrf.mxu1 }
 0x223   : > { %v1800_v16 = vpack.c.bf16 %v924_v58, %v922_v61  ;;  %v1846_v43 = vpack.c.bf16 %v1038_v40, %v1036_v37  ;;  %v926_v17 = vadd.f32 %v925_v44, %v2629_v1  ;;  %v1042_v47 = vadd.f32 %v1041_v8, %v2629_v1 }
 0x224   : > { %v927_v25 = vpop.f32.mrf.mxu0  ;;  %v1043_v5 = vpop.f32.mrf.mxu1 }
 0x225   : > { %1543 = vst [vmem:[%s2640_s8 + $0x48] sm:$0xff] %v1800_v16  ;;  %1589 = vst [vmem:[%s2640_s8 + $0x15c] sm:$0xff] %v1846_v43  ;;  %v928_v48 = vadd.f32 %v927_v25, %v2632_v27  ;;  %v1044_v45 = vadd.f32 %v1043_v5, %v2632_v27 }
 0x226   : > { %v931_v10 = vpop.f32.mrf.mxu0  ;;  %v1045_v38 = vpop.f32.mrf.mxu1 }
 0x227   : > { %v1802_v62 = vpack.c.bf16 %v928_v48, %v926_v17  ;;  %v1848_v7 = vpack.c.bf16 %v1044_v45, %v1042_v47  ;;  %v932_v18 = vadd.f32 %v931_v10, %v2629_v1  ;;  %v1046_v55 = vadd.f32 %v1045_v38, %v2629_v1 }
 0x228   : > { %v933_v32 = vpop.f32.mrf.mxu0  ;;  %v1047_v56 = vpop.f32.mrf.mxu1 }
 0x229   : > { %1545 = vst [vmem:[%s2640_s8 + $0x54] sm:$0xff] %v1802_v62  ;;  %1591 = vst [vmem:[%s2640_s8 + $0x168] sm:$0xff] %v1848_v7  ;;  %v934_v63 = vadd.f32 %v933_v32, %v2632_v27  ;;  %v1048_v39 = vadd.f32 %v1047_v56, %v2632_v27 }
 0x22a   : > { %v935_v11 = vpop.f32.mrf.mxu0  ;;  %v1894_v19 = vpop.f32.mrf.mxu1 }
 0x22b   : > { %v1804_v57 = vpack.c.bf16 %v934_v63, %v932_v18  ;;  %v1850_v60 = vpack.c.bf16 %v1048_v39, %v1046_v55  ;;  %v1093_v0 = vadd.f32 %v1894_v19, %v2685_v28  ;;  %v936_v12 = vadd.f32 %v935_v11, %v2629_v1 }
 0x22c   : > { %v937_v52 = vpop.f32.mrf.mxu0  ;;  %v1084_v29 = vpop.f32.mrf.mxu1 }
 0x22d   : > { %1547 = vst [vmem:[%s2640_s8 + $0x60] sm:$0xff] %v1804_v57  ;;  %1593 = vst [vmem:[%s2640_s8 + $0x174] sm:$0xff] %v1850_v60  ;;  %v1793_v21 = vpack.c.bf16 %v1093_v0, %v1093_v0  ;;  %v938_v46 = vadd.f32 %v937_v52, %v2632_v27  ;;  %v1085_v53 = vadd.f32 %v1084_v29, %v2685_v28 }
 0x22e   : > { %v941_v13 = vpop.f32.mrf.mxu0  ;;  %v1895_v20 = vpop.f32.mrf.mxu1 }
 0x22f   : > { %1536 = vst [vmem:[%s2640_s8 + $0x20] sm:$0xf] %v1793_v21  ;;  %v1806_v9 = vpack.c.bf16 %v938_v46, %v936_v12  ;;  %v1789_v33 = vpack.c.bf16 %v1085_v53, %v1085_v53  ;;  %v1096_v30 = vadd.f32 %v1895_v20, %v2685_v28  ;;  %v942_v4 = vadd.f32 %v941_v13, %v2629_v1 }
 0x230   : > { %v943_v15 = vpop.f32.mrf.mxu0  ;;  %v1087_v2 = vpop.f32.mrf.mxu1 }
 0x231   : > { %1549 = vst [vmem:[%s2640_s8 + $0x6c] sm:$0xff] %v1806_v9  ;;  %1532 = vst [vmem:[%s2640_s8 + $0x8] sm:$0xf] %v1789_v33  ;;  %v1795_v23 = vpack.c.bf16 %v1096_v30, %v1096_v30  ;;  %v944_v31 = vadd.f32 %v943_v15, %v2632_v27  ;;  %v1088_v34 = vadd.f32 %v1087_v2, %v2685_v28 }
 0x232   : > { %v945_v14 = vpop.f32.mrf.mxu0  ;;  %v1898_v22 = vpop.f32.mrf.mxu1 }
 0x233   : > { %1538 = vst [vmem:[%s2640_s8 + $0x2c] sm:$0xf] %v1795_v23  ;;  %v1808_v6 = vpack.c.bf16 %v944_v31, %v942_v4  ;;  %v1791_v35 = vpack.c.bf16 %v1088_v34, %v1088_v34  ;;  %v1109_v24 = vadd.f32 %v1898_v22, %v2685_v28  ;;  %v946_v41 = vadd.f32 %v945_v14, %v2629_v1 }
 0x234   : > { %v947_v26 = vpop.f32.mrf.mxu0  ;;  %v1100_v54 = vpop.f32.mrf.mxu1 }
 0x235   : > { %1551 = vst [vmem:[%s2640_s8 + $0x78] sm:$0xff] %v1808_v6  ;;  %1534 = vst [vmem:[%s2640_s8 + $0x14] sm:$0xf] %v1791_v35  ;;  %v1801_v50 = vpack.c.bf16 %v1109_v24, %v1109_v24  ;;  %v948_v36 = vadd.f32 %v947_v26, %v2632_v27  ;;  %v1101_v42 = vadd.f32 %v1100_v54, %v2685_v28 }
 0x236   : > { %v951_v49 = vpop.f32.mrf.mxu0  ;;  %v1899_v59 = vpop.f32.mrf.mxu1 }
 0x237   : > { %1544 = vst [vmem:[%s2640_s8 + $0x50] sm:$0xf] %v1801_v50  ;;  %v1810_v3 = vpack.c.bf16 %v948_v36, %v946_v41  ;;  %v1797_v61 = vpack.c.bf16 %v1101_v42, %v1101_v42  ;;  %v1112_v37 = vadd.f32 %v1899_v59, %v2685_v28  ;;  %v952_v44 = vadd.f32 %v951_v49, %v2629_v1 }
 0x238   : > { %v953_v58 = vpop.f32.mrf.mxu0  ;;  %v1103_v40 = vpop.f32.mrf.mxu1 }
 0x239   : > { %1553 = vst [vmem:[%s2640_s8 + $0x84] sm:$0xff] %v1810_v3  ;;  %1540 = vst [vmem:[%s2640_s8 + $0x38] sm:$0xf] %v1797_v61  ;;  %v1803_v8 = vpack.c.bf16 %v1112_v37, %v1112_v37  ;;  %v954_v16 = vadd.f32 %v953_v58, %v2632_v27  ;;  %v1104_v43 = vadd.f32 %v1103_v40, %v2685_v28 }
 0x23a   : > { %v955_v51 = vpop.f32.mrf.mxu0  ;;  %v1902_v25 = vpop.f32.mrf.mxu1 }
 0x23b   : > { %1546 = vst [vmem:[%s2640_s8 + $0x5c] sm:$0xf] %v1803_v8  ;;  %v1812_v5 = vpack.c.bf16 %v954_v16, %v952_v44  ;;  %v1799_v17 = vpack.c.bf16 %v1104_v43, %v1104_v43  ;;  %v1125_v47 = vadd.f32 %v1902_v25, %v2685_v28  ;;  %v956_v10 = vadd.f32 %v955_v51, %v2629_v1 }
 0x23c   : > { %v957_v48 = vpop.f32.mrf.mxu0  ;;  %v1116_v45 = vpop.f32.mrf.mxu1 }
 0x23d   : > { %1555 = vst [vmem:[%s2640_s8 + $0x90] sm:$0xff] %v1812_v5  ;;  %1542 = vst [vmem:[%s2640_s8 + $0x44] sm:$0xf] %v1799_v17  ;;  %v1809_v38 = vpack.c.bf16 %v1125_v47, %v1125_v47  ;;  %v958_v62 = vadd.f32 %v957_v48, %v2632_v27  ;;  %v1117_v7 = vadd.f32 %v1116_v45, %v2685_v28 }
 0x23e   : > { %v961_v32 = vpop.f32.mrf.mxu0  ;;  %v1903_v56 = vpop.f32.mrf.mxu1 }
 0x23f   : > { %1552 = vst [vmem:[%s2640_s8 + $0x80] sm:$0xf] %v1809_v38  ;;  %v1814_v18 = vpack.c.bf16 %v958_v62, %v956_v10  ;;  %v1805_v55 = vpack.c.bf16 %v1117_v7, %v1117_v7  ;;  %v1128_v63 = vadd.f32 %v1903_v56, %v2685_v28  ;;  %v962_v19 = vadd.f32 %v961_v32, %v2629_v1 }
 0x240   : > { %v963_v39 = vpop.f32.mrf.mxu0  ;;  %v1119_v11 = vpop.f32.mrf.mxu1 }
 0x241   : > { %1557 = vst [vmem:[%s2640_s8 + $0x9c] sm:$0xff] %v1814_v18  ;;  %1548 = vst [vmem:[%s2640_s8 + $0x68] sm:$0xf] %v1805_v55  ;;  %v1811_v57 = vpack.c.bf16 %v1128_v63, %v1128_v63  ;;  %v964_v60 = vadd.f32 %v963_v39, %v2632_v27  ;;  %v1120_v0 = vadd.f32 %v1119_v11, %v2685_v28 }
 0x242   : > { %v965_v52 = vpop.f32.mrf.mxu0  ;;  %v1906_v29 = vpop.f32.mrf.mxu1 }
 0x243   : > { %1554 = vst [vmem:[%s2640_s8 + $0x8c] sm:$0xf] %v1811_v57  ;;  %v1816_v12 = vpack.c.bf16 %v964_v60, %v962_v19  ;;  %v1807_v21 = vpack.c.bf16 %v1120_v0, %v1120_v0  ;;  %v1141_v46 = vadd.f32 %v1906_v29, %v2685_v28  ;;  %v966_v20 = vadd.f32 %v965_v52, %v2629_v1 }
 0x244   : > { %v967_v53 = vpop.f32.mrf.mxu0  ;;  %v1132_v13 = vpop.f32.mrf.mxu1 }
 0x245   : > { %1559 = vst [vmem:[%s2640_s8 + $0xa8] sm:$0xff] %v1816_v12  ;;  %1550 = vst [vmem:[%s2640_s8 + $0x74] sm:$0xf] %v1807_v21  ;;  %v1817_v9 = vpack.c.bf16 %v1141_v46, %v1141_v46  ;;  %v968_v33 = vadd.f32 %v967_v53, %v2632_v27  ;;  %v1133_v30 = vadd.f32 %v1132_v13, %v2685_v28 }
 0x246   : > { %v971_v15 = vpop.f32.mrf.mxu0  ;;  %v1907_v2 = vpop.f32.mrf.mxu1 }
 0x247   : > { %1560 = vst [vmem:[%s2640_s8 + $0xb0] sm:$0xf] %v1817_v9  ;;  %v1818_v4 = vpack.c.bf16 %v968_v33, %v966_v20  ;;  %v1813_v23 = vpack.c.bf16 %v1133_v30, %v1133_v30  ;;  %v1144_v31 = vadd.f32 %v1907_v2, %v2685_v28  ;;  %v972_v22 = vadd.f32 %v971_v15, %v2629_v1 }
 0x248   : > { %v973_v34 = vpop.f32.mrf.mxu0  ;;  %v1135_v14 = vpop.f32.mrf.mxu1 }
 0x249   : > { %1561 = vst [vmem:[%s2640_s8 + $0xb4] sm:$0xff] %v1818_v4  ;;  %1556 = vst [vmem:[%s2640_s8 + $0x98] sm:$0xf] %v1813_v23  ;;  %v1819_v6 = vpack.c.bf16 %v1144_v31, %v1144_v31  ;;  %v974_v35 = vadd.f32 %v973_v34, %v2632_v27  ;;  %v1136_v24 = vadd.f32 %v1135_v14, %v2685_v28 }
 0x24a   : > { %v975_v26 = vpop.f32.mrf.mxu0  ;;  %v1910_v54 = vpop.f32.mrf.mxu1 }
 0x24b   : > { %1562 = vst [vmem:[%s2640_s8 + $0xbc] sm:$0xf] %v1819_v6  ;;  %v1820_v41 = vpack.c.bf16 %v974_v35, %v972_v22  ;;  %v1815_v50 = vpack.c.bf16 %v1136_v24, %v1136_v24  ;;  %v1157_v36 = vadd.f32 %v1910_v54, %v2685_v28  ;;  %v976_v59 = vadd.f32 %v975_v26, %v2629_v1 }
 0x24c   : > { %v977_v42 = vpop.f32.mrf.mxu0  ;;  %v1148_v49 = vpop.f32.mrf.mxu1 }
 0x24d   : > { %1563 = vst [vmem:[%s2640_s8 + $0xc0] sm:$0xff] %v1820_v41  ;;  %1558 = vst [vmem:[%s2640_s8 + $0xa4] sm:$0xf] %v1815_v50  ;;  %v1825_v3 = vpack.c.bf16 %v1157_v36, %v1157_v36  ;;  %v978_v61 = vadd.f32 %v977_v42, %v2632_v27  ;;  %v1149_v37 = vadd.f32 %v1148_v49, %v2685_v28 }
 0x24e   : > { %v981_v58 = vpop.f32.mrf.mxu0  ;;  %v1911_v40 = vpop.f32.mrf.mxu1 }
 0x24f   : > { %1568 = vst [vmem:[%s2640_s8 + $0xe0] sm:$0xf] %v1825_v3  ;;  %v1822_v44 = vpack.c.bf16 %v978_v61, %v976_v59  ;;  %v1821_v8 = vpack.c.bf16 %v1149_v37, %v1149_v37  ;;  %v1160_v16 = vadd.f32 %v1911_v40, %v2685_v28  ;;  %v982_v25 = vadd.f32 %v981_v58, %v2629_v1 }
 0x250   : > { %v983_v43 = vpop.f32.mrf.mxu0  ;;  %v1151_v51 = vpop.f32.mrf.mxu1 }
 0x251   : > { %1565 = vst [vmem:[%s2640_s8 + $0xcc] sm:$0xff] %v1822_v44  ;;  %1564 = vst [vmem:[%s2640_s8 + $0xc8] sm:$0xf] %v1821_v8  ;;  %v1827_v5 = vpack.c.bf16 %v1160_v16, %v1160_v16  ;;  %v984_v17 = vadd.f32 %v983_v43, %v2632_v27  ;;  %v1152_v47 = vadd.f32 %v1151_v51, %v2685_v28 }
 0x252   : > { %v985_v48 = vpop.f32.mrf.mxu0  ;;  %v1914_v45 = vpop.f32.mrf.mxu1 }
 0x253   : > { %1570 = vst [vmem:[%s2640_s8 + $0xec] sm:$0xf] %v1827_v5  ;;  %v1824_v10 = vpack.c.bf16 %v984_v17, %v982_v25  ;;  %v1823_v38 = vpack.c.bf16 %v1152_v47, %v1152_v47  ;;  %v1173_v62 = vadd.f32 %v1914_v45, %v2685_v28  ;;  %v986_v56 = vadd.f32 %v985_v48, %v2629_v1 }
 0x254   : > { %v987_v7 = vpop.f32.mrf.mxu0  ;;  %v1164_v32 = vpop.f32.mrf.mxu1 }
 0x255   : > { %1567 = vst [vmem:[%s2640_s8 + $0xd8] sm:$0xff] %v1824_v10  ;;  %1566 = vst [vmem:[%s2640_s8 + $0xd4] sm:$0xf] %v1823_v38  ;;  %v1833_v18 = vpack.c.bf16 %v1173_v62, %v1173_v62  ;;  %v988_v55 = vadd.f32 %v987_v7, %v2632_v27  ;;  %v1165_v63 = vadd.f32 %v1164_v32, %v2685_v28 }
 0x256   : > { %v991_v39 = vpop.f32.mrf.mxu0  ;;  %v1915_v11 = vpop.f32.mrf.mxu1 }
 0x257   : > { %1576 = vst [vmem:[%s2640_s8 + $0x110] sm:$0xf] %v1833_v18  ;;  %v1826_v19 = vpack.c.bf16 %v988_v55, %v986_v56  ;;  %v1829_v57 = vpack.c.bf16 %v1165_v63, %v1165_v63  ;;  %v1176_v60 = vadd.f32 %v1915_v11, %v2685_v28  ;;  %v992_v29 = vadd.f32 %v991_v39, %v2629_v1 }
 0x258   : > { %v993_v0 = vpop.f32.mrf.mxu0  ;;  %v1167_v52 = vpop.f32.mrf.mxu1 }
 0x259   : > { %1569 = vst [vmem:[%s2640_s8 + $0xe4] sm:$0xff] %v1826_v19  ;;  %1572 = vst [vmem:[%s2640_s8 + $0xf8] sm:$0xf] %v1829_v57  ;;  %v1835_v12 = vpack.c.bf16 %v1176_v60, %v1176_v60  ;;  %v994_v21 = vadd.f32 %v993_v0, %v2632_v27  ;;  %v1168_v46 = vadd.f32 %v1167_v52, %v2685_v28 }
 0x25a   : > { %v995_v53 = vpop.f32.mrf.mxu0  ;;  %v1918_v13 = vpop.f32.mrf.mxu1 }
 0x25b   : > { %1578 = vst [vmem:[%s2640_s8 + $0x11c] sm:$0xf] %v1835_v12  ;;  %v1828_v20 = vpack.c.bf16 %v994_v21, %v992_v29  ;;  %v1831_v9 = vpack.c.bf16 %v1168_v46, %v1168_v46  ;;  %v1189_v33 = vadd.f32 %v1918_v13, %v2685_v28  ;;  %v996_v2 = vadd.f32 %v995_v53, %v2629_v1 }
 0x25c   : > { %v997_v30 = vpop.f32.mrf.mxu0  ;;  %v1180_v15 = vpop.f32.mrf.mxu1 }
 0x25d   : > { %1571 = vst [vmem:[%s2640_s8 + $0xf0] sm:$0xff] %v1828_v20  ;;  %1574 = vst [vmem:[%s2640_s8 + $0x104] sm:$0xf] %v1831_v9  ;;  %v1841_v4 = vpack.c.bf16 %v1189_v33, %v1189_v33  ;;  %v998_v23 = vadd.f32 %v997_v30, %v2632_v27  ;;  %v1181_v31 = vadd.f32 %v1180_v15, %v2685_v28 }
 0x25e   : > { %v1001_v34 = vpop.f32.mrf.mxu0  ;;  %v1919_v14 = vpop.f32.mrf.mxu1 }
 0x25f   : > { %1584 = vst [vmem:[%s2640_s8 + $0x140] sm:$0xf] %v1841_v4  ;;  %v1830_v22 = vpack.c.bf16 %v998_v23, %v996_v2  ;;  %v1837_v6 = vpack.c.bf16 %v1181_v31, %v1181_v31  ;;  %v1192_v35 = vadd.f32 %v1919_v14, %v2685_v28  ;;  %v1002_v54 = vadd.f32 %v1001_v34, %v2629_v1 }
 0x260   : > { %v1003_v24 = vpop.f32.mrf.mxu0  ;;  %v1183_v26 = vpop.f32.mrf.mxu1 }
 0x261   : > { %1573 = vst [vmem:[%s2640_s8 + $0xfc] sm:$0xff] %v1830_v22  ;;  %1580 = vst [vmem:[%s2640_s8 + $0x128] sm:$0xf] %v1837_v6  ;;  %v1843_v41 = vpack.c.bf16 %v1192_v35, %v1192_v35  ;;  %v1004_v50 = vadd.f32 %v1003_v24, %v2632_v27  ;;  %v1184_v36 = vadd.f32 %v1183_v26, %v2685_v28 }
 0x262   : > { %v1005_v42 = vpop.f32.mrf.mxu0  ;;  %v1922_v49 = vpop.f32.mrf.mxu1 }
 0x263   : > { %1586 = vst [vmem:[%s2640_s8 + $0x14c] sm:$0xf] %v1843_v41  ;;  %v1832_v59 = vpack.c.bf16 %v1004_v50, %v1002_v54  ;;  %v1839_v3 = vpack.c.bf16 %v1184_v36, %v1184_v36  ;;  %v1205_v61 = vadd.f32 %v1922_v49, %v2685_v28  ;;  %v1006_v40 = vadd.f32 %v1005_v42, %v2629_v1 }
 0x264   : > { %v1007_v37 = vpop.f32.mrf.mxu0  ;;  %v1196_v58 = vpop.f32.mrf.mxu1 }
 0x265   : > { %1575 = vst [vmem:[%s2640_s8 + $0x108] sm:$0xff] %v1832_v59  ;;  %1582 = vst [vmem:[%s2640_s8 + $0x134] sm:$0xf] %v1839_v3  ;;  %v1849_v44 = vpack.c.bf16 %v1205_v61, %v1205_v61  ;;  %v1008_v8 = vadd.f32 %v1007_v37, %v2632_v27  ;;  %v1197_v16 = vadd.f32 %v1196_v58, %v2685_v28 }
 0x266   : > { %v1923_v43 = vpop.f32.mrf.mxu1 }
 0x267   : > { %1592 = vst [vmem:[%s2640_s8 + $0x170] sm:$0xf] %v1849_v44  ;;  %v1834_v51 = vpack.c.bf16 %v1008_v8, %v1006_v40  ;;  %v1845_v25 = vpack.c.bf16 %v1197_v16, %v1197_v16  ;;  %v1208_v5 = vadd.f32 %v1923_v43, %v2685_v28 }
 0x268   : > { %v1199_v17 = vpop.f32.mrf.mxu1 }
 0x269   : > { %1577 = vst [vmem:[%s2640_s8 + $0x114] sm:$0xff] %v1834_v51  ;;  %1588 = vst [vmem:[%s2640_s8 + $0x158] sm:$0xf] %v1845_v25  ;;  %v1851_v47 = vpack.c.bf16 %v1208_v5, %v1208_v5  ;;  %v1200_v48 = vadd.f32 %v1199_v17, %v2685_v28 }
 0x26b   : > { %1594 = vst [vmem:[%s2640_s8 + $0x17c] sm:$0xf] %v1851_v47  ;;  %v1847_v1 = vpack.c.bf16 %v1200_v48, %v1200_v48 }
 0x26d   : > { %1590 = vst [vmem:[%s2640_s8 + $0x164] sm:$0xf] %v1847_v1 }
 0x26e PF: > { %s14_s17 = sadd.s32 1, %s2084_s17   ;;  %s2818_s15 = smov %s2080_s16 }
 0x26f   : > { %p11_p5 = scmp.ge.s32.totalorder %s14_s17, 4   ;;  %s2819_s16 = smov %s2821_s18 }
 0x271   :  { %13 = sbr.rel (!%p11_p5) target bundleno = 2 (0x2), region = 66 }

// kernel: attention_block.3
= control target key start
LH: loop header
LB: loop body
LE: loop exit
PB: predicated region body
PF: predicated region fallthrough
CT: control target
= control target key end

     0   :  { %11 = vsyncpa [#allocation9], 0  ;;  %s6378_s0 = inlined_call_operand.vmem [shape: f32[2,256,128], index: 0, kind: input, shape index: {}]   ;;  %s6379_s1 = inlined_call_operand.vmem [shape: bf16[2,256,384], index: 1, kind: input, shape index: {}, may-alias: {1,2,3}]   ;;  %s6380_s2 = inlined_call_operand.vmem [shape: bf16[2,256,384], index: 2, kind: input, shape index: {}, may-alias: {1,2,3}]   ;;  %s6381_s3 = inlined_call_operand.vmem [shape: bf16[2,256,384], index: 3, kind: input, shape index: {}, may-alias: {1,2,3}]   ;;  %s6382_s4 = inlined_call_operand.vmem [shape: bf16[128,128], index: 4, kind: input, shape index: {}]   ;;  %s6383_s5 = inlined_call_operand.vmem [shape: f32[1,128], index: 5, kind: input, shape index: {}]   ;;  %s6384_s6 = inlined_call_operand.hbm [shape: f32[2,256,128], index: 6, kind: output, shape index: {}]  }
   0x1   :  { %13 = vsyncpa [#allocation9 + $0x1], 0  ;;  %s4582_s21 = smov 0   ;;  %s4584_s22 = smov 0  }
   0x2   :  { %s4586_s23 = smov 0   ;;  %s4588_s24 = smov 0  }
   0x3   :  { %s4590_s25 = smov 0   ;;  %s4592_s26 = smov 0  }
   0x4 LB: > { %s3695_s27 = sadd.s32 4294967295, %s4539_s26   ;;  %s3696_s28 = sadd.s32 4294967294, %s4539_s26   ;;  %s4539_s26 = sphi %s4592_s26, %s19_s26   ;;  %s4535_s25 = sphi %s4590_s25, %s6733_s25   ;;  %s4531_s24 = sphi %s4588_s24, %s6732_s24   ;;  %s4527_s23 = sphi %s4586_s23, %s6731_s23   ;;  %s4523_s22 = sphi %s4584_s22, %s6730_s22   ;;  %s4519_s21 = sphi %s4582_s21, %s6729_s21  }
   0x5   : > { %s38_s29 = sadd.s32 1, %s4535_s25  ;;  %s75_s30 = sadd.s32 1, %s4527_s23 }
   0x6   : > { %p40_p0 = scmp.ge.s32.totalorder %s38_s29, 2  ;;  %p82_p1 = scmp.ne.s32.totalorder %s4527_s23, %s4523_s22 }
   0x7   : > { %p83_p2 = scmp.eq.s32.totalorder %s4539_s26, 0  ;;  %p212_p3 = scmp.eq.s32.totalorder %s3695_s27, 1 }
   0x8   : > { %s6735_s29 = smov (%p40_p0, %s38_s29), 0  ;;  %p217_p6 = scmp.ne.s32.totalorder %s4523_s22, %s4519_s21 }
   0x9   : > { %p4621_p4 = por %p83_p2, %p82_p1  ;;  %p4625_p5 = por %p212_p3, %p82_p1 }
   0xa   : > { %s70_s9 = ssub.s32 %s4535_s25, %s6735_s29  ;;  %p218_p8 = scmp.eq.s32.totalorder %s3696_s28, 1 }
   0xb   : > { %p73_p7 = scmp.eq.s32.totalorder %s70_s9, 0  ;;  %p3698_p10 = scmp.ge.s32.totalorder %s4539_s26, 2 }
   0xc   : > { %p4636_p9 = por %p218_p8, %p217_p6 }
   0xd   : > { %s4634_s10 = scalar_select %p73_p7, %s4527_s23, %s75_s30  }
   0xe   : > { %240 = sbr.rel (%p3698_p10) target bundleno = 97 (0x61), region = 24 }
  0x13   : > { %256 = sbr.rel (!%p4621_p4) target bundleno = 45 (0x2d), region = 32  ;;  %s258_s12 = sand.u32 (%p4621_p4), 1, %s4527_s23  }
  0x14   : > { %s4088_s13 = smul.u32 (%p4621_p4), 384, %s4535_s25  ;;  %s3699_s14 = sshll.u32 (%p4621_p4), %s258_s12, 7 }
  0x15   : > { %s4655_s18 = scalar_lea.vmem (%p4621_p4), [#allocation5], %s3699_s14 }
  0x16   : > { %s4650_s17 = scalar_lea.vmem (%p4621_p4), %s6379_s1, %s4088_s13 }
  0x17   : > { %v283_v0 = vld [vmem:[%s4650_s17] sm:$0xf] (%p4621_p4)  ;;  %v285_v1 = vld [vmem:[%s4650_s17 + $0xc] sm:$0xf] (%p4621_p4)  ;;  %v287_v2 = vld [vmem:[%s4650_s17 + $0x18] sm:$0xf] (%p4621_p4) }
  0x18   : > { %284 = vst [vmem:[%s4655_s18] sm:$0xf] %v283_v0  ;;  %286 = vst [vmem:[%s4655_s18 + $0x4] sm:$0xf] %v285_v1  ;;  %v289_v3 = vld [vmem:[%s4650_s17 + $0x24] sm:$0xf] }
  0x19   : > { %288 = vst [vmem:[%s4655_s18 + $0x8] sm:$0xf] %v287_v2  ;;  %v291_v4 = vld [vmem:[%s4650_s17 + $0x30] sm:$0xf]  ;;  %v293_v5 = vld [vmem:[%s4650_s17 + $0x3c] sm:$0xf] }
  0x1a   : > { %290 = vst [vmem:[%s4655_s18 + $0xc] sm:$0xf] %v289_v3  ;;  %292 = vst [vmem:[%s4655_s18 + $0x10] sm:$0xf] %v291_v4  ;;  %v295_v6 = vld [vmem:[%s4650_s17 + $0x48] sm:$0xf] }
  0x1b   : > { %294 = vst [vmem:[%s4655_s18 + $0x14] sm:$0xf] %v293_v5  ;;  %v297_v7 = vld [vmem:[%s4650_s17 + $0x54] sm:$0xf]  ;;  %v299_v8 = vld [vmem:[%s4650_s17 + $0x60] sm:$0xf] }
  0x1c   : > { %296 = vst [vmem:[%s4655_s18 + $0x18] sm:$0xf] %v295_v6  ;;  %298 = vst [vmem:[%s4655_s18 + $0x1c] sm:$0xf] %v297_v7  ;;  %v301_v9 = vld [vmem:[%s4650_s17 + $0x6c] sm:$0xf] }
  0x1d   : > { %300 = vst [vmem:[%s4655_s18 + $0x20] sm:$0xf] %v299_v8  ;;  %v303_v10 = vld [vmem:[%s4650_s17 + $0x78] sm:$0xf]  ;;  %v305_v11 = vld [vmem:[%s4650_s17 + $0x84] sm:$0xf] }
  0x1e   : > { %302 = vst [vmem:[%s4655_s18 + $0x24] sm:$0xf] %v301_v9  ;;  %304 = vst [vmem:[%s4655_s18 + $0x28] sm:$0xf] %v303_v10  ;;  %v307_v12 = vld [vmem:[%s4650_s17 + $0x90] sm:$0xf] }
  0x1f   : > { %306 = vst [vmem:[%s4655_s18 + $0x2c] sm:$0xf] %v305_v11  ;;  %v309_v13 = vld [vmem:[%s4650_s17 + $0x9c] sm:$0xf]  ;;  %v311_v14 = vld [vmem:[%s4650_s17 + $0xa8] sm:$0xf] }
  0x20   : > { %308 = vst [vmem:[%s4655_s18 + $0x30] sm:$0xf] %v307_v12  ;;  %310 = vst [vmem:[%s4655_s18 + $0x34] sm:$0xf] %v309_v13  ;;  %v313_v15 = vld [vmem:[%s4650_s17 + $0xb4] sm:$0xf] }
  0x21   : > { %312 = vst [vmem:[%s4655_s18 + $0x38] sm:$0xf] %v311_v14  ;;  %v315_v16 = vld [vmem:[%s4650_s17 + $0xc0] sm:$0xf]  ;;  %v317_v17 = vld [vmem:[%s4650_s17 + $0xcc] sm:$0xf] }
  0x22   : > { %314 = vst [vmem:[%s4655_s18 + $0x3c] sm:$0xf] %v313_v15  ;;  %316 = vst [vmem:[%s4655_s18 + $0x40] sm:$0xf] %v315_v16  ;;  %v319_v18 = vld [vmem:[%s4650_s17 + $0xd8] sm:$0xf] }
  0x23   : > { %318 = vst [vmem:[%s4655_s18 + $0x44] sm:$0xf] %v317_v17  ;;  %v321_v19 = vld [vmem:[%s4650_s17 + $0xe4] sm:$0xf]  ;;  %v323_v20 = vld [vmem:[%s4650_s17 + $0xf0] sm:$0xf] }
  0x24   : > { %320 = vst [vmem:[%s4655_s18 + $0x48] sm:$0xf] %v319_v18  ;;  %322 = vst [vmem:[%s4655_s18 + $0x4c] sm:$0xf] %v321_v19  ;;  %v325_v21 = vld [vmem:[%s4650_s17 + $0xfc] sm:$0xf] }
  0x25   : > { %324 = vst [vmem:[%s4655_s18 + $0x50] sm:$0xf] %v323_v20  ;;  %v327_v22 = vld [vmem:[%s4650_s17 + $0x108] sm:$0xf]  ;;  %v329_v23 = vld [vmem:[%s4650_s17 + $0x114] sm:$0xf] }
  0x26   : > { %326 = vst [vmem:[%s4655_s18 + $0x54] sm:$0xf] %v325_v21  ;;  %328 = vst [vmem:[%s4655_s18 + $0x58] sm:$0xf] %v327_v22  ;;  %v331_v24 = vld [vmem:[%s4650_s17 + $0x120] sm:$0xf] }
  0x27   : > { %330 = vst [vmem:[%s4655_s18 + $0x5c] sm:$0xf] %v329_v23  ;;  %v333_v25 = vld [vmem:[%s4650_s17 + $0x12c] sm:$0xf]  ;;  %v335_v26 = vld [vmem:[%s4650_s17 + $0x138] sm:$0xf] }
  0x28   : > { %332 = vst [vmem:[%s4655_s18 + $0x60] sm:$0xf] %v331_v24  ;;  %334 = vst [vmem:[%s4655_s18 + $0x64] sm:$0xf] %v333_v25  ;;  %v337_v27 = vld [vmem:[%s4650_s17 + $0x144] sm:$0xf] }
  0x29   : > { %336 = vst [vmem:[%s4655_s18 + $0x68] sm:$0xf] %v335_v26  ;;  %v339_v28 = vld [vmem:[%s4650_s17 + $0x150] sm:$0xf]  ;;  %v341_v29 = vld [vmem:[%s4650_s17 + $0x15c] sm:$0xf] }
  0x2a   : > { %338 = vst [vmem:[%s4655_s18 + $0x6c] sm:$0xf] %v337_v27  ;;  %340 = vst [vmem:[%s4655_s18 + $0x70] sm:$0xf] %v339_v28  ;;  %v343_v30 = vld [vmem:[%s4650_s17 + $0x168] sm:$0xf] }
  0x2b   : > { %342 = vst [vmem:[%s4655_s18 + $0x74] sm:$0xf] %v341_v29  ;;  %v345_v31 = vld [vmem:[%s4650_s17 + $0x174] sm:$0xf]  ;;  %344 = vst [vmem:[%s4655_s18 + $0x78] sm:$0xf] %v343_v30 }
  0x2c   : > { %346 = vst [vmem:[%s4655_s18 + $0x7c] sm:$0xf] %v345_v31 }
  0x2d PF: > { %434 = sbr.rel (!%p4621_p4) target bundleno = 71 (0x47), region = 73  ;;  %s436_s19 = sand.u32 (%p4621_p4), 1, %s4527_s23  }
  0x2e   : > { %s3702_s20 = smul.u32 (%p4621_p4), 384, %s4535_s25  ;;  %s3701_s27 = sshll.u32 (%p4621_p4), %s436_s19, 7 }
  0x2f   : > { %s4730_s12 = scalar_lea.vmem (%p4621_p4), [#allocation6], %s3701_s27 }
  0x30   : > { %s4725_s9 = scalar_lea.vmem (%p4621_p4), %s6380_s2, %s3702_s20 }
  0x31   : > { %v3703_v32 = vld [vmem:[%s4725_s9 + $0x4] sm:$0xf] (%p4621_p4)  ;;  %v3704_v33 = vld [vmem:[%s4725_s9 + $0x10] sm:$0xf] (%p4621_p4)  ;;  %v3705_v34 = vld [vmem:[%s4725_s9 + $0x1c] sm:$0xf] (%p4621_p4) }
  0x32   : > { %463 = vst [vmem:[%s4730_s12] sm:$0xf] %v3703_v32  ;;  %465 = vst [vmem:[%s4730_s12 + $0x4] sm:$0xf] %v3704_v33  ;;  %v3706_v35 = vld [vmem:[%s4725_s9 + $0x28] sm:$0xf] }
  0x33   : > { %467 = vst [vmem:[%s4730_s12 + $0x8] sm:$0xf] %v3705_v34  ;;  %v3707_v36 = vld [vmem:[%s4725_s9 + $0x34] sm:$0xf]  ;;  %v3708_v37 = vld [vmem:[%s4725_s9 + $0x40] sm:$0xf] }
  0x34   : > { %469 = vst [vmem:[%s4730_s12 + $0xc] sm:$0xf] %v3706_v35  ;;  %471 = vst [vmem:[%s4730_s12 + $0x10] sm:$0xf] %v3707_v36  ;;  %v3709_v38 = vld [vmem:[%s4725_s9 + $0x4c] sm:$0xf] }
  0x35   : > { %473 = vst [vmem:[%s4730_s12 + $0x14] sm:$0xf] %v3708_v37  ;;  %v3710_v39 = vld [vmem:[%s4725_s9 + $0x58] sm:$0xf]  ;;  %v3711_v40 = vld [vmem:[%s4725_s9 + $0x64] sm:$0xf] }
  0x36   : > { %475 = vst [vmem:[%s4730_s12 + $0x18] sm:$0xf] %v3709_v38  ;;  %477 = vst [vmem:[%s4730_s12 + $0x1c] sm:$0xf] %v3710_v39  ;;  %v3712_v41 = vld [vmem:[%s4725_s9 + $0x70] sm:$0xf] }
  0x37   : > { %479 = vst [vmem:[%s4730_s12 + $0x20] sm:$0xf] %v3711_v40  ;;  %v3713_v42 = vld [vmem:[%s4725_s9 + $0x7c] sm:$0xf]  ;;  %v3714_v43 = vld [vmem:[%s4725_s9 + $0x88] sm:$0xf] }
  0x38   : > { %481 = vst [vmem:[%s4730_s12 + $0x24] sm:$0xf] %v3712_v41  ;;  %483 = vst [vmem:[%s4730_s12 + $0x28] sm:$0xf] %v3713_v42  ;;  %v3715_v44 = vld [vmem:[%s4725_s9 + $0x94] sm:$0xf] }
  0x39   : > { %485 = vst [vmem:[%s4730_s12 + $0x2c] sm:$0xf] %v3714_v43  ;;  %v3716_v45 = vld [vmem:[%s4725_s9 + $0xa0] sm:$0xf]  ;;  %v3717_v46 = vld [vmem:[%s4725_s9 + $0xac] sm:$0xf] }
  0x3a   : > { %487 = vst [vmem:[%s4730_s12 + $0x30] sm:$0xf] %v3715_v44  ;;  %489 = vst [vmem:[%s4730_s12 + $0x34] sm:$0xf] %v3716_v45  ;;  %v3718_v47 = vld [vmem:[%s4725_s9 + $0xb8] sm:$0xf] }
  0x3b   : > { %491 = vst [vmem:[%s4730_s12 + $0x38] sm:$0xf] %v3717_v46  ;;  %v3719_v48 = vld [vmem:[%s4725_s9 + $0xc4] sm:$0xf]  ;;  %v3720_v49 = vld [vmem:[%s4725_s9 + $0xd0] sm:$0xf] }
  0x3c   : > { %493 = vst [vmem:[%s4730_s12 + $0x3c] sm:$0xf] %v3718_v47  ;;  %495 = vst [vmem:[%s4730_s12 + $0x40] sm:$0xf] %v3719_v48  ;;  %v3721_v50 = vld [vmem:[%s4725_s9 + $0xdc] sm:$0xf] }
  0x3d   : > { %497 = vst [vmem:[%s4730_s12 + $0x44] sm:$0xf] %v3720_v49  ;;  %v3722_v51 = vld [vmem:[%s4725_s9 + $0xe8] sm:$0xf]  ;;  %v3723_v52 = vld [vmem:[%s4725_s9 + $0xf4] sm:$0xf] }
  0x3e   : > { %499 = vst [vmem:[%s4730_s12 + $0x48] sm:$0xf] %v3721_v50  ;;  %501 = vst [vmem:[%s4730_s12 + $0x4c] sm:$0xf] %v3722_v51  ;;  %v3724_v53 = vld [vmem:[%s4725_s9 + $0x100] sm:$0xf] }
  0x3f   : > { %503 = vst [vmem:[%s4730_s12 + $0x50] sm:$0xf] %v3723_v52  ;;  %v3725_v54 = vld [vmem:[%s4725_s9 + $0x10c] sm:$0xf]  ;;  %v3726_v55 = vld [vmem:[%s4725_s9 + $0x118] sm:$0xf] }
  0x40   : > { %505 = vst [vmem:[%s4730_s12 + $0x54] sm:$0xf] %v3724_v53  ;;  %507 = vst [vmem:[%s4730_s12 + $0x58] sm:$0xf] %v3725_v54  ;;  %v3727_v56 = vld [vmem:[%s4725_s9 + $0x124] sm:$0xf] }
  0x41   : > { %509 = vst [vmem:[%s4730_s12 + $0x5c] sm:$0xf] %v3726_v55  ;;  %v3728_v57 = vld [vmem:[%s4725_s9 + $0x130] sm:$0xf]  ;;  %v3729_v58 = vld [vmem:[%s4725_s9 + $0x13c] sm:$0xf] }
  0x42   : > { %511 = vst [vmem:[%s4730_s12 + $0x60] sm:$0xf] %v3727_v56  ;;  %513 = vst [vmem:[%s4730_s12 + $0x64] sm:$0xf] %v3728_v57  ;;  %v3730_v59 = vld [vmem:[%s4725_s9 + $0x148] sm:$0xf] }
  0x43   : > { %515 = vst [vmem:[%s4730_s12 + $0x68] sm:$0xf] %v3729_v58  ;;  %v3731_v60 = vld [vmem:[%s4725_s9 + $0x154] sm:$0xf]  ;;  %v3732_v61 = vld [vmem:[%s4725_s9 + $0x160] sm:$0xf] }
  0x44   : > { %517 = vst [vmem:[%s4730_s12 + $0x6c] sm:$0xf] %v3730_v59  ;;  %519 = vst [vmem:[%s4730_s12 + $0x70] sm:$0xf] %v3731_v60  ;;  %v3733_v62 = vld [vmem:[%s4725_s9 + $0x16c] sm:$0xf] }
  0x45   : > { %521 = vst [vmem:[%s4730_s12 + $0x74] sm:$0xf] %v3732_v61  ;;  %v3734_v63 = vld [vmem:[%s4725_s9 + $0x178] sm:$0xf]  ;;  %523 = vst [vmem:[%s4730_s12 + $0x78] sm:$0xf] %v3733_v62 }
  0x46   : > { %525 = vst [vmem:[%s4730_s12 + $0x7c] sm:$0xf] %v3734_v63 }
  0x47 PF: > { %613 = sbr.rel (!%p4621_p4) target bundleno = 97 (0x61), region = 114  ;;  %s615_s13 = sand.u32 (%p4621_p4), 1, %s4527_s23  }
  0x48   : > { %s3736_s14 = smul.u32 (%p4621_p4), 384, %s4535_s25  ;;  %s3735_s15 = sshll.u32 (%p4621_p4), %s615_s13, 7 }
  0x49   : > { %s4805_s7 = scalar_lea.vmem (%p4621_p4), [#allocation7], %s3735_s15 }
  0x4a   : > { %s4800_s18 = scalar_lea.vmem (%p4621_p4), %s6381_s3, %s3736_s14 }
  0x4b   : > { %v3737_v0 = vld [vmem:[%s4800_s18 + $0x8] sm:$0xf] (%p4621_p4)  ;;  %v3738_v1 = vld [vmem:[%s4800_s18 + $0x14] sm:$0xf] (%p4621_p4)  ;;  %v3739_v2 = vld [vmem:[%s4800_s18 + $0x20] sm:$0xf] (%p4621_p4) }
  0x4c   : > { %642 = vst [vmem:[%s4805_s7] sm:$0xf] %v3737_v0  ;;  %644 = vst [vmem:[%s4805_s7 + $0x4] sm:$0xf] %v3738_v1  ;;  %v3740_v3 = vld [vmem:[%s4800_s18 + $0x2c] sm:$0xf] }
  0x4d   : > { %646 = vst [vmem:[%s4805_s7 + $0x8] sm:$0xf] %v3739_v2  ;;  %v3741_v4 = vld [vmem:[%s4800_s18 + $0x38] sm:$0xf]  ;;  %v3742_v5 = vld [vmem:[%s4800_s18 + $0x44] sm:$0xf] }
  0x4e   : > { %648 = vst [vmem:[%s4805_s7 + $0xc] sm:$0xf] %v3740_v3  ;;  %650 = vst [vmem:[%s4805_s7 + $0x10] sm:$0xf] %v3741_v4  ;;  %v3743_v6 = vld [vmem:[%s4800_s18 + $0x50] sm:$0xf] }
  0x4f   : > { %652 = vst [vmem:[%s4805_s7 + $0x14] sm:$0xf] %v3742_v5  ;;  %v3744_v7 = vld [vmem:[%s4800_s18 + $0x5c] sm:$0xf]  ;;  %v3745_v8 = vld [vmem:[%s4800_s18 + $0x68] sm:$0xf] }
  0x50   : > { %654 = vst [vmem:[%s4805_s7 + $0x18] sm:$0xf] %v3743_v6  ;;  %656 = vst [vmem:[%s4805_s7 + $0x1c] sm:$0xf] %v3744_v7  ;;  %v3746_v9 = vld [vmem:[%s4800_s18 + $0x74] sm:$0xf] }
  0x51   : > { %658 = vst [vmem:[%s4805_s7 + $0x20] sm:$0xf] %v3745_v8  ;;  %v3747_v10 = vld [vmem:[%s4800_s18 + $0x80] sm:$0xf]  ;;  %v3748_v11 = vld [vmem:[%s4800_s18 + $0x8c] sm:$0xf] }
  0x52   : > { %660 = vst [vmem:[%s4805_s7 + $0x24] sm:$0xf] %v3746_v9  ;;  %662 = vst [vmem:[%s4805_s7 + $0x28] sm:$0xf] %v3747_v10  ;;  %v3749_v12 = vld [vmem:[%s4800_s18 + $0x98] sm:$0xf] }
  0x53   : > { %664 = vst [vmem:[%s4805_s7 + $0x2c] sm:$0xf] %v3748_v11  ;;  %v3750_v13 = vld [vmem:[%s4800_s18 + $0xa4] sm:$0xf]  ;;  %v3751_v14 = vld [vmem:[%s4800_s18 + $0xb0] sm:$0xf] }
  0x54   : > { %666 = vst [vmem:[%s4805_s7 + $0x30] sm:$0xf] %v3749_v12  ;;  %668 = vst [vmem:[%s4805_s7 + $0x34] sm:$0xf] %v3750_v13  ;;  %v3752_v15 = vld [vmem:[%s4800_s18 + $0xbc] sm:$0xf] }
  0x55   : > { %670 = vst [vmem:[%s4805_s7 + $0x38] sm:$0xf] %v3751_v14  ;;  %v3753_v16 = vld [vmem:[%s4800_s18 + $0xc8] sm:$0xf]  ;;  %v3754_v17 = vld [vmem:[%s4800_s18 + $0xd4] sm:$0xf] }
  0x56   : > { %672 = vst [vmem:[%s4805_s7 + $0x3c] sm:$0xf] %v3752_v15  ;;  %674 = vst [vmem:[%s4805_s7 + $0x40] sm:$0xf] %v3753_v16  ;;  %v3755_v18 = vld [vmem:[%s4800_s18 + $0xe0] sm:$0xf] }
  0x57   : > { %676 = vst [vmem:[%s4805_s7 + $0x44] sm:$0xf] %v3754_v17  ;;  %v3756_v19 = vld [vmem:[%s4800_s18 + $0xec] sm:$0xf]  ;;  %v3757_v20 = vld [vmem:[%s4800_s18 + $0xf8] sm:$0xf] }
  0x58   : > { %678 = vst [vmem:[%s4805_s7 + $0x48] sm:$0xf] %v3755_v18  ;;  %680 = vst [vmem:[%s4805_s7 + $0x4c] sm:$0xf] %v3756_v19  ;;  %v3758_v21 = vld [vmem:[%s4800_s18 + $0x104] sm:$0xf] }
  0x59   : > { %682 = vst [vmem:[%s4805_s7 + $0x50] sm:$0xf] %v3757_v20  ;;  %v3759_v22 = vld [vmem:[%s4800_s18 + $0x110] sm:$0xf]  ;;  %v3760_v23 = vld [vmem:[%s4800_s18 + $0x11c] sm:$0xf] }
  0x5a   : > { %684 = vst [vmem:[%s4805_s7 + $0x54] sm:$0xf] %v3758_v21  ;;  %686 = vst [vmem:[%s4805_s7 + $0x58] sm:$0xf] %v3759_v22  ;;  %v3761_v24 = vld [vmem:[%s4800_s18 + $0x128] sm:$0xf] }
  0x5b   : > { %688 = vst [vmem:[%s4805_s7 + $0x5c] sm:$0xf] %v3760_v23  ;;  %v3762_v25 = vld [vmem:[%s4800_s18 + $0x134] sm:$0xf]  ;;  %v3763_v26 = vld [vmem:[%s4800_s18 + $0x140] sm:$0xf] }
  0x5c   : > { %690 = vst [vmem:[%s4805_s7 + $0x60] sm:$0xf] %v3761_v24  ;;  %692 = vst [vmem:[%s4805_s7 + $0x64] sm:$0xf] %v3762_v25  ;;  %v3764_v27 = vld [vmem:[%s4800_s18 + $0x14c] sm:$0xf] }
  0x5d   : > { %694 = vst [vmem:[%s4805_s7 + $0x68] sm:$0xf] %v3763_v26  ;;  %v3765_v28 = vld [vmem:[%s4800_s18 + $0x158] sm:$0xf]  ;;  %v3766_v29 = vld [vmem:[%s4800_s18 + $0x164] sm:$0xf] }
  0x5e   : > { %696 = vst [vmem:[%s4805_s7 + $0x6c] sm:$0xf] %v3764_v27  ;;  %698 = vst [vmem:[%s4805_s7 + $0x70] sm:$0xf] %v3765_v28  ;;  %v3767_v30 = vld [vmem:[%s4800_s18 + $0x170] sm:$0xf] }
  0x5f   : > { %700 = vst [vmem:[%s4805_s7 + $0x74] sm:$0xf] %v3766_v29  ;;  %v3768_v31 = vld [vmem:[%s4800_s18 + $0x17c] sm:$0xf]  ;;  %702 = vst [vmem:[%s4805_s7 + $0x78] sm:$0xf] %v3767_v30 }
  0x60   : > { %704 = vst [vmem:[%s4805_s7 + $0x7c] sm:$0xf] %v3768_v31 }
  0x61 PF: > { %p3769_p11 = scmp.ge.s32.totalorder %s4539_s26, 1  ;;  %p791_p12 = scmp.lt.s32.totalorder %s4539_s26, 3 }
  0x63   : > { %p792_p13 = pnand %p3769_p11, %p791_p12 }
  0x65   : > { %795 = sbr.rel (%p792_p13) target bundleno = 1383 (0x567), region = 155 }
  0x6a   : > { %s4871_s19 = sand.u32 1, %s4523_s22   ;;  %vm877_vm0 = vcmask 7168   ;;  %v4541_v0 = vmov -inf   ;;  %v4542_v26 = vmov 0   ;;  %v4543_v27 = vmov 0.0   ;;  %p859_p0 = scmp.lt.s32.totalorder %s4531_s24, 1 }
  0x6b   : > { %s4874_s20 = sshll.u32 %s4871_s19, 7  ;;  %878 = vst.msk [vmem:[#allocation2] sm:$0xff] %vm877_vm0, %v4541_v0  ;;  %879 = vst.msk [vmem:[#allocation2 + $0x8] sm:$0xff] %vm877_vm0, %v4541_v0  ;;  %4149 = vset.pattern.permute.xlu0 %v4542_v26  ;;  %4150 = vset.pattern.permute.xlu1 %v4542_v26  ;;  %s4544_s16 = smov [#allocation8]  }
  0x6c   : > { %s4877_s27 = scalar_lea.vmem [#allocation6], %s4874_s20  ;;  %s4887_s28 = scalar_lea.vmem [#allocation5], %s4874_s20  ;;  %880 = vst.msk [vmem:[#allocation2 + $0x10] sm:$0xff] %vm877_vm0, %v4541_v0  ;;  %881 = vst.msk [vmem:[#allocation2 + $0x18] sm:$0xff] %vm877_vm0, %v4541_v0 }
  0x6d   : > { %v4151_v32 = vld [vmem:[%s4877_s27 + $0x78] sm:$0xff]   ;;  %v4153_v34 = vld [vmem:[%s4877_s27 + $0x70] sm:$0xff]   ;;  %v4155_v36 = vld [vmem:[%s4877_s27 + $0x68] sm:$0xff]   ;;  %882 = vst.msk [vmem:[#allocation2 + $0x20] sm:$0xff] %vm877_vm0, %v4541_v0  ;;  %s5173_s30 = scalar_lea.vmem [#allocation7], %s4874_s20  ;;  %s4467_s17 = sshll.u32 %s4544_s16, 4  ;;  %s4468_s17 = int_to_ptr.vmem [resolvable:$false] %s4467_s17 }
  0x6e   : > { %v4152_v33 = vld [vmem:[%s4877_s27 + $0x38] sm:$0xff]   ;;  %3840 = vmatprep.subr.bf16.mxu0 %v4151_v32  ;;  %v4154_v35 = vld [vmem:[%s4877_s27 + $0x30] sm:$0xff]   ;;  %v4156_v37 = vld [vmem:[%s4877_s27 + $0x28] sm:$0xff]   ;;  %883 = vst.msk [vmem:[#allocation2 + $0x28] sm:$0xff] %vm877_vm0, %v4541_v0  ;;  %s860_s14 = scalar_select %p859_p0, %s4531_s24, 1 }
  0x6f   : > { %3841 = vmatpush3.bf16.xpose.msra.mxu0 %v4152_v33  ;;  %v4157_v38 = vld [vmem:[%s4877_s27 + $0x60] sm:$0xff]   ;;  %v4159_v41 = vld [vmem:[%s4877_s27 + $0x58] sm:$0xff]   ;;  %v4161_v43 = vld [vmem:[%s4877_s27 + $0x50] sm:$0xff]   ;;  %884 = vst.msk [vmem:[#allocation2 + $0x30] sm:$0xff] %vm877_vm0, %v4541_v0 }
  0x70   : > { %3842 = vmatprep.subr.bf16.mxu0 %v4153_v34  ;;  %v4167_v39 = vld [vmem:[%s4887_s28] sm:$0xff]   ;;  %v4160_v42 = vld [vmem:[%s4877_s27 + $0x18] sm:$0xff]   ;;  %v4162_v44 = vld [vmem:[%s4877_s27 + $0x10] sm:$0xff]   ;;  %885 = vst.msk [vmem:[#allocation2 + $0x38] sm:$0xff] %vm877_vm0, %v4541_v0  ;;  %s3838_s15 = sshll.u32 %s860_s14, 8 }
  0x71   : > { %3856 = vmatprep.mubr.bf16.mxu0 %v4167_v39  ;;  %v4158_v40 = vld [vmem:[%s4877_s27 + $0x20] sm:$0xff]   ;;  %v4163_v45 = vld [vmem:[%s4877_s27 + $0x48] sm:$0xff]   ;;  %v4169_v50 = vld [vmem:[%s4887_s28 + $0x10] sm:$0xff]   ;;  %886 = vst.msk [vmem:[#allocation2 + $0x40] sm:$0xff] %vm877_vm0, %v4541_v0  ;;  %s6217_s18 = scalar_lea.vmem %s6378_s0, %s3838_s15 }
  0x72   : > { %v4164_v46 = vld [vmem:[%s4877_s27 + $0x8] sm:$0xff]   ;;  %v4165_v47 = vld [vmem:[%s4877_s27 + $0x40] sm:$0xff]   ;;  %v4170_v51 = vld [vmem:[%s4887_s28 + $0x18] sm:$0xff]   ;;  %887 = vst.msk [vmem:[#allocation2 + $0x48] sm:$0xff] %vm877_vm0, %v4541_v0 }
  0x73   : > { %v4166_v48 = vld [vmem:[%s4877_s27] sm:$0xff]   ;;  %v4168_v49 = vld [vmem:[%s4887_s28 + $0x8] sm:$0xff]   ;;  %v4173_v54 = vld [vmem:[%s4887_s28 + $0x30] sm:$0xff]   ;;  %888 = vst.msk [vmem:[#allocation2 + $0x50] sm:$0xff] %vm877_vm0, %v4541_v0  ;;  %s3773_s27 = sshll.u32 %s4871_s19, 8 }
  0x74   : > { %v4171_v52 = vld [vmem:[%s4887_s28 + $0x20] sm:$0xff]   ;;  %v4172_v53 = vld [vmem:[%s4887_s28 + $0x28] sm:$0xff]   ;;  %v4174_v55 = vld [vmem:[%s4887_s28 + $0x38] sm:$0xff]   ;;  %889 = vst.msk [vmem:[#allocation2 + $0x58] sm:$0xff] %vm877_vm0, %v4541_v0 }
  0x75   : > { %v4175_v56 = vld [vmem:[%s4887_s28 + $0x40] sm:$0xff]   ;;  %v4176_v57 = vld [vmem:[%s4887_s28 + $0x48] sm:$0xff]   ;;  %v4177_v58 = vld [vmem:[%s4887_s28 + $0x50] sm:$0xff]   ;;  %890 = vst.msk [vmem:[#allocation2 + $0x60] sm:$0xff] %vm877_vm0, %v4541_v0 }
  0x76   : > { %v4178_v59 = vld [vmem:[%s4887_s28 + $0x58] sm:$0xff]   ;;  %v4179_v60 = vld [vmem:[%s4887_s28 + $0x60] sm:$0xff]   ;;  %v4180_v61 = vld [vmem:[%s4887_s28 + $0x68] sm:$0xff]   ;;  %891 = vst.msk [vmem:[#allocation2 + $0x68] sm:$0xff] %vm877_vm0, %v4541_v0 }
  0x77   : > { %3843 = vmatpush3.bf16.xpose.msra.mxu0 %v4154_v35  ;;  %v4181_v62 = vld [vmem:[%s4887_s28 + $0x70] sm:$0xff]   ;;  %v4182_v63 = vld [vmem:[%s4887_s28 + $0x78] sm:$0xff]   ;;  %892 = vst.msk [vmem:[#allocation2 + $0x70] sm:$0xff] %vm877_vm0, %v4541_v0  ;;  %893 = vst.msk [vmem:[#allocation2 + $0x78] sm:$0xff] %vm877_vm0, %v4541_v0  ;;  %s6230_s28 = scalar_lea.vmem [#allocation8], %s3773_s27 }
  0x78   : > { %3844 = vmatprep.subr.bf16.mxu0 %v4155_v36  ;;  %894 = vst.msk [vmem:[#allocation2 + $0x80] sm:$0xff] %vm877_vm0, %v4541_v0  ;;  %895 = vst.msk [vmem:[#allocation2 + $0x88] sm:$0xff] %vm877_vm0, %v4541_v0  ;;  %s3548_s9 = sshll.u32 %s6230_s28, 4  ;;  %s6328_s9 = int_to_ptr.vmem [resolvable:$true] %s3548_s9 }
  0x79   : > { %896 = vst.msk [vmem:[#allocation2 + $0x90] sm:$0xff] %vm877_vm0, %v4541_v0  ;;  %897 = vst.msk [vmem:[#allocation2 + $0x98] sm:$0xff] %vm877_vm0, %v4541_v0  ;;  %s4463_s15 = scalar_lea.vmem %s6328_s9, 4096  ;;  %p4470_p4 = scmp.lt.s32.totalorder %s6328_s9, %s4468_s17 }
  0x7a   : > { %898 = vst.msk [vmem:[#allocation2 + $0xa0] sm:$0xff] %vm877_vm0, %v4541_v0  ;;  %899 = vst.msk [vmem:[#allocation2 + $0xa8] sm:$0xff] %vm877_vm0, %v4541_v0  ;;  %p4464_p1 = scmp.ne.s32.totalorder %s6328_s9, %s4463_s15 }
  0x7b   : > { %900 = vst.msk [vmem:[#allocation2 + $0xb0] sm:$0xff] %vm877_vm0, %v4541_v0  ;;  %901 = vst.msk [vmem:[#allocation2 + $0xb8] sm:$0xff] %vm877_vm0, %v4541_v0 }
  0x7c   : > { %902 = vst.msk [vmem:[#allocation2 + $0xc0] sm:$0xff] %vm877_vm0, %v4541_v0  ;;  %903 = vst.msk [vmem:[#allocation2 + $0xc8] sm:$0xff] %vm877_vm0, %v4541_v0  ;;  %p4465_p2 = pnand %p4464_p1, %p4625_p5 }
  0x7d   : > { %904 = vst.msk [vmem:[#allocation2 + $0xd0] sm:$0xff] %vm877_vm0, %v4541_v0  ;;  %905 = vst.msk [vmem:[#allocation2 + $0xd8] sm:$0xff] %vm877_vm0, %v4541_v0 }
  0x7e   : > { %906 = vst.msk [vmem:[#allocation2 + $0xe0] sm:$0xff] %vm877_vm0, %v4541_v0  ;;  %907 = vst.msk [vmem:[#allocation2 + $0xe8] sm:$0xff] %vm877_vm0, %v4541_v0  ;;  %p4466_p3 = pneg %p4465_p2 }
  0x7f   : > { %3845 = vmatpush3.bf16.xpose.msra.mxu0 %v4156_v37  ;;  %908 = vst.msk [vmem:[#allocation2 + $0xf0] sm:$0xff] %vm877_vm0, %v4541_v0  ;;  %909 = vst.msk [vmem:[#allocation2 + $0xf8] sm:$0xff] %vm877_vm0, %v4541_v0 }
  0x80   : > { %3846 = vmatprep.subr.bf16.mxu0 %v4157_v38  ;;  %911 = vst.msk [vmem:[#allocation3 + $0x8] sm:$0xff] %vm877_vm0, %v4543_v27  ;;  %910 = vst.msk [vmem:[#allocation3] sm:$0xff] %vm877_vm0, %v4543_v27 }
  0x81   : > { %912 = vst.msk [vmem:[#allocation3 + $0x10] sm:$0xff] %vm877_vm0, %v4543_v27  ;;  %913 = vst.msk [vmem:[#allocation3 + $0x18] sm:$0xff] %vm877_vm0, %v4543_v27 }
  0x82   : > { %914 = vst.msk [vmem:[#allocation3 + $0x20] sm:$0xff] %vm877_vm0, %v4543_v27  ;;  %915 = vst.msk [vmem:[#allocation3 + $0x28] sm:$0xff] %vm877_vm0, %v4543_v27 }
  0x83   : > { %916 = vst.msk [vmem:[#allocation3 + $0x30] sm:$0xff] %vm877_vm0, %v4543_v27  ;;  %917 = vst.msk [vmem:[#allocation3 + $0x38] sm:$0xff] %vm877_vm0, %v4543_v27 }
  0x84   : > { %918 = vst.msk [vmem:[#allocation3 + $0x40] sm:$0xff] %vm877_vm0, %v4543_v27  ;;  %919 = vst.msk [vmem:[#allocation3 + $0x48] sm:$0xff] %vm877_vm0, %v4543_v27 }
  0x85   : > { %920 = vst.msk [vmem:[#allocation3 + $0x50] sm:$0xff] %vm877_vm0, %v4543_v27  ;;  %921 = vst.msk [vmem:[#allocation3 + $0x58] sm:$0xff] %vm877_vm0, %v4543_v27 }
  0x86   : > { %922 = vst.msk [vmem:[#allocation3 + $0x60] sm:$0xff] %vm877_vm0, %v4543_v27  ;;  %923 = vst.msk [vmem:[#allocation3 + $0x68] sm:$0xff] %vm877_vm0, %v4543_v27 }
  0x87   : > { %3847 = vmatpush3.bf16.xpose.msra.mxu0 %v4158_v40  ;;  %924 = vst.msk [vmem:[#allocation3 + $0x70] sm:$0xff] %vm877_vm0, %v4543_v27  ;;  %925 = vst.msk [vmem:[#allocation3 + $0x78] sm:$0xff] %vm877_vm0, %v4543_v27 }
  0x88   : > { %3848 = vmatprep.subr.bf16.mxu0 %v4159_v41  ;;  %926 = vst.msk [vmem:[#allocation3 + $0x80] sm:$0xff] %vm877_vm0, %v4543_v27  ;;  %927 = vst.msk [vmem:[#allocation3 + $0x88] sm:$0xff] %vm877_vm0, %v4543_v27 }
  0x89   : > { %928 = vst.msk [vmem:[#allocation3 + $0x90] sm:$0xff] %vm877_vm0, %v4543_v27  ;;  %929 = vst.msk [vmem:[#allocation3 + $0x98] sm:$0xff] %vm877_vm0, %v4543_v27 }
  0x8a   : > { %930 = vst.msk [vmem:[#allocation3 + $0xa0] sm:$0xff] %vm877_vm0, %v4543_v27  ;;  %931 = vst.msk [vmem:[#allocation3 + $0xa8] sm:$0xff] %vm877_vm0, %v4543_v27 }
  0x8b   : > { %932 = vst.msk [vmem:[#allocation3 + $0xb0] sm:$0xff] %vm877_vm0, %v4543_v27  ;;  %933 = vst.msk [vmem:[#allocation3 + $0xb8] sm:$0xff] %vm877_vm0, %v4543_v27 }
  0x8c   : > { %934 = vst.msk [vmem:[#allocation3 + $0xc0] sm:$0xff] %vm877_vm0, %v4543_v27  ;;  %935 = vst.msk [vmem:[#allocation3 + $0xc8] sm:$0xff] %vm877_vm0, %v4543_v27 }
  0x8d   : > { %936 = vst.msk [vmem:[#allocation3 + $0xd0] sm:$0xff] %vm877_vm0, %v4543_v27  ;;  %937 = vst.msk [vmem:[#allocation3 + $0xd8] sm:$0xff] %vm877_vm0, %v4543_v27 }
  0x8e   : > { %938 = vst.msk [vmem:[#allocation3 + $0xe0] sm:$0xff] %vm877_vm0, %v4543_v27  ;;  %939 = vst.msk [vmem:[#allocation3 + $0xe8] sm:$0xff] %vm877_vm0, %v4543_v27 }
  0x8f   : > { %3849 = vmatpush3.bf16.xpose.msra.mxu0 %v4160_v42  ;;  %940 = vst.msk [vmem:[#allocation3 + $0xf0] sm:$0xff] %vm877_vm0, %v4543_v27  ;;  %941 = vst.msk [vmem:[#allocation3 + $0xf8] sm:$0xff] %vm877_vm0, %v4543_v27 }
  0x90   : > { %3850 = vmatprep.subr.bf16.mxu0 %v4161_v43 }
  0x97   : > { %3851 = vmatpush3.bf16.xpose.msra.mxu0 %v4162_v44 }
  0x98   : > { %3852 = vmatprep.subr.bf16.mxu0 %v4163_v45 }
  0x9f   : > { %3853 = vmatpush3.bf16.xpose.msra.mxu0 %v4164_v46 }
  0xa0   : > { %3854 = vmatprep.subr.bf16.mxu0 %v4165_v47 }
  0xa7   : > { %3855 = vmatpush3.bf16.xpose.msra.mxu0 %v4166_v48 }
  0xae   : > { %3857 = vmatmul.mubr.bf16.vlgmr.msra.gmra.mxu0 %v4167_v39 }
  0xaf   : > { %3858 = vmatprep.mubr.bf16.mxu0 %v4168_v49 }
  0xb6   : > { %3859 = vmatmul.mubr.bf16.gmra.mxu0 %v4168_v49 }
  0xb7   : > { %3860 = vmatprep.mubr.bf16.mxu0 %v4169_v50 }
  0xbe   : > { %3861 = vmatmul.mubr.bf16.gmra.mxu0 %v4169_v50 }
  0xbf   : > { %3862 = vmatprep.mubr.bf16.mxu0 %v4170_v51 }
  0xc6   : > { %3863 = vmatmul.mubr.bf16.gmra.mxu0 %v4170_v51 }
  0xc7   : > { %3864 = vmatprep.mubr.bf16.mxu0 %v4171_v52 }
  0xce   : > { %3865 = vmatmul.mubr.bf16.gmra.mxu0 %v4171_v52 }
  0xcf   : > { %3866 = vmatprep.mubr.bf16.mxu0 %v4172_v53 }
  0xd6   : > { %3867 = vmatmul.mubr.bf16.gmra.mxu0 %v4172_v53 }
  0xd7   : > { %3868 = vmatprep.mubr.bf16.mxu0 %v4173_v54 }
  0xde   : > { %3869 = vmatmul.mubr.bf16.gmra.mxu0 %v4173_v54 }
  0xdf   : > { %3870 = vmatprep.mubr.bf16.mxu0 %v4174_v55 }
  0xe6   : > { %3871 = vmatmul.mubr.bf16.gmra.mxu0 %v4174_v55 }
  0xe7   : > { %3872 = vmatprep.mubr.bf16.mxu0 %v4175_v56 }
  0xee   : > { %3873 = vmatmul.mubr.bf16.gmra.mxu0 %v4175_v56 }
  0xef   : > { %3874 = vmatprep.mubr.bf16.mxu0 %v4176_v57 }
  0xf6   : > { %3875 = vmatmul.mubr.bf16.gmra.mxu0 %v4176_v57 }
  0xf7   : > { %3876 = vmatprep.mubr.bf16.mxu0 %v4177_v58 }
  0xfe   : > { %3877 = vmatmul.mubr.bf16.gmra.mxu0 %v4177_v58 }
  0xff   : > { %3878 = vmatprep.mubr.bf16.mxu0 %v4178_v59 }
 0x106   : > { %3879 = vmatmul.mubr.bf16.gmra.mxu0 %v4178_v59 }
 0x107   : > { %3880 = vmatprep.mubr.bf16.mxu0 %v4179_v60 }
 0x10e   : > { %3881 = vmatmul.mubr.bf16.gmra.mxu0 %v4179_v60 }
 0x10f   : > { %3882 = vmatprep.mubr.bf16.mxu0 %v4180_v61 }
 0x116   : > { %3883 = vmatmul.mubr.bf16.gmra.mxu0 %v4180_v61 }
 0x117   : > { %3884 = vmatprep.mubr.bf16.mxu0 %v4181_v62 }
 0x11e   : > { %3885 = vmatmul.mubr.bf16.gmra.mxu0 %v4181_v62 }
 0x11f   : > { %3886 = vmatprep.mubr.bf16.mxu0 %v4182_v63 }
 0x126   : > { %3887 = vmatmul.mubr.bf16.gmra.mxu0 %v4182_v63 }
 0x16e   : > { %v4946_v1 = vpop.f32.mrf.mxu0 }
 0x16f   : > { %6471 = vst [vmem:[#allocation11_spill] sm:$0xff] %v4946_v1 }
 0x170   : > { %v4948_v2 = vpop.f32.mrf.mxu0 }
 0x171   : > { %6472 = vst [vmem:[#allocation12_spill] sm:$0xff] %v4948_v2  ;;  %v1455_v3 = vmax.f32 %v4946_v1, %v4948_v2  ;;  %v5385_v2 = vld [vmem:[#allocation2 + $0xb0] sm:$0xff] }
 0x172   : > { %v4952_v4 = vpop.f32.mrf.mxu0  ;;  %6526 = vst [vmem:[#allocation66_spill] sm:$0xff] %v5385_v2 }
 0x173   : > { %6473 = vst [vmem:[#allocation13_spill] sm:$0xff] %v4952_v4  ;;  %1456 = vmax.xlane.f32.xlu0 %v1455_v3 }
 0x174   : > { %v4954_v5 = vpop.f32.mrf.mxu0 }
 0x175   : > { %6474 = vst [vmem:[#allocation14_spill] sm:$0xff] %v4954_v5  ;;  %v1458_v6 = vmax.f32 %v4952_v4, %v4954_v5  ;;  %v5375_v4 = vld [vmem:[#allocation2 + $0xa8] sm:$0xff] }
 0x176   : > { %v4958_v7 = vpop.f32.mrf.mxu0  ;;  %6525 = vst [vmem:[#allocation65_spill] sm:$0xff] %v5375_v4 }
 0x177   : > { %6475 = vst [vmem:[#allocation15_spill] sm:$0xff] %v4958_v7  ;;  %1459 = vmax.xlane.f32.xlu1 %v1458_v6 }
 0x178   : > { %v4960_v8 = vpop.f32.mrf.mxu0 }
 0x179   : > { %6476 = vst [vmem:[#allocation16_spill] sm:$0xff] %v4960_v8  ;;  %v1461_v9 = vmax.f32 %v4958_v7, %v4960_v8  ;;  %v5343_v8 = vld [vmem:[#allocation2 + $0x90] sm:$0xff] }
 0x17a   : > { %v4964_v10 = vpop.f32.mrf.mxu0  ;;  %6523 = vst [vmem:[#allocation63_spill] sm:$0xff] %v5343_v8 }
 0x17b   : > { %6477 = vst [vmem:[#allocation17_spill] sm:$0xff] %v4964_v10  ;;  %1462 = vmax.xlane.f32.xlu0 %v1461_v9 }
 0x17c   : > { %v4966_v11 = vpop.f32.mrf.mxu0 }
 0x17d   : > { %6478 = vst [vmem:[#allocation18_spill] sm:$0xff] %v4966_v11  ;;  %v1464_v12 = vmax.f32 %v4964_v10, %v4966_v11 }
 0x17e   : > { %v4970_v13 = vpop.f32.mrf.mxu0 }
 0x17f   : > { %1465 = vmax.xlane.f32.xlu1 %v1464_v12 }
 0x180   : > { %v4972_v14 = vpop.f32.mrf.mxu0 }
 0x181   : > { %v1467_v15 = vmax.f32 %v4970_v13, %v4972_v14 }
 0x182   : > { %v4976_v16 = vpop.f32.mrf.mxu0 }
 0x183   : > { %1468 = vmax.xlane.f32.xlu0 %v1467_v15 }
 0x184   : > { %v4978_v17 = vpop.f32.mrf.mxu0 }
 0x185   : > { %v1470_v18 = vmax.f32 %v4976_v16, %v4978_v17 }
 0x186   : > { %v4982_v19 = vpop.f32.mrf.mxu0 }
 0x187   : > { %1471 = vmax.xlane.f32.xlu0 %v1470_v18 }
 0x188   : > { %v4984_v20 = vpop.f32.mrf.mxu0 }
 0x189   : > { %v1473_v21 = vmax.f32 %v4982_v19, %v4984_v20 }
 0x18a   : > { %v4988_v22 = vpop.f32.mrf.mxu0 }
 0x18b   : > { %1474 = vmax.xlane.f32.xlu1 %v1473_v21 }
 0x18c   : > { %v4990_v23 = vpop.f32.mrf.mxu0 }
 0x18d   : > { %v1476_v24 = vmax.f32 %v4988_v22, %v4990_v23 }
 0x18e   : > { %v4994_v25 = vpop.f32.mrf.mxu0 }
 0x18f   : > { %1477 = vmax.xlane.f32.xlu1 %v1476_v24 }
 0x190   : > { %v5028_v28 = vpop.f32.mrf.mxu0 }
 0x191   : > { %v1479_v29 = vmax.f32 %v4994_v25, %v5028_v28 }
 0x192   : > { %v5032_v30 = vpop.f32.mrf.mxu0 }
 0x193   : > { %1480 = vmax.xlane.f32.xlu0 %v1479_v29 }
 0x194   : > { %v5034_v31 = vpop.f32.mrf.mxu0 }
 0x195   : > { %v1482_v32 = vmax.f32 %v5032_v30, %v5034_v31 }
 0x196   : > { %v5038_v33 = vpop.f32.mrf.mxu0 }
 0x197   : > { %1483 = vmax.xlane.f32.xlu1 %v1482_v32 }
 0x198   : > { %v5040_v34 = vpop.f32.mrf.mxu0 }
 0x199   : > { %v1485_v35 = vmax.f32 %v5038_v33, %v5040_v34 }
 0x19a   : > { %v5044_v36 = vpop.f32.mrf.mxu0 }
 0x19b   : > { %1486 = vmax.xlane.f32.xlu0 %v1485_v35 }
 0x19c   : > { %v5046_v37 = vpop.f32.mrf.mxu0 }
 0x19d   : > { %v1488_v38 = vmax.f32 %v5044_v36, %v5046_v37 }
 0x19e   : > { %v5050_v39 = vpop.f32.mrf.mxu0 }
 0x19f   : > { %6479 = vst [vmem:[#allocation19_spill] sm:$0xff] %v5050_v39  ;;  %1489 = vmax.xlane.f32.xlu1 %v1488_v38 }
 0x1a0   : > { %v5052_v40 = vpop.f32.mrf.mxu0 }
 0x1a1   : > { %6480 = vst [vmem:[#allocation20_spill] sm:$0xff] %v5052_v40  ;;  %v1491_v41 = vmax.f32 %v5050_v39, %v5052_v40 }
 0x1a2   : > { %v5056_v42 = vpop.f32.mrf.mxu0 }
 0x1a3   : > { %6481 = vst [vmem:[#allocation21_spill] sm:$0xff] %v5056_v42  ;;  %1492 = vmax.xlane.f32.xlu0 %v1491_v41 }
 0x1a4   : > { %v5058_v43 = vpop.f32.mrf.mxu0 }
 0x1a5   : > { %6482 = vst [vmem:[#allocation22_spill] sm:$0xff] %v5058_v43  ;;  %v1494_v44 = vmax.f32 %v5056_v42, %v5058_v43 }
 0x1a6   : > { %v5062_v45 = vpop.f32.mrf.mxu0 }
 0x1a7   : > { %6483 = vst [vmem:[#allocation23_spill] sm:$0xff] %v5062_v45  ;;  %1495 = vmax.xlane.f32.xlu1 %v1494_v44 }
 0x1a8   : > { %v5064_v46 = vpop.f32.mrf.mxu0 }
 0x1a9   : > { %6484 = vst [vmem:[#allocation24_spill] sm:$0xff] %v5064_v46  ;;  %v1497_v47 = vmax.f32 %v5062_v45, %v5064_v46  ;;  %v5307_v46 = vld [vmem:[#allocation2 + $0x70] sm:$0xff]  ;;  %v5325_v45 = vld [vmem:[#allocation2 + $0x80] sm:$0xff] }
 0x1aa   : > { %v5068_v48 = vpop.f32.mrf.mxu0  ;;  %6521 = vst [vmem:[#allocation61_spill] sm:$0xff] %v5307_v46  ;;  %6522 = vst [vmem:[#allocation62_spill] sm:$0xff] %v5325_v45 }
 0x1ab   : > { %6485 = vst [vmem:[#allocation25_spill] sm:$0xff] %v5068_v48  ;;  %1498 = vmax.xlane.f32.xlu0 %v1497_v47 }
 0x1ac   : > { %v5070_v49 = vpop.f32.mrf.mxu0 }
 0x1ad   : > { %6486 = vst [vmem:[#allocation26_spill] sm:$0xff] %v5070_v49  ;;  %v1500_v50 = vmax.f32 %v5068_v48, %v5070_v49  ;;  %v5334_v49 = vld [vmem:[#allocation2 + $0x88] sm:$0xff] }
 0x1ae   : > { %v5074_v51 = vpop.f32.mrf.mxu0 }
 0x1af   : > { %6487 = vst [vmem:[#allocation27_spill] sm:$0xff] %v5074_v51  ;;  %1501 = vmax.xlane.f32.xlu1 %v1500_v50 }
 0x1b0   : > { %v5076_v52 = vpop.f32.mrf.mxu0 }
 0x1b1   : > { %6488 = vst [vmem:[#allocation28_spill] sm:$0xff] %v5076_v52  ;;  %v1503_v53 = vmax.f32 %v5074_v51, %v5076_v52 }
 0x1b2   : > { %v5080_v54 = vpop.f32.mrf.mxu0 }
 0x1b3   : > { %6489 = vst [vmem:[#allocation29_spill] sm:$0xff] %v5080_v54  ;;  %1504 = vmax.xlane.f32.xlu0 %v1503_v53 }
 0x1b4   : > { %v5082_v55 = vpop.f32.mrf.mxu0 }
 0x1b5   : > { %6490 = vst [vmem:[#allocation30_spill] sm:$0xff] %v5082_v55  ;;  %v1506_v56 = vmax.f32 %v5080_v54, %v5082_v55  ;;  %v5288_v54 = vld [vmem:[#allocation2 + $0x60] sm:$0xff] }
 0x1b6   : > { %v5086_v57 = vpop.f32.mrf.mxu0  ;;  %6519 = vst [vmem:[#allocation59_spill] sm:$0xff] %v5288_v54 }
 0x1b7   : > { %6491 = vst [vmem:[#allocation31_spill] sm:$0xff] %v5086_v57  ;;  %1507 = vmax.xlane.f32.xlu1 %v1506_v56 }
 0x1b8   : > { %v5088_v58 = vpop.f32.mrf.mxu0 }
 0x1b9   : > { %6492 = vst [vmem:[#allocation32_spill] sm:$0xff] %v5088_v58  ;;  %v1509_v59 = vmax.f32 %v5086_v57, %v5088_v58  ;;  %v4197_v58 = vld [vmem:[%s5173_s30 + $0x40] sm:$0xff]  }
 0x1ba   : > { %v5092_v60 = vpop.f32.mrf.mxu0 }
 0x1bb   : > { %6493 = vst [vmem:[#allocation33_spill] sm:$0xff] %v5092_v60  ;;  %1510 = vmax.xlane.f32.xlu0 %v1509_v59 }
 0x1bc   : > { %v5094_v61 = vpop.f32.mrf.mxu0 }
 0x1bd   : > { %6494 = vst [vmem:[#allocation34_spill] sm:$0xff] %v5094_v61  ;;  %v1512_v62 = vmax.f32 %v5092_v60, %v5094_v61 }
 0x1be   : > { %v5098_v63 = vpop.f32.mrf.mxu0 }
 0x1bf   : > { %6495 = vst [vmem:[#allocation35_spill] sm:$0xff] %v5098_v63  ;;  %1513 = vmax.xlane.f32.xlu1 %v1512_v62 }
 0x1c0   : > { %v5100_v0 = vpop.f32.mrf.mxu0 }
 0x1c1   : > { %6496 = vst [vmem:[#allocation36_spill] sm:$0xff] %v5100_v0  ;;  %v1515_v3 = vmax.f32 %v5098_v63, %v5100_v0 }
 0x1c2   : > { %v5104_v6 = vpop.f32.mrf.mxu0 }
 0x1c3   : > { %6497 = vst [vmem:[#allocation37_spill] sm:$0xff] %v5104_v6  ;;  %1516 = vmax.xlane.f32.xlu0 %v1515_v3 }
 0x1c4   : > { %v5106_v9 = vpop.f32.mrf.mxu0 }
 0x1c5   : > { %6498 = vst [vmem:[#allocation38_spill] sm:$0xff] %v5106_v9  ;;  %v1518_v12 = vmax.f32 %v5104_v6, %v5106_v9  ;;  %v4195_v9 = vld [vmem:[%s5173_s30 + $0x48] sm:$0xff]  }
 0x1c6   : > { %v5110_v15 = vpop.f32.mrf.mxu0  ;;  %v4196_v6 = vld [vmem:[%s5173_s30 + $0x8] sm:$0xff]  }
 0x1c7   : > { %6499 = vst [vmem:[#allocation39_spill] sm:$0xff] %v5110_v15  ;;  %1519 = vmax.xlane.f32.xlu1 %v1518_v12 }
 0x1c8   : > { %v5112_v18 = vpop.f32.mrf.mxu0 }
 0x1c9   : > { %6500 = vst [vmem:[#allocation40_spill] sm:$0xff] %v5112_v18  ;;  %v1521_v21 = vmax.f32 %v5110_v15, %v5112_v18  ;;  %v5191_v15 = vld [vmem:[#allocation2 + $0x20] sm:$0xff]  ;;  %v5200_v18 = vld [vmem:[#allocation2 + $0x28] sm:$0xff] }
 0x1ca   : > { %v5116_v24 = vpop.f32.mrf.mxu0 }
 0x1cb   : > { %6501 = vst [vmem:[#allocation41_spill] sm:$0xff] %v5116_v24  ;;  %1522 = vmax.xlane.f32.xlu0 %v1521_v21 }
 0x1cc   : > { %v5118_v26 = vpop.f32.mrf.mxu0 }
 0x1cd   : > { %6502 = vst [vmem:[#allocation42_spill] sm:$0xff] %v5118_v26  ;;  %v1524_v27 = vmax.f32 %v5116_v24, %v5118_v26  ;;  %v4194_v24 = vld [vmem:[%s5173_s30 + $0x10] sm:$0xff]  }
 0x1ce   : > { %v5122_v29 = vpop.f32.mrf.mxu0 }
 0x1cf   : > { %6503 = vst [vmem:[#allocation43_spill] sm:$0xff] %v5122_v29  ;;  %1525 = vmax.xlane.f32.xlu1 %v1524_v27 }
 0x1d0   : > { %v5124_v32 = vpop.f32.mrf.mxu0 }
 0x1d1   : > { %6504 = vst [vmem:[#allocation44_spill] sm:$0xff] %v5124_v32  ;;  %v1527_v35 = vmax.f32 %v5122_v29, %v5124_v32  ;;  %v4186_v32 = vld [vmem:[%s5173_s30 + $0x30] sm:$0xff]  }
 0x1d2   : > { %v5128_v38 = vpop.f32.mrf.mxu0 }
 0x1d3   : > { %6505 = vst [vmem:[#allocation45_spill] sm:$0xff] %v5128_v38  ;;  %1528 = vmax.xlane.f32.xlu1 %v1527_v35 }
 0x1d4   : > { %v5130_v41 = vpop.f32.mrf.mxu0 }
 0x1d5   : > { %6506 = vst [vmem:[#allocation46_spill] sm:$0xff] %v5130_v41  ;;  %v1530_v44 = vmax.f32 %v5128_v38, %v5130_v41 }
 0x1d6   : > { %v5134_v47 = vpop.f32.mrf.mxu0 }
 0x1d7   : > { %6507 = vst [vmem:[#allocation47_spill] sm:$0xff] %v5134_v47  ;;  %1531 = vmax.xlane.f32.xlu0 %v1530_v44 }
 0x1d8   : > { %v5136_v50 = vpop.f32.mrf.mxu0 }
 0x1d9   : > { %6508 = vst [vmem:[#allocation48_spill] sm:$0xff] %v5136_v50  ;;  %v1533_v53 = vmax.f32 %v5134_v47, %v5136_v50  ;;  %v5163_v50 = vld [vmem:[#allocation2 + $0x8] sm:$0xff] }
 0x1da   : > { %v5140_v56 = vpop.f32.mrf.mxu0 }
 0x1db   : > { %6509 = vst [vmem:[#allocation49_spill] sm:$0xff] %v5140_v56  ;;  %1534 = vmax.xlane.f32.xlu1 %v1533_v53  ;;  %v5158_v53 = vld [vmem:[#allocation2] sm:$0xff] }
 0x1dc   : > { %v5142_v59 = vpop.f32.mrf.mxu0 }
 0x1dd   : > { %6510 = vst [vmem:[#allocation50_spill] sm:$0xff] %v5142_v59  ;;  %v1536_v62 = vmax.f32 %v5140_v56, %v5142_v59 }
 0x1de   : > { %v5146_v3 = vpop.f32.mrf.mxu0 }
 0x1df   : > { %6511 = vst [vmem:[#allocation51_spill] sm:$0xff] %v5146_v3  ;;  %1537 = vmax.xlane.f32.xlu0 %v1536_v62 }
 0x1e0   : > { %v5148_v12 = vpop.f32.mrf.mxu0 }
 0x1e1   : > { %6512 = vst [vmem:[#allocation52_spill] sm:$0xff] %v5148_v12  ;;  %v1539_v21 = vmax.f32 %v5146_v3, %v5148_v12  ;;  %v5170_v12 = vld [vmem:[#allocation2 + $0x10] sm:$0xff] }
 0x1e2   : > { %v5152_v27 = vpop.f32.mrf.mxu0 }
 0x1e3   : > { %6513 = vst [vmem:[#allocation53_spill] sm:$0xff] %v5152_v27  ;;  %1540 = vmax.xlane.f32.xlu0 %v1539_v21 }
 0x1e4   : > { %v5154_v35 = vpop.f32.mrf.mxu0 }
 0x1e5   : > { %6514 = vst [vmem:[#allocation54_spill] sm:$0xff] %v5154_v35  ;;  %v1542_v44 = vmax.f32 %v5152_v27, %v5154_v35  ;;  %v4185_v35 = vld [vmem:[%s5173_s30 + $0x70] sm:$0xff]   ;;  %v5183_v27 = vld [vmem:[#allocation2 + $0x18] sm:$0xff] }
 0x1e6   : > { %v5243_v0 = vpop.f32.mrf.mxu0 }
 0x1e7   : > { %1543 = vmax.xlane.f32.xlu1 %v1542_v44  ;;  %v4183_v44 = vld [vmem:[%s5173_s30 + $0x78] sm:$0xff]   ;;  %6515 = vst [vmem:[#allocation55_spill] sm:$0xff] %v5243_v0 }
 0x1e8   : > { %4072 = vmatprep.subr.bf16.mxu1 %v4183_v44  ;;  %3888 = vmatprep.subr.bf16.mxu0 %v4183_v44  ;;  %v5258_v61 = vpop.f32.mrf.mxu0 }
 0x1e9   : > { %6516 = vst [vmem:[#allocation56_spill] sm:$0xff] %v5258_v61 }
 0x1ea   : > { %v5269_v57 = vpop.f32.mrf.mxu0 }
 0x1eb   : > { %6517 = vst [vmem:[#allocation57_spill] sm:$0xff] %v5269_v57 }
 0x1fc   : > { %v1457_v47 = vpop.xlane.xlu0 %1456 }
 0x1fd   : > { %v5161_v62 = vmax.f32 %v5158_v53, %v1457_v47  ;;  %v4184_v47 = vld [vmem:[%s5173_s30 + $0x38] sm:$0xff]  }
 0x1fe   : > { %4080 = vmatpush3.bf16.msra.mxu1 %v4184_v47  ;;  %3889 = vmatpush3.bf16.msra.mxu0 %v4184_v47 }
 0x1ff   : > { %2865 = vst.msk [vmem:[#allocation2] sm:$0xff] %vm877_vm0, %v5161_v62  ;;  %4073 = vmatprep.subr.bf16.mxu1 %v4185_v35  ;;  %3890 = vmatprep.subr.bf16.mxu0 %v4185_v35  ;;  %v4188_v35 = vld [vmem:[%s5173_s30 + $0x28] sm:$0xff]  }
 0x200   : > { %v1460_v3 = vpop.xlane.xlu1 %1459 }
 0x201   : > { %v5168_v21 = vmax.f32 %v5163_v50, %v1460_v3 }
 0x202   : > { %4081 = vmatpush3.bf16.msra.mxu1 %v4186_v32  ;;  %3891 = vmatpush3.bf16.msra.mxu0 %v4186_v32  ;;  %v4191_v32 = vld [vmem:[%s5173_s30 + $0x58] sm:$0xff]  }
 0x203   : > { %2866 = vst.msk [vmem:[#allocation2 + $0x8] sm:$0xff] %vm877_vm0, %v5168_v21 }
 0x204   : > { %v1463_v29 = vpop.xlane.xlu0 %1462 }
 0x205   : > { %v5181_v3 = vmax.f32 %v5170_v12, %v1463_v29  ;;  %v4187_v29 = vld [vmem:[%s5173_s30 + $0x68] sm:$0xff]  }
 0x206   : > { %4074 = vmatprep.subr.bf16.mxu1 %v4187_v29  ;;  %3892 = vmatprep.subr.bf16.mxu0 %v4187_v29  ;;  %v5212_v29 = vld [vmem:[#allocation2 + $0x30] sm:$0xff] }
 0x207   : > { %2867 = vst.msk [vmem:[#allocation2 + $0x10] sm:$0xff] %vm877_vm0, %v5181_v3  ;;  %4082 = vmatpush3.bf16.msra.mxu1 %v4188_v35  ;;  %3893 = vmatpush3.bf16.msra.mxu0 %v4188_v35  ;;  %v4193_v35 = vld [vmem:[%s5173_s30 + $0x50] sm:$0xff]  }
 0x208   : > { %v1466_v59 = vpop.xlane.xlu1 %1465 }
 0x209   : > { %v5189_v56 = vmax.f32 %v5183_v27, %v1466_v59  ;;  %v4189_v59 = vld [vmem:[%s5173_s30 + $0x60] sm:$0xff]  }
 0x20a   : > { %4075 = vmatprep.subr.bf16.mxu1 %v4189_v59  ;;  %3894 = vmatprep.subr.bf16.mxu0 %v4189_v59  ;;  %v5224_v59 = vld [vmem:[#allocation2 + $0x38] sm:$0xff] }
 0x20b   : > { %2868 = vst.msk [vmem:[#allocation2 + $0x18] sm:$0xff] %vm877_vm0, %v5189_v56  ;;  %v1586_v1 = vsub.f32 %v5183_v27, %v5189_v56 }
 0x20c   : > { %v1469_v44 = vpop.xlane.xlu0 %1468 }
 0x20d   : > { %v5198_v47 = vmax.f32 %v5191_v15, %v1469_v44  ;;  %v4190_v44 = vld [vmem:[%s5173_s30 + $0x20] sm:$0xff]  }
 0x20e   : > { %4083 = vmatpush3.bf16.msra.mxu1 %v4190_v44  ;;  %3895 = vmatpush3.bf16.msra.mxu0 %v4190_v44  ;;  %v4198_v44 = vld [vmem:[%s5173_s30] sm:$0xff]  }
 0x20f   : > { %2869 = vst.msk [vmem:[#allocation2 + $0x20] sm:$0xff] %vm877_vm0, %v5198_v47  ;;  %1701 = vperm.xlu0 %4149, %v5198_v47   ;;  %4076 = vmatprep.subr.bf16.mxu1 %v4191_v32 }
 0x210   : > { %v1472_v63 = vpop.xlane.xlu0 %1471  ;;  %3896 = vmatprep.subr.bf16.mxu0 %v4191_v32 }
 0x211   : > { %v5210_v41 = vmax.f32 %v5200_v18, %v1472_v63  ;;  %v4192_v63 = vld [vmem:[%s5173_s30 + $0x18] sm:$0xff]   ;;  %s3839_s30 = sshll.u32 %s4531_s24, 12  ;;  %s3533_s24 = scalar_lea.sflag [#allocation9], %s4871_s19 }
 0x212   : > { %4084 = vmatpush3.bf16.msra.mxu1 %v4192_v63  ;;  %3897 = vmatpush3.bf16.msra.mxu0 %v4192_v63  ;;  %v5236_v63 = vld [vmem:[#allocation2 + $0x40] sm:$0xff]  ;;  %s6326_s14 = scalar_lea.hbm %s6384_s6, %s3839_s30 }
 0x213   : > { %2870 = vst.msk [vmem:[#allocation2 + $0x28] sm:$0xff] %vm877_vm0, %v5210_v41  ;;  %1706 = vperm.xlu1 %4150, %v5210_v41   ;;  %4077 = vmatprep.subr.bf16.mxu1 %v4193_v35 }
 0x214   : > { %v1475_v38 = vpop.xlane.xlu1 %1474  ;;  %3898 = vmatprep.subr.bf16.mxu0 %v4193_v35 }
 0x215   : > { %v5222_v26 = vmax.f32 %v5212_v29, %v1475_v38 }
 0x216   : > { %4085 = vmatpush3.bf16.msra.mxu1 %v4194_v24  ;;  %3899 = vmatpush3.bf16.msra.mxu0 %v4194_v24  ;;  %v5251_v24 = vld [vmem:[#allocation2 + $0x48] sm:$0xff] }
 0x217   : > { %2871 = vst.msk [vmem:[#allocation2 + $0x30] sm:$0xff] %vm877_vm0, %v5222_v26  ;;  %1711 = vperm.xlu1 %4150, %v5222_v26   ;;  %4078 = vmatprep.subr.bf16.mxu1 %v4195_v9 }
 0x218   : > { %v1478_v38 = vpop.xlane.xlu1 %1477  ;;  %3900 = vmatprep.subr.bf16.mxu0 %v4195_v9  ;;  %v5263_v9 = vld [vmem:[#allocation2 + $0x50] sm:$0xff] }
 0x219   : > { %v5234_v32 = vmax.f32 %v5224_v59, %v1478_v38 }
 0x21a   : > { %4086 = vmatpush3.bf16.msra.mxu1 %v4196_v6  ;;  %3901 = vmatpush3.bf16.msra.mxu0 %v4196_v6 }
 0x21b   : > { %2872 = vst.msk [vmem:[#allocation2 + $0x38] sm:$0xff] %vm877_vm0, %v5234_v32  ;;  %1716 = vperm.xlu1 %4150, %v5234_v32   ;;  %4079 = vmatprep.subr.bf16.mxu1 %v4197_v58 }
 0x21c   : > { %v1481_v38 = vpop.xlane.xlu0 %1480  ;;  %3902 = vmatprep.subr.bf16.mxu0 %v4197_v58  ;;  %v5274_v58 = vld [vmem:[#allocation2 + $0x58] sm:$0xff] }
 0x21d   : > { %v5249_v35 = vmax.f32 %v5236_v63, %v1481_v38 }
 0x21e   : > { %4087 = vmatpush3.bf16.msra.mxu1 %v4198_v44  ;;  %3903 = vmatpush3.bf16.msra.mxu0 %v4198_v44  ;;  %v5281_v44 = vpop.f32.mrf.mxu0 }
 0x21f   : > { %2873 = vst.msk [vmem:[#allocation2 + $0x40] sm:$0xff] %vm877_vm0, %v5249_v35  ;;  %6518 = vst [vmem:[#allocation58_spill] sm:$0xff] %v5281_v44 }
 0x220   : > { %v1484_v60 = vpop.xlane.xlu1 %1483 }
 0x221   : > { %v5261_v38 = vmax.f32 %v5251_v24, %v1484_v60 }
 0x223   : > { %2874 = vst.msk [vmem:[#allocation2 + $0x48] sm:$0xff] %vm877_vm0, %v5261_v38 }
 0x224   : > { %v1487_v52 = vpop.xlane.xlu0 %1486 }
 0x225   : > { %v5272_v51 = vmax.f32 %v5263_v9, %v1487_v52  ;;  %v1548_v52 = vmax.f32 %v5269_v57, %v5281_v44  ;;  %v5316_v44 = vld [vmem:[#allocation2 + $0x78] sm:$0xff] }
 0x227   : > { %2875 = vst.msk [vmem:[#allocation2 + $0x50] sm:$0xff] %vm877_vm0, %v5272_v51  ;;  %1731 = vperm.xlu1 %4150, %v5272_v51  }
 0x228   : > { %v1490_v6 = vpop.xlane.xlu1 %1489 }
 0x229   : > { %v5284_v55 = vmax.f32 %v5274_v58, %v1490_v6  ;;  %v5298_v6 = vld [vmem:[#allocation2 + $0x68] sm:$0xff] }
 0x22b   : > { %2876 = vst.msk [vmem:[#allocation2 + $0x58] sm:$0xff] %vm877_vm0, %v5284_v55  ;;  %1736 = vperm.xlu1 %4150, %v5284_v55  }
 0x22c   : > { %v1493_v60 = vpop.xlane.xlu0 %1492 }
 0x22d   : > { %v5296_v10 = vmax.f32 %v5288_v54, %v1493_v60 }
 0x22e   : > { %1549 = vmax.xlane.f32.xlu0 %v1548_v52 }
 0x22f   : > { %6520 = vst [vmem:[#allocation60_spill] sm:$0xff] %v5296_v10  ;;  %2877 = vst.msk [vmem:[#allocation2 + $0x60] sm:$0xff] %vm877_vm0, %v5296_v10 }
 0x230   : > { %v1496_v57 = vpop.xlane.xlu1 %1495 }
 0x231   : > { %v5305_v11 = vmax.f32 %v5298_v6, %v1496_v57 }
 0x233   : > { %2878 = vst.msk [vmem:[#allocation2 + $0x68] sm:$0xff] %vm877_vm0, %v5305_v11 }
 0x234   : > { %v1499_v60 = vpop.xlane.xlu0 %1498 }
 0x235   : > { %v5314_v52 = vmax.f32 %v5307_v46, %v1499_v60  ;;  %v5363_v46 = vld [vmem:[#allocation2 + $0xa0] sm:$0xff] }
 0x236   : > { %6524 = vst [vmem:[#allocation64_spill] sm:$0xff] %v5363_v46 }
 0x237   : > { %2879 = vst.msk [vmem:[#allocation2 + $0x70] sm:$0xff] %vm877_vm0, %v5314_v52 }
 0x238   : > { %v1502_v57 = vpop.xlane.xlu1 %1501 }
 0x239   : > { %v5323_v48 = vmax.f32 %v5316_v44, %v1502_v57 }
 0x23b   : > { %2880 = vst.msk [vmem:[#allocation2 + $0x78] sm:$0xff] %vm877_vm0, %v5323_v48 }
 0x23c   : > { %v1505_v60 = vpop.xlane.xlu0 %1504 }
 0x23d   : > { %v5332_v7 = vmax.f32 %v5325_v45, %v1505_v60  ;;  %v5353_v45 = vld [vmem:[#allocation2 + $0x98] sm:$0xff] }
 0x23f   : > { %2881 = vst.msk [vmem:[#allocation2 + $0x80] sm:$0xff] %vm877_vm0, %v5332_v7 }
 0x240   : > { %v1508_v57 = vpop.xlane.xlu1 %1507 }
 0x241   : > { %v5341_v42 = vmax.f32 %v5334_v49, %v1508_v57 }
 0x243   : > { %2882 = vst.msk [vmem:[#allocation2 + $0x88] sm:$0xff] %vm877_vm0, %v5341_v42 }
 0x244   : > { %1721 = vperm.xlu0 %4149, %v5249_v35   ;;  %v1511_v60 = vpop.xlane.xlu0 %1510 }
 0x245   : > { %v5351_v43 = vmax.f32 %v5343_v8, %v1511_v60  ;;  %v1545_v8 = vmax.f32 %v5243_v0, %v5258_v61  ;;  %v5395_v61 = vld [vmem:[#allocation2 + $0xb8] sm:$0xff] }
 0x246   : > { %6527 = vst [vmem:[#allocation67_spill] sm:$0xff] %v5395_v61 }
 0x247   : > { %2883 = vst.msk [vmem:[#allocation2 + $0x90] sm:$0xff] %vm877_vm0, %v5351_v43 }
 0x248   : > { %1726 = vperm.xlu0 %4149, %v5261_v38   ;;  %v1514_v40 = vpop.xlane.xlu1 %1513 }
 0x249   : > { %v5361_v39 = vmax.f32 %v5353_v45, %v1514_v40 }
 0x24b   : > { %2884 = vst.msk [vmem:[#allocation2 + $0x98] sm:$0xff] %vm877_vm0, %v5361_v39 }
 0x24c   : > { %1681 = vperm.xlu0 %4149, %v5161_v62   ;;  %v1517_v57 = vpop.xlane.xlu0 %1516 }
 0x24d   : > { %v5373_v5 = vmax.f32 %v5363_v46, %v1517_v57  ;;  %v5405_v46 = vld [vmem:[#allocation2 + $0xc0] sm:$0xff] }
 0x24e   : > { %6528 = vst [vmem:[#allocation68_spill] sm:$0xff] %v5405_v46 }
 0x24f   : > { %1546 = vmax.xlane.f32.xlu1 %v1545_v8  ;;  %2885 = vst.msk [vmem:[#allocation2 + $0xa0] sm:$0xff] %vm877_vm0, %v5373_v5 }
 0x250   : > { %1686 = vperm.xlu0 %4149, %v5168_v21   ;;  %v1520_v60 = vpop.xlane.xlu1 %1519 }
 0x251   : > { %v5383_v54 = vmax.f32 %v5375_v4, %v1520_v60  ;;  %v5415_v4 = vld [vmem:[#allocation2 + $0xc8] sm:$0xff] }
 0x252   : > { %6529 = vst [vmem:[#allocation69_spill] sm:$0xff] %v5415_v4 }
 0x253   : > { %2886 = vst.msk [vmem:[#allocation2 + $0xa8] sm:$0xff] %vm877_vm0, %v5383_v54 }
 0x254   : > { %1741 = vperm.xlu0 %4149, %v5296_v10   ;;  %v1523_v8 = vpop.xlane.xlu0 %1522  ;;  %v5428_v10 = vld [vmem:[#allocation2 + $0xd0] sm:$0xff] }
 0x255   : > { %v5393_v40 = vmax.f32 %v5385_v2, %v1523_v8  ;;  %6530 = vst [vmem:[#allocation70_spill] sm:$0xff] %v5428_v10 }
 0x257   : > { %2887 = vst.msk [vmem:[#allocation2 + $0xb0] sm:$0xff] %vm877_vm0, %v5393_v40 }
 0x258   : > { %1746 = vperm.xlu0 %4149, %v5305_v11   ;;  %v1526_v57 = vpop.xlane.xlu1 %1525 }
 0x259   : > { %v5403_v0 = vmax.f32 %v5395_v61, %v1526_v57 }
 0x25b   : > { %2888 = vst.msk [vmem:[#allocation2 + $0xb8] sm:$0xff] %vm877_vm0, %v5403_v0 }
 0x25c   : > { %1691 = vperm.xlu0 %4149, %v5181_v3   ;;  %v1529_v60 = vpop.xlane.xlu1 %1528 }
 0x25d   : > { %v5413_v2 = vmax.f32 %v5405_v46, %v1529_v60  ;;  %v1583_v60 = vsub.f32 %v5158_v53, %v5161_v62  ;;  %v1584_v53 = vsub.f32 %v5163_v50, %v5168_v21  ;;  %v5441_v62 = vld [vmem:[#allocation2 + $0xd8] sm:$0xff]  ;;  %v1585_v50 = vsub.f32 %v5170_v12, %v5181_v3  ;;  %v5454_v21 = vld [vmem:[#allocation2 + $0xe0] sm:$0xff] }
 0x25e   : > { %6532 = vst [vmem:[#allocation72_spill] sm:$0xff] %v5454_v21  ;;  %v6534_v12 = vsub.f32 %v5191_v15, %v5198_v47 }
 0x25f   : > { %2889 = vst.msk [vmem:[#allocation2 + $0xc0] sm:$0xff] %vm877_vm0, %v5413_v2 }
 0x260   : > { %1751 = vperm.xlu1 %4150, %v5314_v52   ;;  %1756 = vperm.xlu0 %4149, %v5323_v48   ;;  %v1532_v8 = vpop.xlane.xlu0 %1531 }
 0x261   : > { %v5424_v61 = vmax.f32 %v5415_v4, %v1532_v8  ;;  %v1615_v8 = vmul.f32 1.442695, %v1583_v60  ;;  %v1617_v60 = vmul.f32 1.442695, %v1584_v53  ;;  %v5465_v53 = vld [vmem:[#allocation2 + $0xe8] sm:$0xff] }
 0x263   : > { %2890 = vst.msk [vmem:[#allocation2 + $0xc8] sm:$0xff] %vm877_vm0, %v5424_v61  ;;  %4207 = vpow2.f32 %v1615_v8  ;;  %v1619_v8 = vmul.f32 1.442695, %v1585_v50  ;;  %v1621_v50 = vmul.f32 1.442695, %v1586_v1 }
 0x264   : > { %1766 = vperm.xlu1 %4150, %v5341_v42   ;;  %1696 = vperm.xlu0 %4149, %v5189_v56   ;;  %v1535_v57 = vpop.xlane.xlu1 %1534  ;;  %4209 = vpow2.f32 %v1617_v60 }
 0x265   : > { %v5437_v46 = vmax.f32 %v5428_v10, %v1535_v57  ;;  %4211 = vpow2.f32 %v1619_v8 }
 0x266   : > { %4213 = vpow2.f32 %v1621_v50 }
 0x267   : > { %6531 = vst [vmem:[#allocation71_spill] sm:$0xff] %v5437_v46  ;;  %2891 = vst.msk [vmem:[#allocation2 + $0xd0] sm:$0xff] %vm877_vm0, %v5437_v46 }
 0x268   : > { %1776 = vperm.xlu1 %4150, %v5361_v39   ;;  %1761 = vperm.xlu0 %4149, %v5332_v7   ;;  %v1538_v4 = vpop.xlane.xlu0 %1537 }
 0x269   : > { %v5450_v57 = vmax.f32 %v5441_v62, %v1538_v4 }
 0x26b   : > { %2892 = vst.msk [vmem:[#allocation2 + $0xd8] sm:$0xff] %vm877_vm0, %v5450_v57 }
 0x26c   : > { %1786 = vperm.xlu1 %4150, %v5383_v54   ;;  %1771 = vperm.xlu0 %4149, %v5351_v43   ;;  %v1541_v10 = vpop.xlane.xlu0 %1540 }
 0x26d   : > { %v5463_v4 = vmax.f32 %v5454_v21, %v1541_v10  ;;  %v1623_v21 = vmul.f32 1.442695, %v6534_v12 }
 0x26f   : > { %6533 = vst [vmem:[#allocation73_spill] sm:$0xff] %v5463_v4  ;;  %2893 = vst.msk [vmem:[#allocation2 + $0xe0] sm:$0xff] %vm877_vm0, %v5463_v4  ;;  %4215 = vpow2.f32 %v1623_v21 }
 0x270   : > { %1796 = vperm.xlu1 %4150, %v5403_v0   ;;  %1781 = vperm.xlu0 %4149, %v5373_v5   ;;  %v1544_v3 = vpop.xlane.xlu1 %1543  ;;  %v5487_v56 = vpop.eup %4207 }
 0x271   : > { %v5476_v10 = vmax.f32 %v5465_v53, %v1544_v3  ;;  %6535 = vst [vmem:[#allocation74_spill] sm:$0xff] %v5487_v56  ;;  %v5491_v27 = vpop.eup %4209 }
 0x272   : > { %6536 = vst [vmem:[#allocation75_spill] sm:$0xff] %v5491_v27  ;;  %v5495_v8 = vpop.eup %4211 }
 0x273   : > { %2894 = vst.msk [vmem:[#allocation2 + $0xe8] sm:$0xff] %vm877_vm0, %v5476_v10  ;;  %6537 = vst [vmem:[#allocation76_spill] sm:$0xff] %v5495_v8  ;;  %v5501_v1 = vpop.eup %4213 }
 0x274   : > { %1806 = vperm.xlu1 %4150, %v5424_v61   ;;  %1791 = vperm.xlu0 %4149, %v5393_v40   ;;  %6538 = vst [vmem:[#allocation77_spill] sm:$0xff] %v5501_v1 }
 0x278   : > { %2290 = vperm.xlu1 %4150, %v5487_v56   ;;  %1801 = vperm.xlu0 %4149, %v5413_v2  }
 0x27c   : > { %1816 = vperm.xlu1 %4150, %v5450_v57   ;;  %2295 = vperm.xlu0 %4149, %v5491_v27   ;;  %v5503_v15 = vpop.eup %4215 }
 0x27d   : > { %6539 = vst [vmem:[#allocation78_spill] sm:$0xff] %v5503_v15 }
 0x280   : > { %2300 = vperm.xlu1 %4150, %v5495_v8   ;;  %1811 = vperm.xlu0 %4149, %v5437_v46  }
 0x284   : > { %1826 = vperm.xlu1 %4150, %v5476_v10   ;;  %1821 = vperm.xlu0 %4149, %v5463_v4  }
 0x288   : > { %2305 = vperm.xlu1 %4150, %v5501_v1   ;;  %2310 = vperm.xlu0 %4149, %v5503_v15  }
 0x28a   : > { %v1702_v47 = vpop.permute.xlu0 %1701 }
 0x28b   : > { %v1847_v21 = vsub.f32 %v4970_v13, %v1702_v47  ;;  %v1848_v12 = vsub.f32 %v4972_v14, %v1702_v47 }
 0x28d   : > { %v1919_v3 = vmul.f32 1.442695, %v1847_v21  ;;  %v1921_v50 = vmul.f32 1.442695, %v1848_v12 }
 0x28e   : > { %v1707_v60 = vpop.permute.xlu1 %1706 }
 0x28f   : > { %4217 = vpow2.f32 %v1919_v3  ;;  %v1849_v8 = vsub.f32 %v4976_v16, %v1707_v60  ;;  %v1850_v56 = vsub.f32 %v4978_v17, %v1707_v60 }
 0x290   : > { %4219 = vpow2.f32 %v1921_v50 }
 0x291   : > { %v1923_v27 = vmul.f32 1.442695, %v1849_v8  ;;  %v1925_v4 = vmul.f32 1.442695, %v1850_v56 }
 0x292   : > { %v1712_v46 = vpop.permute.xlu1 %1711 }
 0x293   : > { %4221 = vpow2.f32 %v1923_v27  ;;  %v1851_v1 = vsub.f32 %v4982_v19, %v1712_v46  ;;  %v1852_v15 = vsub.f32 %v4984_v20, %v1712_v46 }
 0x294   : > { %4223 = vpow2.f32 %v1925_v4 }
 0x295   : > { %v1927_v13 = vmul.f32 1.442695, %v1851_v1  ;;  %v1929_v14 = vmul.f32 1.442695, %v1852_v15 }
 0x296   : > { %v1717_v47 = vpop.permute.xlu1 %1716 }
 0x297   : > { %4225 = vpow2.f32 %v1927_v13  ;;  %v1853_v21 = vsub.f32 %v4988_v22, %v1717_v47  ;;  %v1854_v16 = vsub.f32 %v4990_v23, %v1717_v47 }
 0x298   : > { %4227 = vpow2.f32 %v1929_v14 }
 0x299   : > { %v1931_v17 = vmul.f32 1.442695, %v1853_v21  ;;  %v1933_v60 = vmul.f32 1.442695, %v1854_v16 }
 0x29b   : > { %4229 = vpow2.f32 %v1931_v17 }
 0x29c   : > { %v4218_v56 = vpop.eup %4217  ;;  %4231 = vpow2.f32 %v1933_v60 }
 0x29d   : > { %v4220_v27 = vpop.eup %4219 }
 0x29e   : > { %v5515_v8 = vadd.f32 %v4220_v27, %v4218_v56 }
 0x2a0   : > { %v4222_v19 = vpop.eup %4221 }
 0x2a1   : > { %v4224_v20 = vpop.eup %4223  ;;  %v2484_v46 = vpack.c.bf16 %v4222_v19, %v4218_v56 }
 0x2a2   : > { %v1732_v4 = vpop.permute.xlu1 %1731  ;;  %v2485_v1 = vpack.c.bf16 %v4224_v20, %v4220_v27  ;;  %v5517_v15 = vadd.f32 %v4224_v20, %v4222_v19  ;;  %v6540_v20 = vsub.f32 %v5200_v18, %v5210_v41 }
 0x2a3   : > { %v1859_v22 = vsub.f32 %v5038_v33, %v1732_v4  ;;  %v1860_v23 = vsub.f32 %v5040_v34, %v1732_v4 }
 0x2a4   : > { %v4226_v12 = vpop.eup %4225  ;;  %2688 = vmatprep.mubr.bf16.mxu1 %v2485_v1  ;;  %v6542_v1 = vsub.f32 %v5251_v24, %v5261_v38 }
 0x2a5   : > { %v4228_v3 = vpop.eup %4227  ;;  %v1943_v50 = vmul.f32 1.442695, %v1859_v22  ;;  %v1945_v13 = vmul.f32 1.442695, %v1860_v23  ;;  %2689 = vmatmul.mubr.bf16.vlgmr.msra.gmra.mxu1 %v2484_v46  ;;  %v1625_v46 = vmul.f32 1.442695, %v6540_v20 }
 0x2a6   : > { %v1737_v14 = vpop.permute.xlu1 %1736  ;;  %v5521_v47 = vadd.f32 %v4228_v3, %v4226_v12  ;;  %v1633_v22 = vmul.f32 1.442695, %v6542_v1 }
 0x2a7   : > { %4233 = vpow2.f32 %v1943_v50  ;;  %v1861_v21 = vsub.f32 %v5044_v36, %v1737_v14  ;;  %v1862_v16 = vsub.f32 %v5046_v37, %v1737_v14  ;;  %v6541_v36 = vsub.f32 %v5224_v59, %v5234_v32 }
 0x2a8   : > { %v4230_v17 = vpop.eup %4229  ;;  %4235 = vpow2.f32 %v1945_v13  ;;  %v6543_v59 = vsub.f32 %v5274_v58, %v5284_v55  ;;  %v6544_v55 = vsub.f32 %v5298_v6, %v5305_v11  ;;  %v6547_v6 = vsub.f32 %v5236_v63, %v5249_v35 }
 0x2a9   : > { %v4232_v60 = vpop.eup %4231  ;;  %v1947_v33 = vmul.f32 1.442695, %v1861_v21  ;;  %v1949_v56 = vmul.f32 1.442695, %v1862_v16  ;;  %v2486_v34 = vpack.c.bf16 %v4230_v17, %v4226_v12  ;;  %v1629_v37 = vmul.f32 1.442695, %v6541_v36 }
 0x2aa   : > { %v2487_v27 = vpack.c.bf16 %v4232_v60, %v4228_v3  ;;  %v5525_v19 = vadd.f32 %v4232_v60, %v4230_v17  ;;  %v5540_v12 = vld [vmem:[#allocation2 + $0xf8] sm:$0xff]  ;;  %v1637_v32 = vmul.f32 1.442695, %v6543_v59  ;;  %v1641_v58 = vmul.f32 1.442695, %v6544_v55 }
 0x2ab   : > { %4237 = vpow2.f32 %v1947_v33  ;;  %v6545_v21 = vsub.f32 %v5212_v29, %v5222_v26  ;;  %v6546_v17 = vsub.f32 %v5316_v44, %v5323_v48  ;;  %v1631_v26 = vmul.f32 1.442695, %v6547_v6 }
 0x2ac   : > { %4239 = vpow2.f32 %v1949_v56  ;;  %2696 = vmatprep.mubr.bf16.mxu1 %v2487_v27  ;;  %v6548_v48 = vsub.f32 %v5334_v49, %v5341_v42  ;;  %v6550_v63 = vsub.f32 %v5263_v9, %v5272_v51  ;;  %v6551_v42 = vsub.f32 %v5353_v45, %v5361_v39  ;;  %v6555_v51 = vld [vmem:[#allocation59_spill] sm:$0xff]  ;;  %v6556_v9 = vld [vmem:[#allocation60_spill] sm:$0xff]  ;;  %v6558_v39 = vld [vmem:[#allocation65_spill] sm:$0xff] }
 0x2ad   : > { %2697 = vmatmul.mubr.bf16.gmra.mxu1 %v2486_v34  ;;  %4241 = vpow2.f32 %v1625_v46  ;;  %v1627_v16 = vmul.f32 1.442695, %v6545_v21  ;;  %v1645_v60 = vmul.f32 1.442695, %v6546_v17  ;;  %v6559_v45 = vsub.f32 %v6558_v39, %v5383_v54 }
 0x2ae   : > { %4243 = vpow2.f32 %v1629_v37  ;;  %v1649_v44 = vmul.f32 1.442695, %v6548_v48  ;;  %v1635_v35 = vmul.f32 1.442695, %v6550_v63  ;;  %v1653_v49 = vmul.f32 1.442695, %v6551_v42 }
 0x2af   : > { %4245 = vpow2.f32 %v1633_v22  ;;  %v6553_v22 = vld [vmem:[#allocation12_spill] sm:$0xff] }
 0x2b0   : > { %4247 = vpow2.f32 %v1637_v32  ;;  %v6557_v32 = vsub.f32 %v6555_v51, %v6556_v9  ;;  %v6569_v42 = vld [vmem:[#allocation20_spill] sm:$0xff]  ;;  %v6572_v9 = vld [vmem:[#allocation69_spill] sm:$0xff] }
 0x2b1   : > { %4249 = vpow2.f32 %v1641_v58 }
 0x2b2   : > { %4251 = vpow2.f32 %v1627_v16  ;;  %v1639_v55 = vmul.f32 1.442695, %v6557_v32  ;;  %v1657_v16 = vmul.f32 1.442695, %v6559_v45  ;;  %v6573_v32 = vsub.f32 %v6572_v9, %v5424_v61  ;;  %v6575_v45 = vld [vmem:[#allocation21_spill] sm:$0xff] }
 0x2b3   : > { %4253 = vpow2.f32 %v1645_v60  ;;  %v6560_v60 = vld [vmem:[#allocation13_spill] sm:$0xff] }
 0x2b4   : > { %v5533_v4 = vpop.eup %4233 }
 0x2b5   : > { %v5538_v23 = vpop.eup %4235 }
 0x2b6   : > { %v5544_v18 = vadd.f32 %v5538_v23, %v5533_v4 }
 0x2b7   : > { %v1550_v41 = vpop.xlane.xlu0 %1549 }
 0x2b8   : > { %v5546_v3 = vpop.eup %4237  ;;  %v5552_v50 = vmax.f32 %v5540_v12, %v1550_v41 }
 0x2b9   : > { %v5554_v24 = vpop.eup %4239 }
 0x2ba   : > { %2896 = vst.msk [vmem:[#allocation2 + $0xf8] sm:$0xff] %vm877_vm0, %v5552_v50  ;;  %1836 = vperm.xlu1 %4150, %v5552_v50   ;;  %v5563_v13 = vadd.f32 %v5554_v24, %v5546_v3  ;;  %v5568_v14 = vpop.eup %4241 }
 0x2bb   : > { %v5579_v11 = vpop.eup %4243 }
 0x2bc   : > { %v5590_v46 = vpop.eup %4245 }
 0x2bd   : > { %6549 = vst [vmem:[#allocation79_spill] sm:$0xff] %v5590_v46  ;;  %v5601_v59 = vpop.eup %4247 }
 0x2be   : > { %2315 = vperm.xlu1 %4150, %v5568_v14   ;;  %v5612_v6 = vpop.eup %4249 }
 0x2bf   : > { %v1722_v33 = vpop.permute.xlu0 %1721  ;;  %6562 = vst [vmem:[#allocation12_spill] sm:$0xff] %v5612_v6  ;;  %v5618_v54 = vpop.eup %4251 }
 0x2c0   : > { %v1855_v56 = vsub.f32 %v4994_v25, %v1722_v33  ;;  %v1856_v34 = vsub.f32 %v5028_v28, %v1722_v33 }
 0x2c2   : > { %v1935_v29 = vmul.f32 1.442695, %v1855_v56  ;;  %v1937_v27 = vmul.f32 1.442695, %v1856_v34  ;;  %2325 = vperm.xlu1 %4150, %v5579_v11   ;;  %v6561_v56 = vld [vmem:[#allocation14_spill] sm:$0xff] }
 0x2c3   : > { %v1727_v20 = vpop.permute.xlu0 %1726 }
 0x2c4   : > { %4255 = vpow2.f32 %v1935_v29  ;;  %v1857_v25 = vsub.f32 %v5032_v30, %v1727_v20  ;;  %v1858_v28 = vsub.f32 %v5034_v31, %v1727_v20  ;;  %v6552_v31 = vld [vmem:[#allocation11_spill] sm:$0xff] }
 0x2c5   : > { %4257 = vpow2.f32 %v1937_v27  ;;  %6554 = vst [vmem:[#allocation11_spill] sm:$0xff] %v5601_v59  ;;  %v6565_v20 = vld [vmem:[#allocation67_spill] sm:$0xff] }
 0x2c6   : > { %4259 = vpow2.f32 %v1631_v26  ;;  %v1939_v36 = vmul.f32 1.442695, %v1857_v25  ;;  %v1941_v37 = vmul.f32 1.442695, %v1858_v28  ;;  %2335 = vperm.xlu1 %4150, %v5590_v46   ;;  %v6563_v26 = vld [vmem:[#allocation61_spill] sm:$0xff]  ;;  %v6566_v25 = vsub.f32 %v6565_v20, %v5403_v0 }
 0x2c7   : > { %4261 = vpow2.f32 %v1649_v44  ;;  %v1682_v30 = vpop.permute.xlu0 %1681  ;;  %v6564_v29 = vsub.f32 %v6563_v26, %v5314_v52  ;;  %v6579_v20 = vsub.f32 %v5441_v62, %v5450_v57  ;;  %v2491_v62 = vpack.c.bf16 %v5554_v24, %v5538_v23 }
 0x2c8   : > { %4263 = vpow2.f32 %v1939_v36  ;;  %v1839_v1 = vsub.f32 %v6552_v31, %v1682_v30  ;;  %v1840_v41 = vsub.f32 %v6553_v22, %v1682_v30  ;;  %v1661_v28 = vmul.f32 1.442695, %v6566_v25  ;;  %v6568_v36 = vld [vmem:[#allocation19_spill] sm:$0xff]  ;;  %v6570_v31 = vld [vmem:[#allocation62_spill] sm:$0xff] }
 0x2c9   : > { %4265 = vpow2.f32 %v1941_v37  ;;  %v1643_v27 = vmul.f32 1.442695, %v6564_v29  ;;  %v1669_v25 = vmul.f32 1.442695, %v6579_v20 }
 0x2ca   : > { %4267 = vpow2.f32 %v1635_v35  ;;  %v1903_v58 = vmul.f32 1.442695, %v1839_v1  ;;  %v1905_v21 = vmul.f32 1.442695, %v1840_v41  ;;  %2345 = vperm.xlu1 %4150, %v5601_v59   ;;  %v5623_v35 = vpop.eup %4253  ;;  %v6571_v1 = vsub.f32 %v6570_v31, %v5332_v7 }
 0x2cb   : > { %4269 = vpow2.f32 %v1653_v49  ;;  %v1687_v17 = vpop.permute.xlu0 %1686  ;;  %6567 = vst [vmem:[#allocation59_spill] sm:$0xff] %v5623_v35 }
 0x2cc   : > { %4271 = vpow2.f32 %v1903_v58  ;;  %v1841_v33 = vsub.f32 %v6560_v60, %v1687_v17  ;;  %v1842_v34 = vsub.f32 %v6561_v56, %v1687_v17  ;;  %v1647_v22 = vmul.f32 1.442695, %v6571_v1 }
 0x2cd   : > { %4273 = vpow2.f32 %v1905_v21 }
 0x2ce   : > { %4275 = vpow2.f32 %v1639_v55  ;;  %v1907_v48 = vmul.f32 1.442695, %v1841_v33  ;;  %v1909_v44 = vmul.f32 1.442695, %v1842_v34  ;;  %2355 = vperm.xlu1 %4150, %v5612_v6   ;;  %v1665_v55 = vmul.f32 1.442695, %v6573_v32 }
 0x2cf   : > { %4277 = vpow2.f32 %v1657_v16  ;;  %v1742_v63 = vpop.permute.xlu0 %1741  ;;  %v6576_v16 = vld [vmem:[#allocation22_spill] sm:$0xff]  ;;  %v6577_v33 = vld [vmem:[#allocation63_spill] sm:$0xff] }
 0x2d0   : > { %4279 = vpow2.f32 %v1907_v48  ;;  %v1863_v37 = vsub.f32 %v6568_v36, %v1742_v63  ;;  %v1864_v52 = vsub.f32 %v6569_v42, %v1742_v63  ;;  %v6578_v56 = vsub.f32 %v6577_v33, %v5351_v43 }
 0x2d1   : > { %v4256_v49 = vpop.eup %4255  ;;  %4281 = vpow2.f32 %v1909_v44 }
 0x2d2   : > { %v4258_v30 = vpop.eup %4257  ;;  %4283 = vpow2.f32 %v1643_v27  ;;  %v1951_v41 = vmul.f32 1.442695, %v1863_v37  ;;  %v1953_v51 = vmul.f32 1.442695, %v1864_v52  ;;  %2365 = vperm.xlu1 %4150, %v5623_v35   ;;  %v1651_v34 = vmul.f32 1.442695, %v6578_v56 }
 0x2d3   : > { %v5631_v0 = vpop.eup %4259  ;;  %4285 = vpow2.f32 %v1661_v28  ;;  %v1747_v58 = vpop.permute.xlu0 %1746  ;;  %v5636_v21 = vadd.f32 %v4258_v30, %v4256_v49  ;;  %v5646_v27 = vld [vmem:[#allocation2 + $0xf0] sm:$0xff]  ;;  %v6581_v37 = vld [vmem:[#allocation15_spill] sm:$0xff]  ;;  %v6582_v52 = vld [vmem:[#allocation16_spill] sm:$0xff] }
 0x2d4   : > { %v5638_v39 = vpop.eup %4261  ;;  %4287 = vpow2.f32 %v1951_v41  ;;  %v1865_v7 = vsub.f32 %v6575_v45, %v1747_v58  ;;  %v1866_v17 = vsub.f32 %v6576_v16, %v1747_v58  ;;  %v6585_v58 = vsub.f32 %v5465_v53, %v5476_v10  ;;  %v6587_v16 = vld [vmem:[#allocation25_spill] sm:$0xff]  ;;  %v6589_v56 = vld [vmem:[#allocation23_spill] sm:$0xff] }
 0x2d5   : > { %6574 = vst [vmem:[#allocation60_spill] sm:$0xff] %v5638_v39  ;;  %v4264_v60 = vpop.eup %4263  ;;  %4289 = vpow2.f32 %v1953_v51 }
 0x2d6   : > { %v4266_v26 = vpop.eup %4265  ;;  %4291 = vpow2.f32 %v1647_v22  ;;  %v1955_v61 = vmul.f32 1.442695, %v1865_v7  ;;  %v1957_v29 = vmul.f32 1.442695, %v1866_v17  ;;  %2375 = vperm.xlu1 %4150, %v5638_v39   ;;  %v2488_v48 = vpack.c.bf16 %v4264_v60, %v4256_v49  ;;  %v6636_v39 = vld [vmem:[#allocation48_spill] sm:$0xff] }
 0x2d7   : > { %v5648_v44 = vpop.eup %4267  ;;  %4293 = vpow2.f32 %v1665_v55  ;;  %v1692_v28 = vpop.permute.xlu0 %1691  ;;  %v2489_v43 = vpack.c.bf16 %v4266_v26, %v4258_v30  ;;  %v5653_v63 = vadd.f32 %v4266_v26, %v4264_v60  ;;  %v6583_v30 = vld [vmem:[#allocation64_spill] sm:$0xff]  ;;  %v1673_v45 = vmul.f32 1.442695, %v6585_v58  ;;  %v6588_v60 = vld [vmem:[#allocation26_spill] sm:$0xff] }
 0x2d8   : > { %v5655_v36 = vpop.eup %4269  ;;  %4295 = vpow2.f32 %v1955_v61  ;;  %v1843_v42 = vsub.f32 %v6581_v37, %v1692_v28  ;;  %v1844_v31 = vsub.f32 %v6582_v52, %v1692_v28  ;;  %v1547_v1 = vpop.xlane.xlu1 %1546  ;;  %v6584_v41 = vsub.f32 %v6583_v30, %v5373_v5  ;;  %v6590_v26 = vld [vmem:[#allocation24_spill] sm:$0xff]  ;;  %v6593_v30 = vld [vmem:[#allocation18_spill] sm:$0xff] }
 0x2d9   : > { %6580 = vst [vmem:[#allocation65_spill] sm:$0xff] %v5655_v36  ;;  %v4272_v49 = vpop.eup %4271  ;;  %4297 = vpow2.f32 %v1957_v29  ;;  %v5660_v22 = vmax.f32 %v5646_v27, %v1547_v1  ;;  %2704 = vmatprep.mubr.bf16.mxu1 %v2489_v43  ;;  %v6592_v1 = vld [vmem:[#allocation17_spill] sm:$0xff] }
 0x2da   : > { %v4274_v57 = vpop.eup %4273  ;;  %4299 = vpow2.f32 %v1651_v34  ;;  %v1655_v51 = vmul.f32 1.442695, %v6584_v41  ;;  %v1911_v9 = vmul.f32 1.442695, %v1843_v42  ;;  %v1913_v32 = vmul.f32 1.442695, %v1844_v31  ;;  %2705 = vmatmul.mubr.bf16.gmra.mxu1 %v2488_v48  ;;  %2385 = vperm.xlu1 %4150, %v5655_v36  }
 0x2db   : > { %v5668_v55 = vpop.eup %4275  ;;  %4301 = vpow2.f32 %v1669_v25  ;;  %2895 = vst.msk [vmem:[#allocation2 + $0xf0] sm:$0xff] %vm877_vm0, %v5660_v22  ;;  %2712 = vmatprep.mubr.bf16.mxu1 %v2491_v62  ;;  %1831 = vperm.xlu0 %4149, %v5660_v22   ;;  %v1757_v5 = vpop.permute.xlu0 %1756  ;;  %v5678_v24 = vadd.f32 %v4274_v57, %v4272_v49 }
 0x2dc   : > { %v5680_v7 = vpop.eup %4277  ;;  %4303 = vpow2.f32 %v1911_v9  ;;  %v1869_v17 = vsub.f32 %v6587_v16, %v1757_v5  ;;  %v1870_v53 = vsub.f32 %v6588_v60, %v1757_v5  ;;  %v1752_v10 = vpop.permute.xlu1 %1751 }
 0x2dd   : > { %6586 = vst [vmem:[#allocation13_spill] sm:$0xff] %v5680_v7  ;;  %v5684_v33 = vpop.eup %4279  ;;  %4305 = vpow2.f32 %v1913_v32  ;;  %v1867_v34 = vsub.f32 %v6589_v56, %v1752_v10  ;;  %v1868_v61 = vsub.f32 %v6590_v26, %v1752_v10  ;;  %v6594_v32 = vld [vmem:[#allocation29_spill] sm:$0xff] }
 0x2de   : > { %v5688_v29 = vpop.eup %4281  ;;  %4307 = vpow2.f32 %v1655_v51  ;;  %v1963_v48 = vmul.f32 1.442695, %v1869_v17  ;;  %v1965_v20 = vmul.f32 1.442695, %v1870_v53  ;;  %2395 = vperm.xlu1 %4150, %v5680_v7   ;;  %v2480_v25 = vpack.c.bf16 %v5684_v33, %v4272_v49 }
 0x2df   : > { %v5692_v28 = vpop.eup %4283  ;;  %4309 = vpow2.f32 %v1673_v45  ;;  %v1959_v43 = vmul.f32 1.442695, %v1867_v34  ;;  %v1961_v37 = vmul.f32 1.442695, %v1868_v61  ;;  %2320 = vperm.xlu0 %4149, %v5618_v54   ;;  %v1697_v42 = vpop.permute.xlu0 %1696  ;;  %v2481_v52 = vpack.c.bf16 %v5688_v29, %v4274_v57  ;;  %v6595_v45 = vld [vmem:[#allocation30_spill] sm:$0xff]  ;;  %v6597_v34 = vld [vmem:[#allocation27_spill] sm:$0xff] }
 0x2e0   : > { %v5696_v31 = vpop.eup %4285  ;;  %4311 = vpow2.f32 %v1963_v48  ;;  %v1845_v62 = vsub.f32 %v6592_v1, %v1697_v42  ;;  %v1846_v41 = vsub.f32 %v6593_v30, %v1697_v42  ;;  %v1767_v51 = vpop.permute.xlu1 %1766  ;;  %v2490_v49 = vpack.c.bf16 %v5546_v3, %v5533_v4  ;;  %v6598_v61 = vld [vmem:[#allocation28_spill] sm:$0xff] }
 0x2e1   : > { %6591 = vst [vmem:[#allocation14_spill] sm:$0xff] %v5696_v31  ;;  %v4288_v9 = vpop.eup %4287  ;;  %4313 = vpow2.f32 %v1965_v20  ;;  %v1873_v58 = vsub.f32 %v6594_v32, %v1767_v51  ;;  %v1874_v5 = vsub.f32 %v6595_v45, %v1767_v51  ;;  %2672 = vmatprep.mubr.bf16.mxu0 %v2481_v52  ;;  %v6601_v52 = vld [vmem:[#allocation33_spill] sm:$0xff] }
 0x2e2   : > { %v4290_v16 = vpop.eup %4289  ;;  %4315 = vpow2.f32 %v1959_v43  ;;  %v1915_v57 = vmul.f32 1.442695, %v1845_v62  ;;  %v1917_v17 = vmul.f32 1.442695, %v1846_v41  ;;  %2673 = vmatmul.mubr.bf16.vlgmr.msra.gmra.mxu0 %v2480_v25  ;;  %2713 = vmatmul.mubr.bf16.gmra.mxu1 %v2490_v49  ;;  %v6599_v43 = vld [vmem:[#allocation66_spill] sm:$0xff] }
 0x2e3   : > { %v5704_v60 = vpop.eup %4291  ;;  %4317 = vpow2.f32 %v1961_v37  ;;  %v1971_v53 = vmul.f32 1.442695, %v1873_v58  ;;  %v1973_v10 = vmul.f32 1.442695, %v1874_v5  ;;  %2405 = vperm.xlu1 %4150, %v5696_v31   ;;  %2330 = vperm.xlu0 %4149, %v5631_v0   ;;  %v1762_v4 = vpop.permute.xlu0 %1761  ;;  %v5708_v3 = vadd.f32 %v4290_v16, %v4288_v9  ;;  %v6602_v62 = vld [vmem:[#allocation34_spill] sm:$0xff]  ;;  %v6617_v31 = vld [vmem:[#allocation40_spill] sm:$0xff] }
 0x2e4   : > { %v5710_v56 = vpop.eup %4293  ;;  %4319 = vpow2.f32 %v1915_v57  ;;  %v1871_v26 = vsub.f32 %v6597_v34, %v1762_v4  ;;  %v1872_v48 = vsub.f32 %v6598_v61, %v1762_v4  ;;  %v1777_v20 = vpop.permute.xlu1 %1776  ;;  %v6600_v37 = vsub.f32 %v6599_v43, %v5393_v40  ;;  %v6604_v4 = vld [vmem:[#allocation31_spill] sm:$0xff]  ;;  %v6607_v43 = vld [vmem:[#allocation38_spill] sm:$0xff] }
 0x2e5   : > { %6596 = vst [vmem:[#allocation61_spill] sm:$0xff] %v5710_v56  ;;  %v4296_v25 = vpop.eup %4295  ;;  %4321 = vpow2.f32 %v1917_v17  ;;  %v1877_v1 = vsub.f32 %v6601_v52, %v1777_v20  ;;  %v1878_v30 = vsub.f32 %v6602_v62, %v1777_v20 }
 0x2e6   : > { %v1659_v42 = vmul.f32 1.442695, %v6600_v37  ;;  %v4298_v41 = vpop.eup %4297  ;;  %4323 = vpow2.f32 %v1971_v53  ;;  %v1967_v51 = vmul.f32 1.442695, %v1871_v26  ;;  %v1969_v49 = vmul.f32 1.442695, %v1872_v48 }
 0x2e7   : > { %v2492_v32 = vpack.c.bf16 %v4296_v25, %v4288_v9  ;;  %v5719_v58 = vpop.eup %4299  ;;  %4325 = vpow2.f32 %v1973_v10  ;;  %v1979_v45 = vmul.f32 1.442695, %v1877_v1  ;;  %v1981_v5 = vmul.f32 1.442695, %v1878_v30  ;;  %2415 = vperm.xlu1 %4150, %v5710_v56   ;;  %2340 = vperm.xlu0 %4149, %v5648_v44   ;;  %v1772_v40 = vpop.permute.xlu0 %1771  ;;  %v6605_v53 = vld [vmem:[#allocation32_spill] sm:$0xff]  ;;  %v6606_v10 = vld [vmem:[#allocation37_spill] sm:$0xff] }
 0x2e8   : > { %v2493_v57 = vpack.c.bf16 %v4298_v41, %v4290_v16  ;;  %v5723_v17 = vpop.eup %4301  ;;  %4327 = vpow2.f32 %v1967_v51  ;;  %v1875_v34 = vsub.f32 %v6604_v4, %v1772_v40  ;;  %v1876_v26 = vsub.f32 %v6605_v53, %v1772_v40  ;;  %v1787_v61 = vpop.permute.xlu1 %1786  ;;  %v6611_v53 = vld [vmem:[#allocation42_spill] sm:$0xff] }
 0x2e9   : > { %6603 = vst [vmem:[#allocation67_spill] sm:$0xff] %v5723_v17  ;;  %v5727_v9 = vadd.f32 %v4298_v41, %v4296_v25  ;;  %v5729_v48 = vpop.eup %4303  ;;  %4329 = vpow2.f32 %v1969_v49  ;;  %v1881_v20 = vsub.f32 %v6606_v10, %v1787_v61  ;;  %v1882_v37 = vsub.f32 %v6607_v43, %v1787_v61 }
 0x2ea   : > { %2720 = vmatprep.mubr.bf16.mxu1 %v2493_v57  ;;  %v4306_v52 = vpop.eup %4305  ;;  %4331 = vpow2.f32 %v1979_v45  ;;  %v1977_v16 = vmul.f32 1.442695, %v1876_v26  ;;  %v1975_v49 = vmul.f32 1.442695, %v1875_v34  ;;  %v6609_v45 = vld [vmem:[#allocation36_spill] sm:$0xff] }
 0x2eb   : > { %2721 = vmatmul.mubr.bf16.gmra.mxu1 %v2492_v32  ;;  %v5733_v1 = vpop.eup %4307  ;;  %4333 = vpow2.f32 %v1981_v5  ;;  %v1987_v62 = vmul.f32 1.442695, %v1881_v20  ;;  %v1989_v30 = vmul.f32 1.442695, %v1882_v37  ;;  %2425 = vperm.xlu1 %4150, %v5723_v17   ;;  %v1782_v25 = vpop.permute.xlu0 %1781  ;;  %v5738_v41 = vadd.f32 %v4306_v52, %v5729_v48  ;;  %v6610_v5 = vld [vmem:[#allocation41_spill] sm:$0xff]  ;;  %v6616_v17 = vld [vmem:[#allocation35_spill] sm:$0xff] }
 0x2ec   : > { %2350 = vperm.xlu0 %4149, %v5668_v55   ;;  %v5740_v51 = vpop.eup %4309  ;;  %4335 = vpow2.f32 %v1659_v42  ;;  %v1880_v40 = vsub.f32 %v6609_v45, %v1782_v25  ;;  %v1797_v32 = vpop.permute.xlu1 %1796  ;;  %v6612_v45 = vld [vmem:[#allocation68_spill] sm:$0xff]  ;;  %v1879_v56 = vsub.f32 %v6616_v17, %v1782_v25 }
 0x2ed   : > { %6608 = vst [vmem:[#allocation19_spill] sm:$0xff] %v5740_v51  ;;  %v4312_v57 = vpop.eup %4311  ;;  %4337 = vpow2.f32 %v1977_v16  ;;  %v1885_v4 = vsub.f32 %v6610_v5, %v1797_v32  ;;  %v1886_v26 = vsub.f32 %v6611_v53, %v1797_v32  ;;  %v6613_v5 = vsub.f32 %v6612_v45, %v5413_v2 }
 0x2ee   : > { %v4314_v61 = vpop.eup %4313  ;;  %4339 = vpow2.f32 %v1987_v62  ;;  %v1985_v10 = vmul.f32 1.442695, %v1880_v40 }
 0x2ef   : > { %v4316_v20 = vpop.eup %4315  ;;  %4341 = vpow2.f32 %v1989_v30  ;;  %v1995_v43 = vmul.f32 1.442695, %v1885_v4  ;;  %v1997_v37 = vmul.f32 1.442695, %v1886_v26  ;;  %2435 = vperm.xlu1 %4150, %v5740_v51   ;;  %v5747_v42 = vpop.permute.xlu0 %1791  ;;  %v5749_v34 = vadd.f32 %v4314_v61, %v4312_v57  ;;  %v6614_v30 = vld [vmem:[#allocation45_spill] sm:$0xff]  ;;  %v6615_v26 = vld [vmem:[#allocation46_spill] sm:$0xff] }
 0x2f0   : > { %2360 = vperm.xlu0 %4149, %v5692_v28   ;;  %v4318_v16 = vpop.eup %4317  ;;  %v1663_v32 = vmul.f32 1.442695, %v6613_v5  ;;  %4343 = vpow2.f32 %v1975_v49  ;;  %v1807_v62 = vpop.permute.xlu1 %1806  ;;  %v2494_v40 = vpack.c.bf16 %v4312_v57, %v4316_v20  ;;  %v1884_v7 = vsub.f32 %v6617_v31, %v5747_v42 }
 0x2f1   : > { %v4320_v53 = vpop.eup %4319  ;;  %4345 = vpow2.f32 %v1985_v10  ;;  %v1889_v4 = vsub.f32 %v6614_v30, %v1807_v62  ;;  %v1890_v23 = vsub.f32 %v6615_v26, %v1807_v62  ;;  %v2495_v38 = vpack.c.bf16 %v4314_v61, %v4318_v16  ;;  %v6618_v62 = vld [vmem:[#allocation70_spill] sm:$0xff]  ;;  %v6619_v61 = vld [vmem:[#allocation71_spill] sm:$0xff] }
 0x2f2   : > { %v4322_v51 = vpop.eup %4321  ;;  %4347 = vpow2.f32 %v1995_v43  ;;  %v2482_v2 = vpack.c.bf16 %v4320_v53, %v5729_v48  ;;  %v6620_v30 = vsub.f32 %v6618_v62, %v6619_v61  ;;  %v5768_v31 = vadd.f32 %v4318_v16, %v4316_v20  ;;  %v6622_v16 = vld [vmem:[#allocation72_spill] sm:$0xff] }
 0x2f3   : > { %v4324_v45 = vpop.eup %4323  ;;  %4349 = vpow2.f32 %v1997_v37  ;;  %v2003_v49 = vmul.f32 1.442695, %v1889_v4  ;;  %v2005_v57 = vmul.f32 1.442695, %v1890_v23  ;;  %2728 = vmatprep.mubr.bf16.mxu1 %v2495_v38  ;;  %v2483_v10 = vpack.c.bf16 %v4322_v51, %v4306_v52  ;;  %v5764_v17 = vpop.permute.xlu0 %1801 }
 0x2f4   : > { %2370 = vperm.xlu0 %4149, %v5704_v60   ;;  %v4326_v5 = vpop.eup %4325  ;;  %v1667_v26 = vmul.f32 1.442695, %v6620_v30  ;;  %2729 = vmatmul.mubr.bf16.gmra.mxu1 %v2494_v40  ;;  %v5766_v25 = vpop.permute.xlu1 %2290  ;;  %4351 = vpow2.f32 %v1663_v32  ;;  %v5770_v23 = vadd.f32 %v4322_v51, %v4320_v53  ;;  %v1983_v43 = vmul.f32 1.442695, %v1879_v56  ;;  %v6623_v32 = vld [vmem:[#allocation73_spill] sm:$0xff]  ;;  %v6626_v56 = vld [vmem:[#allocation39_spill] sm:$0xff] }
 0x2f5   : > { %6621 = vst [vmem:[#allocation20_spill] sm:$0xff] %v5766_v25  ;;  %v4328_v48 = vpop.eup %4327  ;;  %2680 = vmatprep.mubr.bf16.mxu0 %v2483_v10  ;;  %v5772_v38 = vadd.f32 %v4326_v5, %v4324_v45  ;;  %4353 = vpow2.f32 %v2003_v49  ;;  %v1993_v4 = vmul.f32 1.442695, %v1884_v7  ;;  %v6624_v51 = vsub.f32 %v6622_v16, %v6623_v32  ;;  %v6627_v49 = vld [vmem:[#allocation49_spill] sm:$0xff] }
 0x2f6   : > { %v4330_v52 = vpop.eup %4329  ;;  %2681 = vmatmul.mubr.bf16.gmra.mxu0 %v2482_v2  ;;  %4355 = vpow2.f32 %v2005_v57  ;;  %v1883_v2 = vsub.f32 %v6626_v56, %v5747_v42  ;;  %v6628_v57 = vld [vmem:[#allocation50_spill] sm:$0xff] }
 0x2f7   : > { %v4332_v37 = vpop.eup %4331  ;;  %v2497_v40 = vpack.c.bf16 %v4326_v5, %v4330_v52  ;;  %v5775_v62 = vadd.f32 %v4330_v52, %v4328_v48  ;;  %4357 = vpow2.f32 %v1667_v26  ;;  %v1671_v53 = vmul.f32 1.442695, %v6624_v51  ;;  %v6629_v26 = vld [vmem:[#allocation44_spill] sm:$0xff]  ;;  %v5792_v32 = vpop.permute.xlu0 %2295 }
 0x2f8   : > { %2380 = vperm.xlu0 %4149, %v5719_v58   ;;  %v4334_v20 = vpop.eup %4333  ;;  %v1817_v10 = vpop.permute.xlu1 %1816  ;;  %4359 = vpow2.f32 %v1983_v43  ;;  %v1888_v16 = vsub.f32 %v6629_v26, %v5764_v17  ;;  %6630 = vst [vmem:[#allocation69_spill] sm:$0xff] %v5792_v32  ;;  %v2496_v51 = vpack.c.bf16 %v4324_v45, %v4328_v48 }
 0x2f9   : > { %v5780_v61 = vpop.eup %4335  ;;  %v1893_v7 = vsub.f32 %v6627_v49, %v1817_v10  ;;  %v1894_v30 = vsub.f32 %v6628_v57, %v1817_v10  ;;  %2736 = vmatprep.mubr.bf16.mxu1 %v2497_v40  ;;  %v5786_v5 = vadd.f32 %v4334_v20, %v4332_v37  ;;  %4361 = vpow2.f32 %v1993_v4 }
 0x2fa   : > { %6625 = vst [vmem:[#allocation62_spill] sm:$0xff] %v5780_v61  ;;  %v5788_v52 = vpop.eup %4337  ;;  %4363 = vpow2.f32 %v1671_v53  ;;  %v1991_v49 = vmul.f32 1.442695, %v1883_v2  ;;  %v2001_v48 = vmul.f32 1.442695, %v1888_v16 }
 0x2fb   : > { %v4340_v25 = vpop.eup %4339  ;;  %v2011_v36 = vmul.f32 1.442695, %v1893_v7  ;;  %v2013_v42 = vmul.f32 1.442695, %v1894_v30  ;;  %v2499_v10 = vpack.c.bf16 %v4334_v20, %v5788_v52  ;;  %v1812_v7 = vpop.permute.xlu0 %1811  ;;  %v6632_v30 = vld [vmem:[#allocation53_spill] sm:$0xff] }
 0x2fc   : > { %2390 = vperm.xlu0 %4149, %v5733_v1   ;;  %v4342_v40 = vpop.eup %4341  ;;  %2737 = vmatmul.mubr.bf16.gmra.mxu1 %v2496_v51  ;;  %v5796_v56 = vpop.permute.xlu1 %2300  ;;  %v6633_v51 = vld [vmem:[#allocation54_spill] sm:$0xff]  ;;  %v1892_v35 = vsub.f32 %v6636_v39, %v1812_v7 }
 0x2fd   : > { %6631 = vst [vmem:[#allocation21_spill] sm:$0xff] %v5796_v56  ;;  %v5798_v43 = vpop.eup %4343  ;;  %4365 = vpow2.f32 %v2011_v36  ;;  %2744 = vmatprep.mubr.bf16.mxu1 %v2499_v10  ;;  %v5800_v57 = vadd.f32 %v4342_v40, %v4340_v25  ;;  %v6635_v10 = vld [vmem:[#allocation43_spill] sm:$0xff] }
 0x2fe   : > { %v5802_v45 = vpop.eup %4345  ;;  %4367 = vpow2.f32 %v2013_v42  ;;  %v1887_v32 = vsub.f32 %v6635_v10, %v5764_v17  ;;  %v2498_v16 = vpack.c.bf16 %v4332_v37, %v5798_v43  ;;  %v2009_v37 = vmul.f32 1.442695, %v1892_v35  ;;  %v6639_v10 = vld [vmem:[#allocation47_spill] sm:$0xff] }
 0x2ff   : > { %v4348_v4 = vpop.eup %4347  ;;  %4369 = vpow2.f32 %v1991_v49  ;;  %v2501_v49 = vpack.c.bf16 %v4342_v40, %v5802_v45 }
 0x300   : > { %2400 = vperm.xlu0 %4149, %v5780_v61   ;;  %v4350_v20 = vpop.eup %4349  ;;  %v1827_v53 = vpop.permute.xlu1 %1826  ;;  %4371 = vpow2.f32 %v2001_v48  ;;  %v1999_v17 = vmul.f32 1.442695, %v1887_v32 }
 0x301   : > { %v1897_v26 = vsub.f32 %v6632_v30, %v1827_v53  ;;  %v1898_v56 = vsub.f32 %v6633_v51, %v1827_v53  ;;  %v5807_v2 = vadd.f32 %v4350_v20, %v4348_v4  ;;  %v5809_v36 = vpop.eup %4351 }
 0x302   : > { %6634 = vst [vmem:[#allocation22_spill] sm:$0xff] %v5809_v36  ;;  %v4354_v42 = vpop.eup %4353 }
 0x303   : > { %v2019_v6 = vmul.f32 1.442695, %v1897_v26  ;;  %v2021_v59 = vmul.f32 1.442695, %v1898_v56  ;;  %v4356_v53 = vpop.eup %4355  ;;  %v1822_v56 = vpop.permute.xlu0 %1821 }
 0x304   : > { %2410 = vperm.xlu0 %4149, %v5809_v36   ;;  %2745 = vmatmul.mubr.bf16.gmra.mxu1 %v2498_v16  ;;  %v5817_v30 = vpop.eup %4357  ;;  %v5819_v51 = vadd.f32 %v4356_v53, %v4354_v42  ;;  %v1891_v16 = vsub.f32 %v6639_v10, %v1812_v7  ;;  %v2098_v7 = vadd.f32 %v5688_v29, %v5684_v33 }
 0x305   : > { %6637 = vst [vmem:[#allocation63_spill] sm:$0xff] %v5817_v30  ;;  %2752 = vmatprep.mubr.bf16.mxu1 %v2501_v49  ;;  %4373 = vpow2.f32 %v2019_v6  ;;  %v5821_v48 = vpop.eup %4359  ;;  %v6640_v6 = vld [vmem:[#allocation52_spill] sm:$0xff] }
 0x306   : > { %4375 = vpow2.f32 %v2021_v59  ;;  %v5824_v39 = vpop.eup %4361  ;;  %v2500_v49 = vpack.c.bf16 %v4340_v25, %v5821_v48  ;;  %v1896_v32 = vsub.f32 %v6640_v6, %v1822_v56  ;;  %v2007_v46 = vmul.f32 1.442695, %v1891_v16  ;;  %v6641_v25 = vld [vmem:[#allocation51_spill] sm:$0xff] }
 0x307   : > { %v5826_v26 = vpop.eup %4363  ;;  %4377 = vpow2.f32 %v1999_v17  ;;  %v2503_v59 = vpack.c.bf16 %v4350_v20, %v5824_v39 }
 0x308   : > { %2420 = vperm.xlu0 %4149, %v5817_v30   ;;  %6638 = vst [vmem:[#allocation15_spill] sm:$0xff] %v5826_v26  ;;  %4379 = vpow2.f32 %v2009_v37  ;;  %v2017_v17 = vmul.f32 1.442695, %v1896_v32  ;;  %v1895_v37 = vsub.f32 %v6641_v25, %v1822_v56 }
 0x309   : > { %4381 = vpow2.f32 %v2007_v46 }
 0x30a   : > { %v4366_v40 = vpop.eup %4365  ;;  %4383 = vpow2.f32 %v2017_v17 }
 0x30b   : > { %v4368_v36 = vpop.eup %4367 }
 0x30c   : > { %2430 = vperm.xlu0 %4149, %v5826_v26   ;;  %2753 = vmatmul.mubr.bf16.gmra.mxu1 %v2500_v49  ;;  %v5833_v35 = vadd.f32 %v4368_v36, %v4366_v40  ;;  %v4370_v30 = vpop.eup %4369 }
 0x30d   : > { %2760 = vmatprep.mubr.bf16.mxu1 %v2503_v59  ;;  %v4372_v61 = vpop.eup %4371  ;;  %v2502_v10 = vpack.c.bf16 %v4348_v4, %v4370_v30  ;;  %v2015_v59 = vmul.f32 1.442695, %v1895_v37 }
 0x30e   : > { %v2505_v26 = vpack.c.bf16 %v4356_v53, %v4372_v61 }
 0x30f   : > { %4385 = vpow2.f32 %v2015_v59 }
 0x312   : > { %v4374_v6 = vpop.eup %4373 }
 0x313   : > { %2099 = vadd.xlane.f32.xlu1 %v2098_v7  ;;  %v4376_v20 = vpop.eup %4375 }
 0x314   : > { %2761 = vmatmul.mubr.bf16.gmra.mxu1 %v2502_v10  ;;  %v5838_v49 = vadd.f32 %v4376_v20, %v4374_v6  ;;  %v4378_v16 = vpop.eup %4377 }
 0x315   : > { %2768 = vmatprep.mubr.bf16.mxu1 %v2505_v26  ;;  %v4380_v32 = vpop.eup %4379  ;;  %v2504_v33 = vpack.c.bf16 %v4354_v42, %v4378_v16 }
 0x316   : > { %v2507_v46 = vpack.c.bf16 %v4368_v36, %v4380_v32  ;;  %v4382_v29 = vpop.eup %4381  ;;  %v6645_v36 = vld [vmem:[#allocation56_spill] sm:$0xff] }
 0x317   : > { %2108 = vadd.xlane.f32.xlu1 %v5515_v8  ;;  %v4384_v4 = vpop.eup %4383  ;;  %v2506_v53 = vpack.c.bf16 %v4366_v40, %v4382_v29 }
 0x318   : > { %v2509_v56 = vpack.c.bf16 %v4376_v20, %v4384_v4 }
 0x31b   : > { %2114 = vadd.xlane.f32.xlu1 %v5521_v47  ;;  %v2149_v47 = vadd.f32 %v5798_v43, %v5788_v52  ;;  %v5868_v52 = vpop.permute.xlu0 %2310 }
 0x31c   : > { %2769 = vmatmul.mubr.bf16.gmra.mxu1 %v2504_v33  ;;  %v4386_v26 = vpop.eup %4385 }
 0x31d   : > { %2776 = vmatprep.mubr.bf16.mxu1 %v2507_v46  ;;  %v2508_v8 = vpack.c.bf16 %v4374_v6, %v4386_v26 }
 0x31f   : > { %2120 = vadd.xlane.f32.xlu1 %v5636_v21  ;;  %v2161_v21 = vadd.f32 %v4370_v30, %v5824_v39 }
 0x323   : > { %2126 = vadd.xlane.f32.xlu1 %v5544_v18  ;;  %v2155_v18 = vadd.f32 %v5821_v48, %v5802_v45 }
 0x324   : > { %2777 = vmatmul.mubr.bf16.gmra.mxu1 %v2506_v53 }
 0x325   : > { %2784 = vmatprep.mubr.bf16.mxu1 %v2509_v56  ;;  %v4201_v56 = vld [vmem:[%s6382_s4 + $0x28] sm:$0xff]  }
 0x327   : > { %2132 = vadd.xlane.f32.xlu1 %v5708_v3  ;;  %v2173_v3 = vadd.f32 %v4382_v29, %v4380_v32  ;;  %v4199_v32 = vld [vmem:[%s6382_s4 + $0x38] sm:$0xff]  }
 0x328   : > { %4024 = vmatprep.subr.bf16.mxu1 %v4199_v32 }
 0x329   : > { %4025 = vmatpush3.bf16.msra.mxu1 %v4199_v32 }
 0x32b   : > { %2096 = vadd.xlane.f32.xlu0 %v5678_v24  ;;  %2138 = vadd.xlane.f32.xlu1 %v5768_v31  ;;  %v2167_v24 = vadd.f32 %v4378_v16, %v4372_v61  ;;  %v5859_v31 = vpop.permute.xlu1 %2305 }
 0x32c   : > { %2785 = vmatmul.mubr.bf16.gmra.mxu1 %v2508_v8 }
 0x32f   : > { %2102 = vadd.xlane.f32.xlu0 %v5738_v41  ;;  %2144 = vadd.xlane.f32.xlu1 %v5775_v62  ;;  %v2179_v41 = vadd.f32 %v4386_v26, %v4384_v4  ;;  %v6643_v62 = vld [vmem:[#allocation58_spill] sm:$0xff] }
 0x333   : > { %2105 = vadd.xlane.f32.xlu0 %v5770_v23  ;;  %2150 = vadd.xlane.f32.xlu1 %v2149_v47 }
 0x337   : > { %2111 = vadd.xlane.f32.xlu0 %v5517_v15  ;;  %2156 = vadd.xlane.f32.xlu1 %v2155_v18  ;;  %v1837_v15 = vpop.permute.xlu1 %1836 }
 0x33b   : > { %2117 = vadd.xlane.f32.xlu0 %v5525_v19  ;;  %2162 = vadd.xlane.f32.xlu1 %v2161_v21  ;;  %v6642_v19 = vld [vmem:[#allocation57_spill] sm:$0xff]  ;;  %v5866_v61 = vpop.permute.xlu1 %2315  ;;  %v4202_v21 = vld [vmem:[%s6382_s4 + $0x20] sm:$0xff]  }
 0x33c   : > { %v1901_v23 = vsub.f32 %v6642_v19, %v1837_v15 }
 0x33f   : > { %2123 = vadd.xlane.f32.xlu0 %v5653_v63  ;;  %2168 = vadd.xlane.f32.xlu1 %v2167_v24  ;;  %v1902_v63 = vsub.f32 %v6643_v62, %v1837_v15  ;;  %v5871_v45 = vpop.permute.xlu1 %2325  ;;  %v4203_v24 = vld [vmem:[%s6382_s4 + $0x18] sm:$0xff]   ;;  %v4204_v15 = vld [vmem:[%s6382_s4 + $0x10] sm:$0xff]   ;;  %v2032_v62 = vld [vmem:[#allocation3 + $0x8] sm:$0xff] }
 0x341   : > { %v2029_v43 = vmul.f32 1.442695, %v1902_v63  ;;  %v6658_v63 = vld [vmem:[#allocation75_spill] sm:$0xff] }
 0x343   : > { %2129 = vadd.xlane.f32.xlu0 %v5563_v13  ;;  %2174 = vadd.xlane.f32.xlu1 %v2173_v3  ;;  %v2027_v13 = vmul.f32 1.442695, %v1901_v23  ;;  %v5877_v39 = vpop.permute.xlu1 %2335 }
 0x345   : > { %4387 = vpow2.f32 %v2027_v13  ;;  %v2064_v13 = vmul.f32 %v6658_v63, %v2032_v62  ;;  %v2031_v63 = vld [vmem:[#allocation3] sm:$0xff] }
 0x346   : > { %4389 = vpow2.f32 %v2029_v43 }
 0x347   : > { %2135 = vadd.xlane.f32.xlu0 %v5727_v9  ;;  %2180 = vadd.xlane.f32.xlu1 %v2179_v41 }
 0x34b   : > { %2141 = vadd.xlane.f32.xlu0 %v5749_v34  ;;  %v6644_v34 = vld [vmem:[#allocation55_spill] sm:$0xff] }
 0x34f   : > { %2147 = vadd.xlane.f32.xlu0 %v5772_v38 }
 0x353   : > { %2153 = vadd.xlane.f32.xlu0 %v5786_v5  ;;  %v5880_v5 = vpop.permute.xlu1 %2345 }
 0x356   : > { %v1832_v9 = vpop.permute.xlu0 %1831 }
 0x357   : > { %2159 = vadd.xlane.f32.xlu0 %v5800_v57  ;;  %v1899_v38 = vsub.f32 %v6644_v34, %v1832_v9  ;;  %v1900_v42 = vsub.f32 %v6645_v36, %v1832_v9  ;;  %v4388_v57 = vpop.eup %4387  ;;  %v5884_v7 = vpop.permute.xlu1 %2355  ;;  %v2035_v9 = vld [vmem:[#allocation3 + $0x20] sm:$0xff]  ;;  %v6660_v36 = vld [vmem:[#allocation78_spill] sm:$0xff] }
 0x358   : > { %v4390_v40 = vpop.eup %4389 }
 0x359   : > { %v2023_v30 = vmul.f32 1.442695, %v1899_v38  ;;  %v2025_v48 = vmul.f32 1.442695, %v1900_v42  ;;  %v2188_v25 = vadd.f32 %v4390_v40, %v4388_v57  ;;  %v2067_v42 = vmul.f32 %v6660_v36, %v2035_v9  ;;  %v6664_v36 = vld [vmem:[#allocation74_spill] sm:$0xff] }
 0x35b   : > { %2165 = vadd.xlane.f32.xlu0 %v5807_v2  ;;  %4391 = vpow2.f32 %v2023_v30  ;;  %v5894_v16 = vpop.permute.xlu1 %2365 }
 0x35c   : > { %4393 = vpow2.f32 %v2025_v48 }
 0x35f   : > { %2171 = vadd.xlane.f32.xlu0 %v5819_v51  ;;  %v6646_v51 = vsub.f32 %v5540_v12, %v5552_v50  ;;  %v5901_v50 = vpop.permute.xlu1 %2375 }
 0x360   : > { %6648 = vst [vmem:[#allocation16_spill] sm:$0xff] %v5901_v50 }
 0x361   : > { %v1677_v20 = vmul.f32 1.442695, %v6646_v51 }
 0x363   : > { %2177 = vadd.xlane.f32.xlu0 %v5833_v35  ;;  %v5889_v35 = vpop.permute.xlu0 %2320  ;;  %4395 = vpow2.f32 %v1677_v20  ;;  %v5905_v46 = vpop.permute.xlu1 %2385 }
 0x364   : > { %6649 = vst [vmem:[#allocation64_spill] sm:$0xff] %v5905_v46 }
 0x367   : > { %2183 = vadd.xlane.f32.xlu0 %v5838_v49  ;;  %v6647_v49 = vsub.f32 %v5646_v27, %v5660_v22  ;;  %v5899_v12 = vpop.permute.xlu0 %2330  ;;  %v4200_v27 = vld [vmem:[%s6382_s4 + $0x30] sm:$0xff]   ;;  %v5917_v53 = vpop.permute.xlu1 %2395 }
 0x368   : > { %v4392_v17 = vpop.eup %4391  ;;  %4026 = vmatprep.subr.bf16.mxu1 %v4200_v27  ;;  %6650 = vst [vmem:[#allocation25_spill] sm:$0xff] %v5917_v53 }
 0x369   : > { %v4394_v37 = vpop.eup %4393  ;;  %v2510_v2 = vpack.c.bf16 %v4388_v57, %v4392_v17  ;;  %v1675_v59 = vmul.f32 1.442695, %v6647_v49  ;;  %4027 = vmatpush3.bf16.msra.mxu1 %v4200_v27  ;;  %v2037_v57 = vld [vmem:[#allocation3 + $0x30] sm:$0xff] }
 0x36a   : > { %v2511_v10 = vpack.c.bf16 %v4390_v40, %v4394_v37  ;;  %v2185_v6 = vadd.f32 %v4394_v37, %v4392_v17  ;;  %4028 = vmatprep.subr.bf16.mxu1 %v4201_v56  ;;  %v2069_v17 = vmul.f32 %v5618_v54, %v2037_v57  ;;  %v2039_v37 = vld [vmem:[#allocation3 + $0x40] sm:$0xff] }
 0x36b   : > { %2189 = vadd.xlane.f32.xlu0 %v2188_v25  ;;  %4397 = vpow2.f32 %v1675_v59  ;;  %v5903_v33 = vpop.permute.xlu0 %2340  ;;  %v5925_v8 = vpop.permute.xlu1 %2405  ;;  %v2071_v51 = vmul.f32 %v5631_v0, %v2039_v37  ;;  %v2041_v59 = vld [vmem:[#allocation3 + $0x50] sm:$0xff] }
 0x36c   : > { %2792 = vmatprep.mubr.bf16.mxu1 %v2511_v10  ;;  %2186 = vadd.xlane.f32.xlu1 %v2185_v6  ;;  %6651 = vst [vmem:[#allocation26_spill] sm:$0xff] %v5925_v8  ;;  %v2073_v54 = vmul.f32 %v5648_v44, %v2041_v59 }
 0x36d   : > { %2793 = vmatmul.mubr.bf16.gmra.mxu1 %v2510_v2  ;;  %v5957_v2 = vpop.f32.mrf.mxu1 }
 0x36e   : > { %4029 = vmatpush3.bf16.msra.mxu1 %v4201_v56 }
 0x36f   : > { %v5915_v4 = vpop.permute.xlu0 %2350  ;;  %v5929_v18 = vpop.permute.xlu1 %2415  ;;  %4030 = vmatprep.subr.bf16.mxu1 %v4202_v21 }
 0x370   : > { %v5910_v22 = vpop.eup %4395  ;;  %6653 = vst [vmem:[#allocation24_spill] sm:$0xff] %v5929_v18  ;;  %v5963_v32 = vpop.f32.mrf.mxu1 }
 0x372   : > { %4031 = vmatpush3.bf16.msra.mxu1 %v4202_v21  ;;  %v2043_v21 = vld [vmem:[#allocation3 + $0x60] sm:$0xff] }
 0x373   : > { %v5923_v26 = vpop.permute.xlu0 %2360  ;;  %v5939_v41 = vpop.permute.xlu1 %2425  ;;  %4032 = vmatprep.subr.bf16.mxu1 %v4203_v24  ;;  %v2075_v0 = vmul.f32 %v5668_v55, %v2043_v21  ;;  %v4206_v55 = vld [vmem:[%s6382_s4] sm:$0xff]  }
 0x374   : > { %6655 = vst [vmem:[#allocation18_spill] sm:$0xff] %v5939_v41 }
 0x376   : > { %4033 = vmatpush3.bf16.msra.mxu1 %v4203_v24  ;;  %v5967_v24 = vpop.f32.mrf.mxu1 }
 0x377   : > { %v5927_v47 = vpop.permute.xlu0 %2370  ;;  %4034 = vmatprep.subr.bf16.mxu1 %v4204_v15  ;;  %v5946_v23 = vpop.permute.xlu1 %2435 }
 0x378   : > { %v5913_v29 = vpop.eup %4397  ;;  %6652 = vst [vmem:[#allocation23_spill] sm:$0xff] %v5927_v47  ;;  %6657 = vst [vmem:[#allocation30_spill] sm:$0xff] %v5946_v23  ;;  %v5973_v9 = vpop.f32.mrf.mxu1 }
 0x37a   : > { %4035 = vmatpush3.bf16.msra.mxu1 %v4204_v15 }
 0x37b   : > { %v5937_v3 = vpop.permute.xlu0 %2380 }
 0x37c   : > { %6654 = vst [vmem:[#allocation17_spill] sm:$0xff] %v5937_v3 }
 0x37d   : > { %2445 = vperm.xlu1 %4150, %v5910_v22  }
 0x37f   : > { %v5944_v19 = vpop.permute.xlu0 %2390 }
 0x380   : > { %6656 = vst [vmem:[#allocation29_spill] sm:$0xff] %v5944_v19 }
 0x381   : > { %2440 = vperm.xlu0 %4149, %v5913_v29  }
 0x383   : > { %v5949_v34 = vpop.permute.xlu0 %2400 }
 0x384   : > { %6659 = vst [vmem:[#allocation27_spill] sm:$0xff] %v5949_v34 }
 0x387   : > { %v5953_v40 = vpop.permute.xlu0 %2410 }
 0x388   : > { %6661 = vst [vmem:[#allocation28_spill] sm:$0xff] %v5953_v40 }
 0x38b   : > { %v5961_v20 = vpop.permute.xlu0 %2420 }
 0x38c   : > { %6662 = vst [vmem:[#allocation66_spill] sm:$0xff] %v5961_v20 }
 0x38f   : > { %v5969_v62 = vpop.permute.xlu0 %2430 }
 0x390   : > { %6663 = vst [vmem:[#allocation33_spill] sm:$0xff] %v5969_v62 }
 0x39c   : > { %v2100_v43 = vpop.xlane.xlu1 %2099 }
 0x39d   : > { %v2192_v38 = vadd.f32 %v2100_v43, %v2064_v13  ;;  %v2045_v43 = vld [vmem:[#allocation3 + $0x70] sm:$0xff] }
 0x39e   : > { %v2077_v57 = vmul.f32 %v5692_v28, %v2045_v43 }
 0x39f   : > { %2225 = vst.msk [vmem:[#allocation3 + $0x8] sm:$0xff] %vm877_vm0, %v2192_v38 }
 0x3a0   : > { %v2109_v30 = vpop.xlane.xlu1 %2108 }
 0x3a1   : > { %v2195_v48 = vadd.f32 %v2109_v30, %v2067_v42  ;;  %v2063_v42 = vmul.f32 %v6664_v36, %v2031_v63  ;;  %v2033_v30 = vld [vmem:[#allocation3 + $0x10] sm:$0xff]  ;;  %v2036_v36 = vld [vmem:[#allocation3 + $0x28] sm:$0xff] }
 0x3a3   : > { %2228 = vst.msk [vmem:[#allocation3 + $0x20] sm:$0xff] %vm877_vm0, %v2195_v48 }
 0x3a4   : > { %v2115_v25 = vpop.xlane.xlu1 %2114 }
 0x3a5   : > { %v2197_v6 = vadd.f32 %v2115_v25, %v2069_v17  ;;  %v4205_v25 = vld [vmem:[%s6382_s4 + $0x8] sm:$0xff]  }
 0x3a6   : > { %v2933_v10 = vld [vmem:[#allocation3 + $0x8] sm:$0xff]  ;;  %4036 = vmatprep.subr.bf16.mxu1 %v4205_v25 }
 0x3a7   : > { %4399 = vrcp.f32 %v2933_v10  ;;  %2230 = vst.msk [vmem:[#allocation3 + $0x30] sm:$0xff] %vm877_vm0, %v2197_v6  ;;  %v2047_v10 = vld [vmem:[#allocation3 + $0x80] sm:$0xff]  ;;  %v5984_v6 = vpop.f32.mrf.mxu1  ;;  %4037 = vmatpush3.bf16.msra.mxu1 %v4205_v25  ;;  %v2068_v25 = vmul.f32 %v5568_v14, %v2036_v36 }
 0x3a8   : > { %v2121_v49 = vpop.xlane.xlu1 %2120  ;;  %4038 = vmatprep.subr.bf16.mxu1 %v4206_v55  ;;  %v2055_v36 = vld [vmem:[#allocation3 + $0xc0] sm:$0xff] }
 0x3a9   : > { %v2199_v27 = vadd.f32 %v2121_v49, %v2071_v51  ;;  %v6665_v49 = vld [vmem:[#allocation76_spill] sm:$0xff]  ;;  %v5990_v63 = vpop.f32.mrf.mxu1 }
 0x3aa   : > { %v2065_v59 = vmul.f32 %v6665_v49, %v2033_v30 }
 0x3ab   : > { %2232 = vst.msk [vmem:[#allocation3 + $0x40] sm:$0xff] %vm877_vm0, %v2199_v27  ;;  %v2034_v27 = vld [vmem:[#allocation3 + $0x18] sm:$0xff]  ;;  %4039 = vmatpush3.bf16.msra.mxu1 %v4206_v55 }
 0x3ac   : > { %v2127_v56 = vpop.xlane.xlu1 %2126 }
 0x3ad   : > { %v2201_v15 = vadd.f32 %v2127_v56, %v2073_v54  ;;  %v2079_v54 = vmul.f32 %v5704_v60, %v2047_v10  ;;  %v2038_v10 = vld [vmem:[#allocation3 + $0x38] sm:$0xff] }
 0x3af   : > { %2234 = vst.msk [vmem:[#allocation3 + $0x50] sm:$0xff] %vm877_vm0, %v2201_v15  ;;  %v2049_v15 = vld [vmem:[#allocation3 + $0x90] sm:$0xff] }
 0x3b0   : > { %v2133_v13 = vpop.xlane.xlu1 %2132 }
 0x3b1   : > { %v2203_v38 = vadd.f32 %v2133_v13, %v2075_v0  ;;  %v6666_v13 = vld [vmem:[#allocation77_spill] sm:$0xff] }
 0x3b2   : > { %v2066_v43 = vmul.f32 %v6666_v13, %v2034_v27  ;;  %v2936_v27 = vld [vmem:[#allocation3 + $0x20] sm:$0xff] }
 0x3b3   : > { %2236 = vst.msk [vmem:[#allocation3 + $0x60] sm:$0xff] %vm877_vm0, %v2203_v38 }
 0x3b4   : > { %v2097_v44 = vpop.xlane.xlu0 %2096  ;;  %v4400_v48 = vpop.eup %4399 }
 0x3b5   : > { %v2191_v17 = vadd.f32 %v2097_v44, %v2063_v42  ;;  %v2139_v37 = vpop.xlane.xlu1 %2138  ;;  %3003 = vperm.xlu1 %4150, %v4400_v48   ;;  %v2081_v42 = vmul.f32 %v5719_v58, %v2049_v15  ;;  %v2051_v48 = vld [vmem:[#allocation3 + $0xa0] sm:$0xff] }
 0x3b6   : > { %v2205_v51 = vadd.f32 %v2139_v37, %v2077_v57  ;;  %v5996_v57 = vpop.f32.mrf.mxu1  ;;  %v2083_v55 = vmul.f32 %v5733_v1, %v2051_v48  ;;  %v6667_v1 = vld [vmem:[#allocation62_spill] sm:$0xff] }
 0x3b7   : > { %2224 = vst.msk [vmem:[#allocation3] sm:$0xff] %vm877_vm0, %v2191_v17  ;;  %v2042_v48 = vld [vmem:[#allocation3 + $0x58] sm:$0xff] }
 0x3b8   : > { %v2103_v28 = vpop.xlane.xlu0 %2102  ;;  %2238 = vst.msk [vmem:[#allocation3 + $0x70] sm:$0xff] %vm877_vm0, %v2205_v51 }
 0x3b9   : > { %v2193_v56 = vadd.f32 %v2103_v28, %v2065_v59  ;;  %v2145_v21 = vpop.xlane.xlu1 %2144  ;;  %v2053_v59 = vld [vmem:[#allocation3 + $0xb0] sm:$0xff]  ;;  %v6002_v28 = vpop.f32.mrf.mxu1 }
 0x3ba   : > { %v2207_v0 = vadd.f32 %v2145_v21, %v2079_v54  ;;  %v2040_v21 = vld [vmem:[#allocation3 + $0x48] sm:$0xff] }
 0x3bb   : > { %2226 = vst.msk [vmem:[#allocation3 + $0x10] sm:$0xff] %vm877_vm0, %v2193_v56  ;;  %v2070_v56 = vmul.f32 %v5579_v11, %v2038_v10  ;;  %v6006_v15 = vpop.f32.mrf.mxu1 }
 0x3bc   : > { %v2106_v38 = vpop.xlane.xlu0 %2105  ;;  %2240 = vst.msk [vmem:[#allocation3 + $0x80] sm:$0xff] %vm877_vm0, %v2207_v0  ;;  %v2085_v0 = vmul.f32 %v6667_v1, %v2053_v59 }
 0x3bd   : > { %v2194_v44 = vadd.f32 %v2106_v38, %v2066_v43  ;;  %v2151_v30 = vpop.xlane.xlu1 %2150 }
 0x3be   : > { %v2932_v60 = vld [vmem:[#allocation3] sm:$0xff]  ;;  %v2209_v17 = vadd.f32 %v2151_v30, %v2081_v42  ;;  %v2938_v42 = vld [vmem:[#allocation3 + $0x30] sm:$0xff] }
 0x3bf   : > { %4401 = vrcp.f32 %v2932_v60  ;;  %2227 = vst.msk [vmem:[#allocation3 + $0x18] sm:$0xff] %vm877_vm0, %v2194_v44  ;;  %v6668_v60 = vld [vmem:[#allocation79_spill] sm:$0xff] }
 0x3c0   : > { %v2112_v37 = vpop.xlane.xlu0 %2111  ;;  %2242 = vst.msk [vmem:[#allocation3 + $0x90] sm:$0xff] %vm877_vm0, %v2209_v17  ;;  %v2072_v11 = vmul.f32 %v6668_v60, %v2040_v21  ;;  %v6012_v17 = vpop.f32.mrf.mxu1  ;;  %v2044_v21 = vld [vmem:[#allocation3 + $0x68] sm:$0xff] }
 0x3c1   : > { %v2196_v51 = vadd.f32 %v2112_v37, %v2068_v25  ;;  %v2157_v49 = vpop.xlane.xlu1 %2156  ;;  %v6669_v25 = vld [vmem:[#allocation22_spill] sm:$0xff] }
 0x3c2   : > { %v2934_v58 = vld [vmem:[#allocation3 + $0x10] sm:$0xff]  ;;  %v2211_v54 = vadd.f32 %v2157_v49, %v2083_v55  ;;  %v2087_v37 = vmul.f32 %v6669_v25, %v2055_v36  ;;  %v2940_v49 = vld [vmem:[#allocation3 + $0x40] sm:$0xff]  ;;  %v6018_v1 = vpop.f32.mrf.mxu1 }
 0x3c3   : > { %4403 = vrcp.f32 %v2934_v58  ;;  %2229 = vst.msk [vmem:[#allocation3 + $0x28] sm:$0xff] %vm877_vm0, %v2196_v51  ;;  %v2057_v58 = vld [vmem:[#allocation3 + $0xd0] sm:$0xff] }
 0x3c4   : > { %v2118_v14 = vpop.xlane.xlu0 %2117  ;;  %2244 = vst.msk [vmem:[#allocation3 + $0xa0] sm:$0xff] %vm877_vm0, %v2211_v54  ;;  %4405 = vrcp.f32 %v2936_v27  ;;  %v6670_v27 = vld [vmem:[#allocation11_spill] sm:$0xff] }
 0x3c5   : > { %v2198_v13 = vadd.f32 %v2118_v14, %v2070_v56  ;;  %v2163_v38 = vpop.xlane.xlu1 %2162  ;;  %v2074_v54 = vmul.f32 %v6670_v27, %v2042_v48 }
 0x3c6   : > { %v2935_v43 = vld [vmem:[#allocation3 + $0x18] sm:$0xff]  ;;  %v2213_v44 = vadd.f32 %v2163_v38, %v2085_v0  ;;  %v6671_v0 = vld [vmem:[#allocation63_spill] sm:$0xff] }
 0x3c7   : > { %4407 = vrcp.f32 %v2935_v43  ;;  %2231 = vst.msk [vmem:[#allocation3 + $0x38] sm:$0xff] %vm877_vm0, %v2198_v13  ;;  %v2089_v13 = vmul.f32 %v6671_v0, %v2057_v58 }
 0x3c8   : > { %v2124_v30 = vpop.xlane.xlu0 %2123  ;;  %2246 = vst.msk [vmem:[#allocation3 + $0xb0] sm:$0xff] %vm877_vm0, %v2213_v44  ;;  %4409 = vrcp.f32 %v2938_v42  ;;  %v2059_v42 = vld [vmem:[#allocation3 + $0xe0] sm:$0xff]  ;;  %v2942_v44 = vld [vmem:[#allocation3 + $0x50] sm:$0xff] }
 0x3c9   : > { %v2200_v10 = vadd.f32 %v2124_v30, %v2072_v11  ;;  %v2169_v51 = vpop.xlane.xlu1 %2168  ;;  %v6672_v11 = vld [vmem:[#allocation12_spill] sm:$0xff] }
 0x3ca   : > { %v2937_v55 = vld [vmem:[#allocation3 + $0x28] sm:$0xff]  ;;  %v2215_v59 = vadd.f32 %v2169_v51, %v2087_v37  ;;  %v2076_v30 = vmul.f32 %v6672_v11, %v2044_v21  ;;  %v2046_v37 = vld [vmem:[#allocation3 + $0x78] sm:$0xff] }
 0x3cb   : > { %4411 = vrcp.f32 %v2937_v55  ;;  %2233 = vst.msk [vmem:[#allocation3 + $0x48] sm:$0xff] %vm877_vm0, %v2200_v10  ;;  %v6024_v10 = vpop.f32.mrf.mxu1  ;;  %v6673_v55 = vld [vmem:[#allocation15_spill] sm:$0xff]  ;;  %v6675_v11 = vld [vmem:[#allocation60_spill] sm:$0xff] }
 0x3cc   : > { %v4402_v56 = vpop.eup %4401  ;;  %v2130_v14 = vpop.xlane.xlu0 %2129  ;;  %2248 = vst.msk [vmem:[#allocation3 + $0xc0] sm:$0xff] %vm877_vm0, %v2215_v59  ;;  %4413 = vrcp.f32 %v2940_v49  ;;  %v2091_v51 = vmul.f32 %v6673_v55, %v2059_v42 }
 0x3cd   : > { %v2202_v43 = vadd.f32 %v2130_v14, %v2074_v54  ;;  %2998 = vperm.xlu0 %4149, %v4402_v56   ;;  %v2175_v36 = vpop.xlane.xlu1 %2174  ;;  %v2944_v54 = vld [vmem:[#allocation3 + $0x60] sm:$0xff] }
 0x3ce   : > { %v2939_v38 = vld [vmem:[#allocation3 + $0x38] sm:$0xff]  ;;  %v2217_v60 = vadd.f32 %v2175_v36, %v2089_v13  ;;  %v6674_v14 = vld [vmem:[#allocation59_spill] sm:$0xff] }
 0x3cf   : > { %4415 = vrcp.f32 %v2939_v38  ;;  %2235 = vst.msk [vmem:[#allocation3 + $0x58] sm:$0xff] %vm877_vm0, %v2202_v43  ;;  %v2078_v21 = vmul.f32 %v6674_v14, %v2046_v37  ;;  %v2048_v43 = vld [vmem:[#allocation3 + $0x88] sm:$0xff]  ;;  %v6030_v38 = vpop.f32.mrf.mxu1  ;;  %v2050_v37 = vld [vmem:[#allocation3 + $0x98] sm:$0xff] }
 0x3d0   : > { %v4404_v48 = vpop.eup %4403  ;;  %v2136_v25 = vpop.xlane.xlu0 %2135  ;;  %2250 = vst.msk [vmem:[#allocation3 + $0xd0] sm:$0xff] %vm877_vm0, %v2217_v60  ;;  %4417 = vrcp.f32 %v2942_v44  ;;  %v2946_v60 = vld [vmem:[#allocation3 + $0x70] sm:$0xff] }
 0x3d1   : > { %v2204_v58 = vadd.f32 %v2136_v25, %v2076_v30  ;;  %3008 = vperm.xlu0 %4149, %v4404_v48   ;;  %v2181_v59 = vpop.xlane.xlu1 %2180  ;;  %v4406_v27 = vpop.eup %4405  ;;  %v2080_v30 = vmul.f32 %v6675_v11, %v2048_v43 }
 0x3d2   : > { %v2941_v49 = vld [vmem:[#allocation3 + $0x48] sm:$0xff]  ;;  %v2219_v56 = vadd.f32 %v2181_v59, %v2091_v51  ;;  %v6035_v55 = vpop.f32.mrf.mxu1  ;;  %v2948_v59 = vld [vmem:[#allocation3 + $0x80] sm:$0xff] }
 0x3d3   : > { %4419 = vrcp.f32 %v2941_v49  ;;  %2237 = vst.msk [vmem:[#allocation3 + $0x68] sm:$0xff] %vm877_vm0, %v2204_v58 }
 0x3d4   : > { %v4408_v0 = vpop.eup %4407  ;;  %v2142_v13 = vpop.xlane.xlu0 %2141  ;;  %2252 = vst.msk [vmem:[#allocation3 + $0xe0] sm:$0xff] %vm877_vm0, %v2219_v56  ;;  %4421 = vrcp.f32 %v2944_v54 }
 0x3d5   : > { %v2206_v36 = vadd.f32 %v2142_v13, %v2078_v21  ;;  %3018 = vperm.xlu0 %4149, %v4406_v27   ;;  %3013 = vperm.xlu1 %4150, %v4408_v0   ;;  %v4410_v44 = vpop.eup %4409  ;;  %v6676_v27 = vld [vmem:[#allocation65_spill] sm:$0xff]  ;;  %v2052_v21 = vld [vmem:[#allocation3 + $0xa8] sm:$0xff]  ;;  %v6039_v0 = vpop.f32.mrf.mxu1 }
 0x3d6   : > { %v2943_v42 = vld [vmem:[#allocation3 + $0x58] sm:$0xff]  ;;  %v2082_v54 = vmul.f32 %v6676_v27, %v2050_v37 }
 0x3d7   : > { %4423 = vrcp.f32 %v2943_v42  ;;  %2239 = vst.msk [vmem:[#allocation3 + $0x78] sm:$0xff] %vm877_vm0, %v2206_v36  ;;  %v2950_v42 = vld [vmem:[#allocation3 + $0x90] sm:$0xff] }
 0x3d8   : > { %v4412_v48 = vpop.eup %4411  ;;  %v2148_v25 = vpop.xlane.xlu0 %2147  ;;  %4425 = vrcp.f32 %v2946_v60 }
 0x3d9   : > { %v2208_v51 = vadd.f32 %v2148_v25, %v2080_v30  ;;  %3028 = vperm.xlu0 %4149, %v4410_v44   ;;  %3023 = vperm.xlu1 %4150, %v4412_v48   ;;  %v4414_v49 = vpop.eup %4413  ;;  %v6677_v44 = vld [vmem:[#allocation13_spill] sm:$0xff]  ;;  %v2054_v48 = vld [vmem:[#allocation3 + $0xb8] sm:$0xff]  ;;  %v6043_v25 = vpop.f32.mrf.mxu1 }
 0x3da   : > { %v2945_v58 = vld [vmem:[#allocation3 + $0x68] sm:$0xff]  ;;  %v2084_v60 = vmul.f32 %v6677_v44, %v2052_v21  ;;  %v6679_v44 = vld [vmem:[#allocation61_spill] sm:$0xff] }
 0x3db   : > { %4427 = vrcp.f32 %v2945_v58  ;;  %2241 = vst.msk [vmem:[#allocation3 + $0x88] sm:$0xff] %vm877_vm0, %v2208_v51  ;;  %v6047_v21 = vpop.f32.mrf.mxu1 }
 0x3dc   : > { %v4416_v56 = vpop.eup %4415  ;;  %v2154_v14 = vpop.xlane.xlu0 %2153  ;;  %4429 = vrcp.f32 %v2948_v59  ;;  %v6678_v59 = vld [vmem:[#allocation14_spill] sm:$0xff] }
 0x3dd   : > { %v2210_v13 = vadd.f32 %v2154_v14, %v2082_v54  ;;  %3038 = vperm.xlu0 %4149, %v4414_v49   ;;  %3033 = vperm.xlu1 %4150, %v4416_v56   ;;  %v4418_v36 = vpop.eup %4417  ;;  %v2952_v49 = vld [vmem:[#allocation3 + $0xa0] sm:$0xff]  ;;  %v2086_v27 = vmul.f32 %v6678_v59, %v2054_v48  ;;  %v2056_v14 = vld [vmem:[#allocation3 + $0xc8] sm:$0xff]  ;;  %v2058_v48 = vld [vmem:[#allocation3 + $0xd8] sm:$0xff] }
 0x3de   : > { %v2947_v43 = vld [vmem:[#allocation3 + $0x78] sm:$0xff] }
 0x3df   : > { %4431 = vrcp.f32 %v2947_v43  ;;  %2243 = vst.msk [vmem:[#allocation3 + $0x98] sm:$0xff] %vm877_vm0, %v2210_v13 }
 0x3e0   : > { %v4420_v11 = vpop.eup %4419  ;;  %v2160_v30 = vpop.xlane.xlu0 %2159  ;;  %4433 = vrcp.f32 %v2950_v42  ;;  %v2954_v42 = vld [vmem:[#allocation3 + $0xb0] sm:$0xff] }
 0x3e1   : > { %v2212_v37 = vadd.f32 %v2160_v30, %v2084_v60  ;;  %3048 = vperm.xlu0 %4149, %v4418_v36   ;;  %3043 = vperm.xlu1 %4150, %v4420_v11   ;;  %v4422_v58 = vpop.eup %4421  ;;  %v2088_v60 = vmul.f32 %v6679_v44, %v2056_v14  ;;  %v2060_v14 = vld [vmem:[#allocation3 + $0xe8] sm:$0xff] }
 0x3e2   : > { %v2949_v51 = vld [vmem:[#allocation3 + $0x88] sm:$0xff] }
 0x3e3   : > { %4435 = vrcp.f32 %v2949_v51  ;;  %2245 = vst.msk [vmem:[#allocation3 + $0xa8] sm:$0xff] %vm877_vm0, %v2212_v37  ;;  %v6051_v37 = vpop.f32.mrf.mxu1 }
 0x3e4   : > { %v4424_v54 = vpop.eup %4423  ;;  %v2166_v56 = vpop.xlane.xlu0 %2165  ;;  %4437 = vrcp.f32 %v2952_v49  ;;  %v2956_v49 = vld [vmem:[#allocation3 + $0xc0] sm:$0xff] }
 0x3e5   : > { %v2214_v13 = vadd.f32 %v2166_v56, %v2086_v27  ;;  %3058 = vperm.xlu0 %4149, %v4422_v58   ;;  %3053 = vperm.xlu1 %4150, %v4424_v54   ;;  %v4426_v36 = vpop.eup %4425  ;;  %v6680_v27 = vld [vmem:[#allocation67_spill] sm:$0xff] }
 0x3e6   : > { %v2951_v43 = vld [vmem:[#allocation3 + $0x98] sm:$0xff]  ;;  %v2090_v54 = vmul.f32 %v6680_v27, %v2058_v48 }
 0x3e7   : > { %4439 = vrcp.f32 %v2951_v43  ;;  %2247 = vst.msk [vmem:[#allocation3 + $0xb8] sm:$0xff] %vm877_vm0, %v2214_v13  ;;  %v6055_v43 = vpop.f32.mrf.mxu1  ;;  %v2062_v48 = vld [vmem:[#allocation3 + $0xf8] sm:$0xff] }
 0x3e8   : > { %v4428_v11 = vpop.eup %4427  ;;  %v2172_v30 = vpop.xlane.xlu0 %2171  ;;  %4441 = vrcp.f32 %v2954_v42  ;;  %v2958_v42 = vld [vmem:[#allocation3 + $0xd0] sm:$0xff] }
 0x3e9   : > { %v2216_v51 = vadd.f32 %v2172_v30, %v2088_v60  ;;  %3068 = vperm.xlu0 %4149, %v4426_v36   ;;  %3063 = vperm.xlu1 %4150, %v4428_v11   ;;  %v4430_v59 = vpop.eup %4429  ;;  %v6681_v11 = vld [vmem:[#allocation19_spill] sm:$0xff]  ;;  %v6059_v27 = vpop.f32.mrf.mxu1 }
 0x3ea   : > { %v2953_v58 = vld [vmem:[#allocation3 + $0xa8] sm:$0xff]  ;;  %v2092_v30 = vmul.f32 %v6681_v11, %v2060_v14 }
 0x3eb   : > { %4443 = vrcp.f32 %v2953_v58  ;;  %2249 = vst.msk [vmem:[#allocation3 + $0xc8] sm:$0xff] %vm877_vm0, %v2216_v51 }
 0x3ec   : > { %v4432_v56 = vpop.eup %4431  ;;  %v2178_v13 = vpop.xlane.xlu0 %2177  ;;  %4445 = vrcp.f32 %v2956_v49 }
 0x3ed   : > { %v2218_v44 = vadd.f32 %v2178_v13, %v2090_v54  ;;  %3078 = vperm.xlu0 %4149, %v4430_v59   ;;  %3073 = vperm.xlu1 %4150, %v4432_v56   ;;  %v4434_v60 = vpop.eup %4433  ;;  %v2061_v54 = vld [vmem:[#allocation3 + $0xf0] sm:$0xff]  ;;  %v2960_v56 = vld [vmem:[#allocation3 + $0xe0] sm:$0xff]  ;;  %v2094_v13 = vmul.f32 %v5910_v22, %v2062_v48 }
 0x3ee   : > { %v2955_v36 = vld [vmem:[#allocation3 + $0xb8] sm:$0xff]  ;;  %v2093_v23 = vmul.f32 %v5913_v29, %v2061_v54 }
 0x3ef   : > { %4447 = vrcp.f32 %v2955_v36  ;;  %2251 = vst.msk [vmem:[#allocation3 + $0xd8] sm:$0xff] %vm877_vm0, %v2218_v44  ;;  %v6063_v36 = vpop.f32.mrf.mxu1 }
 0x3f0   : > { %v4436_v51 = vpop.eup %4435  ;;  %v2184_v58 = vpop.xlane.xlu0 %2183  ;;  %4449 = vrcp.f32 %v2958_v42 }
 0x3f1   : > { %v2220_v62 = vadd.f32 %v2184_v58, %v2092_v30  ;;  %3088 = vperm.xlu0 %4149, %v4434_v60   ;;  %3083 = vperm.xlu1 %4150, %v4436_v51   ;;  %v4438_v49 = vpop.eup %4437  ;;  %v6067_v58 = vpop.f32.mrf.mxu1 }
 0x3f2   : > { %v2957_v59 = vld [vmem:[#allocation3 + $0xc8] sm:$0xff] }
 0x3f3   : > { %4451 = vrcp.f32 %v2957_v59  ;;  %2253 = vst.msk [vmem:[#allocation3 + $0xe8] sm:$0xff] %vm877_vm0, %v2220_v62  ;;  %v6070_v59 = vpop.f32.mrf.mxu1 }
 0x3f4   : > { %v4440_v44 = vpop.eup %4439  ;;  %v2190_v14 = vpop.xlane.xlu0 %2189  ;;  %4453 = vrcp.f32 %v2960_v56 }
 0x3f5   : > { %v2222_v11 = vadd.f32 %v2190_v14, %v2094_v13  ;;  %3098 = vperm.xlu0 %4149, %v4438_v49   ;;  %3093 = vperm.xlu1 %4150, %v4440_v44   ;;  %v2187_v42 = vpop.xlane.xlu1 %2186  ;;  %v4442_v30 = vpop.eup %4441 }
 0x3f6   : > { %v2959_v60 = vld [vmem:[#allocation3 + $0xd8] sm:$0xff]  ;;  %v2221_v51 = vadd.f32 %v2187_v42, %v2093_v23  ;;  %v6072_v13 = vpop.f32.mrf.mxu1 }
 0x3f7   : > { %4455 = vrcp.f32 %v2959_v60  ;;  %2255 = vst.msk [vmem:[#allocation3 + $0xf8] sm:$0xff] %vm877_vm0, %v2222_v11 }
 0x3f8   : > { %v4444_v62 = vpop.eup %4443  ;;  %2254 = vst.msk [vmem:[#allocation3 + $0xf0] sm:$0xff] %vm877_vm0, %v2221_v51  ;;  %v6074_v11 = vpop.f32.mrf.mxu1 }
 0x3f9   : > { %3108 = vperm.xlu0 %4149, %v4442_v30   ;;  %3103 = vperm.xlu1 %4150, %v4444_v62   ;;  %v4446_v48 = vpop.eup %4445  ;;  %v6106_v53 = vpop.permute.xlu1 %2445 }
 0x3fa   : > { %v2961_v22 = vld [vmem:[#allocation3 + $0xe8] sm:$0xff]  ;;  %v6076_v42 = vpop.f32.mrf.mxu1  ;;  %6695 = vst [vmem:[#allocation70_spill] sm:$0xff] %v6106_v53 }
 0x3fb   : > { %4457 = vrcp.f32 %v2961_v22 }
 0x3fc   : > { %v4448_v29 = vpop.eup %4447  ;;  %v6078_v51 = vpop.f32.mrf.mxu1 }
 0x3fd   : > { %3118 = vperm.xlu0 %4149, %v4446_v48   ;;  %3113 = vperm.xlu1 %4150, %v4448_v29   ;;  %v4450_v49 = vpop.eup %4449  ;;  %v6108_v46 = vpop.permute.xlu0 %2440 }
 0x3fe   : > { %v2963_v54 = vld [vmem:[#allocation3 + $0xf8] sm:$0xff]  ;;  %v6080_v22 = vpop.f32.mrf.mxu1  ;;  %6696 = vst [vmem:[#allocation71_spill] sm:$0xff] %v6108_v46  ;;  %v6699_v46 = vld [vmem:[#allocation21_spill] sm:$0xff] }
 0x3ff   : > { %4459 = vrcp.f32 %v2963_v54  ;;  %v2962_v23 = vld [vmem:[#allocation3 + $0xf0] sm:$0xff]  ;;  %6682 = vst [vmem:[#allocation34_spill] sm:$0xff] %v6080_v22  ;;  %v2450_v22 = vmul.f32 0.0, %v6699_v46 }
 0x400   : > { %v4452_v56 = vpop.eup %4451  ;;  %4461 = vrcp.f32 %v2962_v23  ;;  %v6082_v48 = vpop.f32.mrf.mxu1 }
 0x401   : > { %3128 = vperm.xlu0 %4149, %v4450_v49   ;;  %3123 = vperm.xlu1 %4150, %v4452_v56   ;;  %v4454_v44 = vpop.eup %4453  ;;  %6683 = vst [vmem:[#allocation31_spill] sm:$0xff] %v6082_v48 }
 0x402   : > { %v6084_v29 = vpop.f32.mrf.mxu1 }
 0x403   : > { %6684 = vst [vmem:[#allocation32_spill] sm:$0xff] %v6084_v29 }
 0x404   : > { %v4456_v14 = vpop.eup %4455  ;;  %v6086_v54 = vpop.f32.mrf.mxu1 }
 0x405   : > { %3138 = vperm.xlu0 %4149, %v4454_v44   ;;  %3133 = vperm.xlu1 %4150, %v4456_v14   ;;  %6685 = vst [vmem:[#allocation37_spill] sm:$0xff] %v6086_v54  ;;  %v3904_v14 = vpop.f32.mrf.mxu0 }
 0x406   : > { %v6088_v49 = vpop.f32.mrf.mxu1 }
 0x407   : > { %6686 = vst [vmem:[#allocation38_spill] sm:$0xff] %v6088_v49 }
 0x408   : > { %v4458_v60 = vpop.eup %4457  ;;  %v6090_v56 = vpop.f32.mrf.mxu1 }
 0x409   : > { %3143 = vperm.xlu1 %4150, %v4458_v60   ;;  %6687 = vst [vmem:[#allocation36_spill] sm:$0xff] %v6090_v56 }
 0x40a   : > { %v6092_v23 = vpop.f32.mrf.mxu1 }
 0x40b   : > { %6688 = vst [vmem:[#allocation41_spill] sm:$0xff] %v6092_v23 }
 0x40c   : > { %v4460_v30 = vpop.eup %4459  ;;  %v6094_v44 = vpop.f32.mrf.mxu1 }
 0x40d   : > { %3153 = vperm.xlu1 %4150, %v4460_v30   ;;  %v4462_v62 = vpop.eup %4461  ;;  %6689 = vst [vmem:[#allocation42_spill] sm:$0xff] %v6094_v44  ;;  %v3905_v30 = vpop.f32.mrf.mxu0 }
 0x40e   : > { %3148 = vperm.xlu0 %4149, %v4462_v62   ;;  %v6096_v60 = vpop.f32.mrf.mxu1  ;;  %v3906_v23 = vadd.f32 %v3905_v30, %v3904_v14 }
 0x40f   : > { %6690 = vst [vmem:[#allocation68_spill] sm:$0xff] %v6096_v60  ;;  %v3907_v41 = vpop.f32.mrf.mxu0  ;;  %v6697_v60 = vld [vmem:[#allocation20_spill] sm:$0xff] }
 0x410   : > { %v6098_v62 = vpop.f32.mrf.mxu1  ;;  %v2448_v3 = vmul.f32 0.0, %v6697_v60  ;;  %v2451_v60 = vmul.f32 0.0, %v5859_v31 }
 0x411   : > { %6691 = vst [vmem:[#allocation45_spill] sm:$0xff] %v6098_v62  ;;  %v3908_v40 = vpop.f32.mrf.mxu0  ;;  %v6698_v62 = vld [vmem:[#allocation69_spill] sm:$0xff] }
 0x412   : > { %v6100_v20 = vpop.f32.mrf.mxu1  ;;  %v3909_v44 = vadd.f32 %v3908_v40, %v3907_v41  ;;  %v2449_v49 = vmul.f32 0.0, %v6698_v62  ;;  %v2801_v48 = vadd.f32 %v3906_v23, %v2448_v3  ;;  %v3918_v3 = vadd.f32 %v5963_v32, %v5957_v2 }
 0x413   : > { %6692 = vst [vmem:[#allocation46_spill] sm:$0xff] %v6100_v20  ;;  %v3910_v18 = vpop.f32.mrf.mxu0  ;;  %v3927_v2 = vadd.f32 %v6002_v28, %v5996_v57 }
 0x414   : > { %v6102_v8 = vpop.f32.mrf.mxu1  ;;  %v2802_v29 = vadd.f32 %v3909_v44, %v2449_v49  ;;  %v3921_v49 = vadd.f32 %v5973_v9, %v5967_v24 }
 0x415   : > { %6693 = vst [vmem:[#allocation35_spill] sm:$0xff] %v6102_v8  ;;  %v3911_v34 = vpop.f32.mrf.mxu0 }
 0x416   : > { %v6104_v19 = vpop.f32.mrf.mxu1  ;;  %v3912_v14 = vadd.f32 %v3911_v34, %v3910_v18  ;;  %v3924_v34 = vadd.f32 %v5990_v63, %v5984_v6  ;;  %v3930_v6 = vadd.f32 %v6012_v17, %v6006_v15  ;;  %v3933_v63 = vadd.f32 %v6024_v10, %v6018_v1 }
 0x417   : > { %6694 = vst [vmem:[#allocation40_spill] sm:$0xff] %v6104_v19  ;;  %v3913_v56 = vpop.f32.mrf.mxu0  ;;  %v3939_v15 = vadd.f32 %v6043_v25, %v6039_v0 }
 0x418   : > { %v6112_v54 = vpop.f32.mrf.mxu1  ;;  %v2803_v23 = vadd.f32 %v3912_v14, %v2450_v22  ;;  %v2454_v22 = vmul.f32 0.0, %v5889_v35 }
 0x419   : > { %v3914_v8 = vpop.f32.mrf.mxu0 }
 0x41a   : > { %v6114_v50 = vpop.f32.mrf.mxu1  ;;  %v3915_v41 = vadd.f32 %v3914_v8, %v3913_v56  ;;  %v2453_v8 = vmul.f32 0.0, %v5866_v61  ;;  %v2807_v14 = vadd.f32 %v3924_v34, %v2454_v22 }
 0x41c   : > { %v6118_v62 = vpop.f32.mrf.mxu1  ;;  %v2806_v9 = vadd.f32 %v3921_v49, %v2453_v8  ;;  %v3936_v49 = vadd.f32 %v6035_v55, %v6030_v38  ;;  %v3942_v38 = vadd.f32 %v6051_v37, %v6047_v21  ;;  %v3945_v55 = vadd.f32 %v6059_v27, %v6055_v43 }
 0x41d   : > { %v3951_v21 = vadd.f32 %v6072_v13, %v6070_v59 }
 0x41e   : > { %v6126_v46 = vpop.f32.mrf.mxu1 }
 0x420   : > { %v6134_v61 = vpop.f32.mrf.mxu1 }
 0x430   : > { %v3004_v20 = vpop.permute.xlu1 %3003 }
 0x431   : > { %v3157_v19 = vmul.f32 %v3004_v20, %v2802_v29  ;;  %v2804_v20 = vadd.f32 %v3915_v41, %v2451_v60 }
 0x448   : > { %v2999_v47 = vpop.permute.xlu0 %2998 }
 0x449   : > { %v3156_v53 = vmul.f32 %v2999_v47, %v2801_v48 }
 0x44b   : > { %v3188_v40 = vpack.c.bf16 %v3157_v19, %v3156_v53  ;;  %v2452_v53 = vmul.f32 0.0, %v5868_v52  ;;  %v2455_v52 = vmul.f32 0.0, %v5871_v45  ;;  %v2456_v45 = vmul.f32 0.0, %v5899_v12 }
 0x44c   : > { %v3009_v30 = vpop.permute.xlu0 %3008  ;;  %v2459_v12 = vmul.f32 0.0, %v5880_v5  ;;  %v2460_v5 = vmul.f32 0.0, %v5915_v4  ;;  %v2463_v4 = vmul.f32 0.0, %v5894_v16 }
 0x44d   : > { %4040 = vmatprep.mubr.bf16.mxu1 %v3188_v40  ;;  %v3158_v31 = vmul.f32 %v3009_v30, %v2803_v23  ;;  %v2805_v24 = vadd.f32 %v3918_v3, %v2452_v53  ;;  %v2808_v28 = vadd.f32 %v3927_v2, %v2455_v52  ;;  %v2457_v40 = vmul.f32 0.0, %v5877_v39  ;;  %v6142_v30 = vpop.f32.mrf.mxu1 }
 0x44e   : > { %v2809_v1 = vadd.f32 %v3930_v6, %v2456_v45  ;;  %v2458_v23 = vmul.f32 0.0, %v5903_v33  ;;  %v2812_v25 = vadd.f32 %v3939_v15, %v2459_v12  ;;  %v2813_v43 = vadd.f32 %v3942_v38, %v2460_v5  ;;  %v6701_v6 = vld [vmem:[#allocation16_spill] sm:$0xff] }
 0x44f   : > { %v2810_v10 = vadd.f32 %v3933_v63, %v2457_v40  ;;  %v2465_v63 = vmul.f32 0.0, %v6701_v6  ;;  %v6703_v40 = vld [vmem:[#allocation31_spill] sm:$0xff]  ;;  %v6704_v45 = vld [vmem:[#allocation32_spill] sm:$0xff] }
 0x450   : > { %v3014_v47 = vpop.permute.xlu1 %3013  ;;  %v3019_v18 = vpop.permute.xlu0 %3018  ;;  %v2811_v8 = vadd.f32 %v3936_v49, %v2458_v23  ;;  %v6709_v38 = vld [vmem:[#allocation36_spill] sm:$0xff] }
 0x451   : > { %v3159_v19 = vmul.f32 %v3014_v47, %v2804_v20  ;;  %v3160_v56 = vmul.f32 %v3019_v18, %v2805_v24  ;;  %v6150_v47 = vpop.f32.mrf.mxu1  ;;  %v3948_v24 = vadd.f32 %v6067_v58, %v6063_v36  ;;  %v3954_v36 = vadd.f32 %v6076_v42, %v6074_v11  ;;  %v6700_v58 = vld [vmem:[#allocation34_spill] sm:$0xff]  ;;  %v6705_v11 = vld [vmem:[#allocation37_spill] sm:$0xff] }
 0x452   : > { %v3957_v59 = vadd.f32 %v6700_v58, %v6078_v51  ;;  %v6706_v42 = vld [vmem:[#allocation38_spill] sm:$0xff] }
 0x453   : > { %v3189_v32 = vpack.c.bf16 %v3159_v19, %v3158_v31  ;;  %v2461_v19 = vmul.f32 0.0, %v5884_v7  ;;  %v6158_v34 = vpop.f32.mrf.mxu1 }
 0x454   : > { %v3024_v48 = vpop.permute.xlu1 %3023  ;;  %v3029_v29 = vpop.permute.xlu0 %3028  ;;  %v2818_v15 = vadd.f32 %v3957_v59, %v2465_v63 }
 0x455   : > { %v3161_v44 = vmul.f32 %v3024_v48, %v2806_v9  ;;  %4041 = vmatmul.mubr.bf16.vlgmr.msra.gmra.mxu1 %v3189_v32  ;;  %v3162_v60 = vmul.f32 %v3029_v29, %v2807_v14  ;;  %v2814_v27 = vadd.f32 %v3945_v55, %v2461_v19  ;;  %v2462_v9 = vmul.f32 0.0, %v5923_v26  ;;  %v6166_v48 = vpop.f32.mrf.mxu1  ;;  %v6710_v55 = vld [vmem:[#allocation41_spill] sm:$0xff] }
 0x457   : > { %v3190_v57 = vpack.c.bf16 %v3161_v44, %v3160_v56  ;;  %v2815_v56 = vadd.f32 %v3948_v24, %v2462_v9  ;;  %v2816_v44 = vadd.f32 %v3951_v21, %v2463_v4  ;;  %v6713_v24 = vld [vmem:[#allocation25_spill] sm:$0xff]  ;;  %v6716_v4 = vld [vmem:[#allocation46_spill] sm:$0xff] }
 0x458   : > { %v3034_v41 = vpop.permute.xlu1 %3033  ;;  %v3039_v35 = vpop.permute.xlu0 %3038  ;;  %v2469_v21 = vmul.f32 0.0, %v6713_v24 }
 0x459   : > { %v3163_v3 = vmul.f32 %v3034_v41, %v2808_v28  ;;  %4044 = vmatprep.mubr.bf16.mxu1 %v3190_v57  ;;  %v3164_v18 = vmul.f32 %v3039_v35, %v2809_v1  ;;  %v6702_v57 = vld [vmem:[#allocation23_spill] sm:$0xff]  ;;  %v6174_v28 = vpop.f32.mrf.mxu1 }
 0x45a   : > { %v2464_v16 = vmul.f32 0.0, %v6702_v57  ;;  %v6720_v57 = vld [vmem:[#allocation26_spill] sm:$0xff] }
 0x45b   : > { %v3191_v17 = vpack.c.bf16 %v3163_v3, %v3162_v60  ;;  %v3960_v60 = vadd.f32 %v6704_v45, %v6703_v40  ;;  %v3963_v3 = vadd.f32 %v6706_v42, %v6705_v11  ;;  %v3991_v12 = vpop.f32.mrf.mxu1  ;;  %v3978_v45 = vadd.f32 %v6114_v50, %v6112_v54 }
 0x45c   : > { %v3044_v20 = vpop.permute.xlu1 %3043  ;;  %v3049_v39 = vpop.permute.xlu0 %3048  ;;  %v2817_v49 = vadd.f32 %v3954_v36, %v2464_v16  ;;  %v2471_v16 = vmul.f32 0.0, %v6720_v57  ;;  %v3987_v50 = vadd.f32 %v6158_v34, %v6150_v47 }
 0x45d   : > { %v3165_v53 = vmul.f32 %v3044_v20, %v2810_v10  ;;  %4045 = vmatmul.mubr.bf16.gmra.mxu1 %v3191_v17  ;;  %v3166_v2 = vmul.f32 %v3049_v39, %v2811_v8  ;;  %v6707_v17 = vld [vmem:[#allocation17_spill] sm:$0xff]  ;;  %v6708_v20 = vld [vmem:[#allocation64_spill] sm:$0xff] }
 0x45e   : > { %v2466_v1 = vmul.f32 0.0, %v6707_v17  ;;  %v2467_v39 = vmul.f32 0.0, %v6708_v20 }
 0x45f   : > { %v3192_v0 = vpack.c.bf16 %v3165_v53, %v3164_v18 }
 0x460   : > { %v3054_v31 = vpop.permute.xlu1 %3053  ;;  %v3059_v33 = vpop.permute.xlu0 %3058  ;;  %v2819_v8 = vadd.f32 %v3960_v60, %v2466_v1  ;;  %v2820_v5 = vadd.f32 %v3963_v3, %v2467_v39  ;;  %v3981_v60 = vadd.f32 %v6126_v46, %v6118_v62  ;;  %v6722_v1 = vld [vmem:[#allocation28_spill] sm:$0xff]  ;;  %v3984_v39 = vadd.f32 %v6142_v30, %v6134_v61 }
 0x461   : > { %v3167_v32 = vmul.f32 %v3054_v31, %v2812_v25  ;;  %4048 = vmatprep.mubr.bf16.mxu1 %v3192_v0  ;;  %v3168_v29 = vmul.f32 %v3059_v33, %v2813_v43  ;;  %v3966_v0 = vadd.f32 %v6710_v55, %v6709_v38  ;;  %v6711_v25 = vld [vmem:[#allocation42_spill] sm:$0xff]  ;;  %v6712_v31 = vld [vmem:[#allocation68_spill] sm:$0xff]  ;;  %v3990_v61 = vadd.f32 %v6174_v28, %v6166_v48 }
 0x462   : > { %v3969_v33 = vadd.f32 %v6712_v31, %v6711_v25 }
 0x463   : > { %v3193_v37 = vpack.c.bf16 %v3167_v32, %v3166_v2 }
 0x464   : > { %v3064_v22 = vpop.permute.xlu1 %3063  ;;  %v3069_v7 = vpop.permute.xlu0 %3068 }
 0x465   : > { %v3169_v52 = vmul.f32 %v3064_v22, %v2814_v27  ;;  %4049 = vmatmul.mubr.bf16.gmra.mxu1 %v3193_v37  ;;  %v3170_v41 = vmul.f32 %v3069_v7, %v2815_v56  ;;  %v6714_v37 = vld [vmem:[#allocation29_spill] sm:$0xff]  ;;  %v3992_v27 = vpop.f32.mrf.mxu1  ;;  %v6718_v56 = vld [vmem:[#allocation40_spill] sm:$0xff] }
 0x466   : > { %v2468_v43 = vmul.f32 0.0, %v6714_v37  ;;  %v6715_v7 = vld [vmem:[#allocation45_spill] sm:$0xff]  ;;  %v3993_v30 = vadd.f32 %v3992_v27, %v3991_v12 }
 0x467   : > { %v3194_v13 = vpack.c.bf16 %v3169_v52, %v3168_v29  ;;  %v3972_v29 = vadd.f32 %v6716_v4, %v6715_v7  ;;  %v6717_v52 = vld [vmem:[#allocation35_spill] sm:$0xff]  ;;  %v3994_v58 = vpop.f32.mrf.mxu1 }
 0x468   : > { %v3074_v14 = vpop.permute.xlu1 %3073  ;;  %v3079_v26 = vpop.permute.xlu0 %3078  ;;  %v3975_v36 = vadd.f32 %v6718_v56, %v6717_v52 }
 0x469   : > { %v3171_v35 = vmul.f32 %v3074_v14, %v2816_v44  ;;  %4052 = vmatprep.mubr.bf16.mxu1 %v3194_v13  ;;  %v3172_v18 = vmul.f32 %v3079_v26, %v2817_v49  ;;  %v2821_v13 = vadd.f32 %v3966_v0, %v2468_v43  ;;  %v2822_v44 = vadd.f32 %v3969_v33, %v2469_v21  ;;  %v6719_v14 = vld [vmem:[#allocation27_spill] sm:$0xff]  ;;  %v3995_v11 = vpop.f32.mrf.mxu1  ;;  %v6724_v0 = vld [vmem:[#allocation18_spill] sm:$0xff]  ;;  %v6726_v21 = vld [vmem:[#allocation33_spill] sm:$0xff] }
 0x46a   : > { %v2470_v26 = vmul.f32 0.0, %v6719_v14  ;;  %v2824_v3 = vadd.f32 %v3975_v36, %v2471_v16  ;;  %v2475_v25 = vmul.f32 0.0, %v6724_v0  ;;  %v2476_v37 = vmul.f32 0.0, %v6726_v21  ;;  %v6727_v36 = vld [vmem:[#allocation70_spill] sm:$0xff] }
 0x46b   : > { %v3195_v51 = vpack.c.bf16 %v3171_v35, %v3170_v41  ;;  %v3997_v54 = vpop.f32.mrf.mxu1  ;;  %v2479_v48 = vmul.f32 0.0, %v6727_v36  ;;  %v3996_v28 = vadd.f32 %v3995_v11, %v3994_v58  ;;  %v6222_v58 = vld [vmem:[%s6383_s5] ss:$0 sm:$0xff]  ;;  %v3450_v36 = vld [vmem:[%s6217_s18 + $0x70] sm:$0xff] }
 0x46c   : > { %v3084_v10 = vpop.permute.xlu1 %3083  ;;  %v3089_v23 = vpop.permute.xlu0 %3088  ;;  %v2823_v40 = vadd.f32 %v3972_v29, %v2470_v26  ;;  %v2828_v47 = vadd.f32 %v3987_v50, %v2475_v25  ;;  %v2829_v29 = vadd.f32 %v3990_v61, %v2476_v37  ;;  %v3436_v11 = vld [vmem:[%s6217_s18] sm:$0xff]  ;;  %v3442_v50 = vld [vmem:[%s6217_s18 + $0x30] sm:$0xff] }
 0x46d   : > { %v3173_v53 = vmul.f32 %v3084_v10, %v2818_v15  ;;  %4053 = vmatmul.mubr.bf16.gmra.mxu1 %v3195_v51  ;;  %v3174_v9 = vmul.f32 %v3089_v23, %v2819_v8  ;;  %v6721_v15 = vld [vmem:[#allocation24_spill] sm:$0xff]  ;;  %v2472_v10 = vmul.f32 0.0, %v6722_v1  ;;  %v3998_v34 = vpop.f32.mrf.mxu1 }
 0x46e   : > { %v2473_v17 = vmul.f32 0.0, %v6721_v15  ;;  %v3999_v7 = vadd.f32 %v3998_v34, %v3997_v54 }
 0x46f   : > { %v3196_v19 = vpack.c.bf16 %v3173_v53, %v3172_v18  ;;  %v2825_v46 = vadd.f32 %v3978_v45, %v2472_v10  ;;  %v6723_v53 = vld [vmem:[#allocation66_spill] sm:$0xff]  ;;  %v3437_v10 = vld [vmem:[%s6217_s18 + $0x8] sm:$0xff] }
 0x470   : > { %v3094_v2 = vpop.permute.xlu1 %3093  ;;  %v3099_v32 = vpop.permute.xlu0 %3098  ;;  %v2826_v18 = vadd.f32 %v3981_v60, %v2473_v17  ;;  %v2474_v8 = vmul.f32 0.0, %v6723_v53  ;;  %v2832_v14 = vadd.f32 %v3999_v7, %v2479_v48 }
 0x471   : > { %v3175_v22 = vmul.f32 %v3094_v2, %v2820_v5  ;;  %4056 = vmatprep.mubr.bf16.mxu1 %v3196_v19  ;;  %v3176_v41 = vmul.f32 %v3099_v32, %v2821_v13  ;;  %v6725_v32 = vld [vmem:[#allocation30_spill] sm:$0xff] }
 0x472   : > { %v2827_v19 = vadd.f32 %v3984_v39, %v2474_v8  ;;  %v2477_v24 = vmul.f32 0.0, %v6725_v32  ;;  %v3444_v32 = vld [vmem:[%s6217_s18 + $0x40] sm:$0xff] }
 0x473   : > { %v3197_v59 = vpack.c.bf16 %v3175_v22, %v3174_v9 }
 0x474   : > { %v3104_v6 = vpop.permute.xlu1 %3103  ;;  %v3109_v63 = vpop.permute.xlu0 %3108  ;;  %v2830_v52 = vadd.f32 %v3993_v30, %v2477_v24 }
 0x475   : > { %v3177_v35 = vmul.f32 %v3104_v6, %v2822_v44  ;;  %4057 = vmatmul.mubr.bf16.gmra.mxu1 %v3197_v59  ;;  %v3178_v23 = vmul.f32 %v3109_v63, %v2823_v40  ;;  %v6728_v59 = vld [vmem:[#allocation71_spill] sm:$0xff]  ;;  %v3438_v40 = vld [vmem:[%s6217_s18 + $0x10] sm:$0xff] }
 0x476   : > { %v2478_v13 = vmul.f32 0.0, %v6728_v59 }
 0x477   : > { %v3198_v42 = vpack.c.bf16 %v3177_v35, %v3176_v41 }
 0x478   : > { %v3114_v51 = vpop.permute.xlu1 %3113  ;;  %v3119_v49 = vpop.permute.xlu0 %3118  ;;  %v2831_v63 = vadd.f32 %v3996_v28, %v2478_v13 }
 0x479   : > { %v3179_v20 = vmul.f32 %v3114_v51, %v2824_v3  ;;  %4060 = vmatprep.mubr.bf16.mxu1 %v3198_v42  ;;  %v3180_v31 = vmul.f32 %v3119_v49, %v2825_v46  ;;  %v3439_v49 = vld [vmem:[%s6217_s18 + $0x18] sm:$0xff] }
 0x47b   : > { %v3199_v62 = vpack.c.bf16 %v3179_v20, %v3178_v23 }
 0x47c   : > { %v3124_v38 = vpop.permute.xlu1 %3123  ;;  %v3129_v55 = vpop.permute.xlu0 %3128 }
 0x47d   : > { %v3181_v33 = vmul.f32 %v3124_v38, %v2826_v18  ;;  %4061 = vmatmul.mubr.bf16.gmra.mxu1 %v3199_v62  ;;  %v3182_v43 = vmul.f32 %v3129_v55, %v2827_v19  ;;  %v3440_v18 = vld [vmem:[%s6217_s18 + $0x20] sm:$0xff]  ;;  %v3443_v55 = vld [vmem:[%s6217_s18 + $0x38] sm:$0xff] }
 0x47f   : > { %v3200_v5 = vpack.c.bf16 %v3181_v33, %v3180_v31  ;;  %v3441_v33 = vld [vmem:[%s6217_s18 + $0x28] sm:$0xff] }
 0x480   : > { %v3134_v2 = vpop.permute.xlu1 %3133  ;;  %v3139_v22 = vpop.permute.xlu0 %3138 }
 0x481   : > { %v3183_v9 = vmul.f32 %v3134_v2, %v2828_v47  ;;  %4064 = vmatprep.mubr.bf16.mxu1 %v3200_v5  ;;  %v3184_v12 = vmul.f32 %v3139_v22, %v2829_v29  ;;  %v3446_v5 = vld [vmem:[%s6217_s18 + $0x50] sm:$0xff] }
 0x483   : > { %v3201_v4 = vpack.c.bf16 %v3183_v9, %v3182_v43  ;;  %v3447_v43 = vld [vmem:[%s6217_s18 + $0x58] sm:$0xff] }
 0x484   : > { %v3144_v56 = vpop.permute.xlu1 %3143 }
 0x485   : > { %v3185_v27 = vmul.f32 %v3144_v56, %v2830_v52  ;;  %4065 = vmatmul.mubr.bf16.gmra.mxu1 %v3201_v4  ;;  %v3445_v4 = vld [vmem:[%s6217_s18 + $0x48] sm:$0xff] }
 0x487   : > { %v3202_v44 = vpack.c.bf16 %v3185_v27, %v3184_v12  ;;  %v3448_v27 = vld [vmem:[%s6217_s18 + $0x60] sm:$0xff] }
 0x488   : > { %v3154_v26 = vpop.permute.xlu1 %3153 }
 0x489   : > { %v3187_v6 = vmul.f32 %v3154_v26, %v2832_v14  ;;  %4068 = vmatprep.mubr.bf16.mxu1 %v3202_v44  ;;  %v3149_v57 = vpop.permute.xlu0 %3148  ;;  %v3451_v14 = vld [vmem:[%s6217_s18 + $0x78] sm:$0xff] }
 0x48a   : > { %v3186_v16 = vmul.f32 %v3149_v57, %v2831_v63  ;;  %v3449_v57 = vld [vmem:[%s6217_s18 + $0x68] sm:$0xff] }
 0x48c   : > { %v3203_v41 = vpack.c.bf16 %v3187_v6, %v3186_v16 }
 0x48e   : > { %4069 = vmatmul.mubr.bf16.gmra.mxu1 %v3203_v41 }
 0x515   : > { %v4042_v35 = vpop.f32.mrf.mxu1 }
 0x516   : > { %v3318_v45 = vadd.f32 %v4042_v35, %v6222_v58 }
 0x517   : > { %v3309_v60 = vpop.f32.mrf.mxu1 }
 0x518   : > { %v3470_v42 = vadd.f32 %v3438_v40, %v3318_v45  ;;  %v3310_v3 = vadd.f32 %v6222_v58, %v3309_v60  ;;  %v3454_v40 = vld [vmem:[%s6217_s18 + $0x90] sm:$0xff] }
 0x519   : > { %v4043_v51 = vpop.f32.mrf.mxu1 }
 0x51a   : > { %3502 = vst [vmem:[%s6230_s28 + $0x10] sm:$0xff] %v3470_v42  ;;  %v3468_v15 = vadd.f32 %v3436_v11, %v3310_v3  ;;  %v3321_v17 = vadd.f32 %v4043_v51, %v6222_v58  ;;  %v3452_v42 = vld [vmem:[%s6217_s18 + $0x80] sm:$0xff] }
 0x51b   : > { %v3312_v1 = vpop.f32.mrf.mxu1 }
 0x51c   : > { %3500 = vst [vmem:[%s6230_s28] sm:$0xff] %v3468_v15  ;;  %v3471_v23 = vadd.f32 %v3439_v49, %v3321_v17  ;;  %v3313_v20 = vadd.f32 %v6222_v58, %v3312_v1  ;;  %v3455_v15 = vld [vmem:[%s6217_s18 + $0x98] sm:$0xff] }
 0x51d   : > { %v4046_v39 = vpop.f32.mrf.mxu1 }
 0x51e   : > { %3503 = vst [vmem:[%s6230_s28 + $0x18] sm:$0xff] %v3471_v23  ;;  %v3469_v54 = vadd.f32 %v3437_v10, %v3313_v20  ;;  %v3334_v62 = vadd.f32 %v4046_v39, %v6222_v58  ;;  %v3453_v23 = vld [vmem:[%s6217_s18 + $0x88] sm:$0xff] }
 0x51f   : > { %v3325_v46 = vpop.f32.mrf.mxu1 }
 0x520   : > { %3501 = vst [vmem:[%s6230_s28 + $0x8] sm:$0xff] %v3469_v54  ;;  %v3474_v53 = vadd.f32 %v3442_v50, %v3334_v62  ;;  %v3326_v8 = vadd.f32 %v6222_v58, %v3325_v46  ;;  %v3458_v54 = vld [vmem:[%s6217_s18 + $0xb0] sm:$0xff] }
 0x521   : > { %v4047_v38 = vpop.f32.mrf.mxu1 }
 0x522   : > { %3506 = vst [vmem:[%s6230_s28 + $0x30] sm:$0xff] %v3474_v53  ;;  %v3472_v0 = vadd.f32 %v3440_v18, %v3326_v8  ;;  %v3337_v25 = vadd.f32 %v4047_v38, %v6222_v58  ;;  %v3456_v53 = vld [vmem:[%s6217_s18 + $0xa0] sm:$0xff] }
 0x523   : > { %v3328_v31 = vpop.f32.mrf.mxu1 }
 0x524   : > { %3504 = vst [vmem:[%s6230_s28 + $0x20] sm:$0xff] %v3472_v0  ;;  %v3475_v19 = vadd.f32 %v3443_v55, %v3337_v25  ;;  %v3329_v61 = vadd.f32 %v6222_v58, %v3328_v31  ;;  %v3459_v0 = vld [vmem:[%s6217_s18 + $0xb8] sm:$0xff] }
 0x525   : > { %v4050_v30 = vpop.f32.mrf.mxu1 }
 0x526   : > { %3507 = vst [vmem:[%s6230_s28 + $0x38] sm:$0xff] %v3475_v19  ;;  %v3473_v47 = vadd.f32 %v3441_v33, %v3329_v61  ;;  %v3350_v34 = vadd.f32 %v4050_v30, %v6222_v58  ;;  %v3457_v19 = vld [vmem:[%s6217_s18 + $0xa8] sm:$0xff] }
 0x527   : > { %v3341_v2 = vpop.f32.mrf.mxu1 }
 0x528   : > { %3505 = vst [vmem:[%s6230_s28 + $0x28] sm:$0xff] %v3473_v47  ;;  %v3478_v24 = vadd.f32 %v3446_v5, %v3350_v34  ;;  %v3342_v21 = vadd.f32 %v6222_v58, %v3341_v2  ;;  %v3462_v47 = vld [vmem:[%s6217_s18 + $0xd0] sm:$0xff] }
 0x529   : > { %v4051_v37 = vpop.f32.mrf.mxu1 }
 0x52a   : > { %3510 = vst [vmem:[%s6230_s28 + $0x50] sm:$0xff] %v3478_v24  ;;  %v3476_v9 = vadd.f32 %v3444_v32, %v3342_v21  ;;  %v3353_v22 = vadd.f32 %v4051_v37, %v6222_v58  ;;  %v3460_v24 = vld [vmem:[%s6217_s18 + $0xc0] sm:$0xff] }
 0x52b   : > { %v3344_v7 = vpop.f32.mrf.mxu1 }
 0x52c   : > { %3508 = vst [vmem:[%s6230_s28 + $0x40] sm:$0xff] %v3476_v9  ;;  %v3479_v29 = vadd.f32 %v3447_v43, %v3353_v22  ;;  %v3345_v52 = vadd.f32 %v6222_v58, %v3344_v7  ;;  %v3463_v9 = vld [vmem:[%s6217_s18 + $0xd8] sm:$0xff] }
 0x52d   : > { %v4054_v56 = vpop.f32.mrf.mxu1 }
 0x52e   : > { %3511 = vst [vmem:[%s6230_s28 + $0x58] sm:$0xff] %v3479_v29  ;;  %v3477_v48 = vadd.f32 %v3445_v4, %v3345_v52  ;;  %v3366_v28 = vadd.f32 %v4054_v56, %v6222_v58  ;;  %v3461_v29 = vld [vmem:[%s6217_s18 + $0xc8] sm:$0xff] }
 0x52f   : > { %v3357_v12 = vpop.f32.mrf.mxu1 }
 0x530   : > { %3509 = vst [vmem:[%s6230_s28 + $0x48] sm:$0xff] %v3477_v48  ;;  %v3482_v59 = vadd.f32 %v3450_v36, %v3366_v28  ;;  %v3358_v13 = vadd.f32 %v6222_v58, %v3357_v12  ;;  %v3466_v28 = vld [vmem:[%s6217_s18 + $0xf0] sm:$0xff] }
 0x531   : > { %v4055_v44 = vpop.f32.mrf.mxu1 }
 0x532   : > { %3514 = vst [vmem:[%s6230_s28 + $0x70] sm:$0xff] %v3482_v59  ;;  %v3480_v26 = vadd.f32 %v3448_v27, %v3358_v13  ;;  %v3369_v6 = vadd.f32 %v4055_v44, %v6222_v58  ;;  %v3464_v59 = vld [vmem:[%s6217_s18 + $0xe0] sm:$0xff] }
 0x533   : > { %v3360_v63 = vpop.f32.mrf.mxu1 }
 0x534   : > { %3512 = vst [vmem:[%s6230_s28 + $0x60] sm:$0xff] %v3480_v26  ;;  %v3483_v16 = vadd.f32 %v3451_v14, %v3369_v6  ;;  %v3361_v41 = vadd.f32 %v6222_v58, %v3360_v63  ;;  %v3467_v26 = vld [vmem:[%s6217_s18 + $0xf8] sm:$0xff] }
 0x535   : > { %v4058_v35 = vpop.f32.mrf.mxu1 }
 0x536   : > { %3515 = vst [vmem:[%s6230_s28 + $0x78] sm:$0xff] %v3483_v16  ;;  %v3481_v45 = vadd.f32 %v3449_v57, %v3361_v41  ;;  %v3382_v60 = vadd.f32 %v4058_v35, %v6222_v58  ;;  %v3465_v16 = vld [vmem:[%s6217_s18 + $0xe8] sm:$0xff]  ;;  %s4469_s18 = scalar_lea.vmem %s4468_s17, 8192 }
 0x537   : > { %v3373_v11 = vpop.f32.mrf.mxu1  ;;  %p4471_p6 = scmp.lt.s32.totalorder %s4469_s18, %s4463_s15 }
 0x538   : > { %3513 = vst [vmem:[%s6230_s28 + $0x68] sm:$0xff] %v3481_v45  ;;  %v3486_v3 = vadd.f32 %v3454_v40, %v3382_v60  ;;  %v3374_v51 = vadd.f32 %v6222_v58, %v3373_v11 }
 0x539   : > { %v4059_v49 = vpop.f32.mrf.mxu1  ;;  %p4472_p7 = por %p4471_p6, %p4470_p4 }
 0x53a   : > { %3518 = vst [vmem:[%s6230_s28 + $0x90] sm:$0xff] %v3486_v3  ;;  %v3484_v17 = vadd.f32 %v3452_v42, %v3374_v51  ;;  %v3385_v1 = vadd.f32 %v4059_v49, %v6222_v58 }
 0x53b   : > { %v3376_v10 = vpop.f32.mrf.mxu1  ;;  %p4473_p8 = pnand %p4472_p7, %p4466_p3 }
 0x53c   : > { %3516 = vst [vmem:[%s6230_s28 + $0x80] sm:$0xff] %v3484_v17  ;;  %v3487_v20 = vadd.f32 %v3455_v15, %v3385_v1  ;;  %v3377_v39 = vadd.f32 %v6222_v58, %v3376_v10 }
 0x53d   : > { %v4062_v50 = vpop.f32.mrf.mxu1 }
 0x53e   : > { %3519 = vst [vmem:[%s6230_s28 + $0x98] sm:$0xff] %v3487_v20  ;;  %v3485_v62 = vadd.f32 %v3453_v23, %v3377_v39  ;;  %v3398_v46 = vadd.f32 %v4062_v50, %v6222_v58 }
 0x53f   : > { %v3389_v18 = vpop.f32.mrf.mxu1 }
 0x540   : > { %3517 = vst [vmem:[%s6230_s28 + $0x88] sm:$0xff] %v3485_v62  ;;  %v3490_v8 = vadd.f32 %v3458_v54, %v3398_v46  ;;  %v3390_v38 = vadd.f32 %v6222_v58, %v3389_v18 }
 0x541   : > { %v4063_v55 = vpop.f32.mrf.mxu1 }
 0x542   : > { %3522 = vst [vmem:[%s6230_s28 + $0xb0] sm:$0xff] %v3490_v8  ;;  %v3488_v25 = vadd.f32 %v3456_v53, %v3390_v38  ;;  %v3401_v31 = vadd.f32 %v4063_v55, %v6222_v58 }
 0x543   : > { %v3392_v33 = vpop.f32.mrf.mxu1 }
 0x544   : > { %3520 = vst [vmem:[%s6230_s28 + $0xa0] sm:$0xff] %v3488_v25  ;;  %v3491_v61 = vadd.f32 %v3459_v0, %v3401_v31  ;;  %v3393_v30 = vadd.f32 %v6222_v58, %v3392_v33 }
 0x545   : > { %v4066_v5 = vpop.f32.mrf.mxu1 }
 0x546   : > { %3523 = vst [vmem:[%s6230_s28 + $0xb8] sm:$0xff] %v3491_v61  ;;  %v3489_v34 = vadd.f32 %v3457_v19, %v3393_v30  ;;  %v3414_v2 = vadd.f32 %v4066_v5, %v6222_v58 }
 0x547   : > { %v3405_v32 = vpop.f32.mrf.mxu1 }
 0x548   : > { %3521 = vst [vmem:[%s6230_s28 + $0xa8] sm:$0xff] %v3489_v34  ;;  %v3494_v21 = vadd.f32 %v3462_v47, %v3414_v2  ;;  %v3406_v37 = vadd.f32 %v6222_v58, %v3405_v32 }
 0x549   : > { %v4067_v43 = vpop.f32.mrf.mxu1 }
 0x54a   : > { %3526 = vst [vmem:[%s6230_s28 + $0xd0] sm:$0xff] %v3494_v21  ;;  %v3492_v22 = vadd.f32 %v3460_v24, %v3406_v37  ;;  %v3417_v7 = vadd.f32 %v4067_v43, %v6222_v58 }
 0x54b   : > { %v3408_v4 = vpop.f32.mrf.mxu1 }
 0x54c   : > { %3524 = vst [vmem:[%s6230_s28 + $0xc0] sm:$0xff] %v3492_v22  ;;  %v3495_v52 = vadd.f32 %v3463_v9, %v3417_v7  ;;  %v3409_v56 = vadd.f32 %v6222_v58, %v3408_v4 }
 0x54e   : > { %3527 = vst [vmem:[%s6230_s28 + $0xd8] sm:$0xff] %v3495_v52  ;;  %v3493_v36 = vadd.f32 %v3461_v29, %v3409_v56  ;;  %v4070_v48 = vpop.f32.mrf.mxu1 }
 0x54f   : > { %v3430_v12 = vadd.f32 %v4070_v48, %v6222_v58 }
 0x550   : > { %3525 = vst [vmem:[%s6230_s28 + $0xc8] sm:$0xff] %v3493_v36  ;;  %v3421_v27 = vpop.f32.mrf.mxu1 }
 0x551   : > { %v3498_v13 = vadd.f32 %v3466_v28, %v3430_v12  ;;  %v3422_v44 = vadd.f32 %v6222_v58, %v3421_v27 }
 0x552   : > { %v4071_v14 = vpop.f32.mrf.mxu1 }
 0x553   : > { %3530 = vst [vmem:[%s6230_s28 + $0xf0] sm:$0xff] %v3498_v13  ;;  %v3496_v6 = vadd.f32 %v3464_v59, %v3422_v44  ;;  %v3433_v63 = vadd.f32 %v4071_v14, %v6222_v58 }
 0x554   : > { %v3424_v57 = vpop.f32.mrf.mxu1 }
 0x555   : > { %3528 = vst [vmem:[%s6230_s28 + $0xe0] sm:$0xff] %v3496_v6  ;;  %v3499_v41 = vadd.f32 %v3467_v26, %v3433_v63  ;;  %v3425_v35 = vadd.f32 %v6222_v58, %v3424_v57 }
 0x557   : > { %3531 = vst [vmem:[%s6230_s28 + $0xf8] sm:$0xff] %v3499_v41  ;;  %v3497_v40 = vadd.f32 %v3465_v16, %v3425_v35 }
 0x559   : > { %3529 = vst [vmem:[%s6230_s28 + $0xe8] sm:$0xff] %v3497_v40 }
 0x55a   : > { %4476 = shalt.err (!%p4473_p8)
}
 0x55b   : > { %s4477_s7 = scalar_lea.hbm %s6326_s14, 4096  ;;  %s4481_s28 = scalar_lea.hbm %s6384_s6, 8192 }
 0x55c   : > { %p4478_p11 = scmp.ne.s32.totalorder %s6326_s14, %s4477_s7  ;;  %p4482_p0 = scmp.lt.s32.totalorder %s6326_s14, %s6384_s6 }
 0x55d   : > { %p4483_p1 = scmp.lt.s32.totalorder %s4481_s28, %s4477_s7 }
 0x55e   : > { %p4479_p12 = pnand %p4478_p11, %p4625_p5 }
 0x55f   : > { %p4484_p2 = por %p4483_p1, %p4482_p0 }
 0x560   : > { %p4480_p13 = pneg %p4479_p12 }
 0x562   : > { %p4485_p3 = pnand %p4484_p2, %p4480_p13 }
 0x564   : > { %4488 = shalt.err (!%p4485_p3)
}
 0x565   : > { %s4545_s13 = smov 128   ;;  %s4546_s15 = smov 8  }
 0x566   : > { %4089 = dma.vmem_to_hbm [thread:$0]  (%p4625_p5), %s6328_s9, 4096, %s6326_s14, %s3533_s24, %s4545_s13, %s4545_s13, %s4546_s15  }
 0x567 PF: > { %s3563_s16 = sand.u32 1, %s4519_s21   ;;  %p4092_p4 = pnand %p3698_p10, %p4636_p9 }
 0x568   : > { %s3564_s17 = scalar_lea.sflag [#allocation9], %s3563_s16 }
 0x569   : > { %p4093_p6 = pneg %p4092_p4 }
 0x56b   : > { %4514 = dma.done.wait (%p4093_p6), %s3564_s17, 4096  }
 0x56c   : > { %4516 = vsyncadd (%p4093_p6), %s3564_s17, 4294963200  ;;  %s19_s26 = sadd.s32 1, %s4539_s26   ;;  %s6729_s21 = smov %s4523_s22 }
 0x56d   : > { %p16_p7 = scmp.ge.s32.totalorder %s19_s26, 4   ;;  %s6730_s22 = smov %s4527_s23 }
 0x56e   : > { %s6731_s23 = smov %s4634_s10  ;;  %s6732_s24 = smov %s4535_s25 }
 0x56f   : > { %s6733_s25 = smov %s6735_s29  ;;  %18 = sbr.rel (!%p16_p7) target bundleno = 4 (0x4), region = 234 }
 0x574   :  { %3569 = vsyncpa [#allocation9], 1 }
 0x575   :  { %3571 = vsyncpa [#allocation9 + $0x1], 1 }

</bundles_post_ra>
